<compile_context>
chip_gen: v6e
topology: v6e:2x2x1
jax: 0.10.0
libtpu: 0.0.40
codegen_flags: <defaults>
</compile_context>

<pallas_src>
import functools

import jax
import jax.numpy as jnp
from jax import lax
from jax.experimental import pallas as pl
from jax.experimental.pallas import tpu as pltpu


def _round_up(x: int, m: int) -> int:
    return (x + m - 1) // m * m


def _vmem_capacity_bytes() -> int:
    try:
        info = pltpu.get_tpu_info()
        cap = getattr(info, "vmem_capacity_bytes", None)
        if cap:
            return int(cap)
    except Exception:
        pass
    return 64 * 2 ** 20  # conservative fallback (v7x per-core VMEM)


def _lstm_kernel(x4_ref, gate_ref, wih0_ref, whh0_ref, b0_ref, w1_ref, b1_ref,
                 out_ref, hid_ref, g0_ref):
    """One batch-group program (everything resident in VMEM).

    x4_ref   : [S, Bg, 4H]   bf16  time-major packed concat [Y, Xp, Xn, Ix]
    gate_ref : [Bg, 4H]      f32   per-batch gate (ones in the Y block)
    wih0_ref : [4H, G]       bf16  layer-0 input weight (G = 4*Op)
    whh0_ref : [Op, G]       bf16  layer-0 recurrent weight
    b0_ref   : [1, G]        f32   layer-0 bias (b_ih + b_hh)
    w1_ref   : [2*Op, G]     bf16  vstack(Wih1, Whh1)
    b1_ref   : [1, G]        f32   layer-1 bias (b_ih + b_hh)
    out_ref  : [S, Bg, Op]   f32   layer-1 hidden per step
    hid_ref  : [Bg, Op]      f32   final hidden state of LAYER 0
    g0_ref   : [S, Bg, G]    bf16  VMEM scratch (precomputed layer-0 input proj)
    """
    S, Bg, H4 = x4_ref.shape
    _, Op = hid_ref.shape
    G = 4 * Op

    # ---- hoisted gating: one VPU pass over the whole sequence --------------
    xg = (x4_ref[...] * gate_ref[...][None, :, :]).astype(jnp.bfloat16)

    # ---- layer-0 input projection for ALL timesteps: single K=4H matmul ----
    g0 = (jnp.dot(xg.reshape(S * Bg, H4), wih0_ref[...],
                  preferred_element_type=jnp.float32) + b0_ref[...])
    g0_ref[...] = g0.reshape(S, Bg, G).astype(g0_ref.dtype)

    whh0 = whh0_ref[...]
    w1 = w1_ref[...]
    b1 = jnp.broadcast_to(b1_ref[...], (Bg, G))            # hoisted broadcast

    def cell(pre, c):
        # PyTorch gate order along the last dim: [i, f, g, o]; Op is a multiple
        # of 128 so every slice is lane-aligned.
        i_g = jax.nn.sigmoid(pre[:, 0 * Op:1 * Op])
        f_g = jax.nn.sigmoid(pre[:, 1 * Op:2 * Op])
        g_g = jnp.tanh(pre[:, 2 * Op:3 * Op])
        o_g = jax.nn.sigmoid(pre[:, 3 * Op:4 * Op])
        c_new = f_g * c + i_g * g_g
        return o_g * jnp.tanh(c_new), c_new

    def l0_step(t, h0, c0):
        pre0 = (g0_ref[t].astype(jnp.float32)
                + jnp.dot(h0.astype(jnp.bfloat16), whh0,
                          preferred_element_type=jnp.float32))
        return cell(pre0, c0)

    def l1_step(t, h0, h1, c1):
        # fused recurrent matmul: [h0, h1] @ [[Wih1]; [Whh1]]
        h01 = jnp.concatenate(
            [h0.astype(jnp.bfloat16), h1.astype(jnp.bfloat16)], axis=-1)
        pre1 = jnp.dot(h01, w1, preferred_element_type=jnp.float32) + b1
        h1n, c1n = cell(pre1, c1)
        out_ref[t] = h1n.astype(out_ref.dtype)
        return h1n, c1n

    # ---- skewed (software-pipelined) recurrence -----------------------------
    z = jnp.zeros((Bg, Op), jnp.float32)
    h0, c0 = cell(g0_ref[0].astype(jnp.float32), z)        # layer-0, t=0 (h0_init=0)
    carry = (h0, c0, z, z)

    def body(t, carry):
        h0, c0, h1, c1 = carry
        h0n, c0n = l0_step(t, h0, c0)                      # layer-0 step t
        h1n, c1n = l1_step(t - 1, h0, h1, c1)              # layer-1 step t-1 (independent)
        return (h0n, c0n, h1n, c1n)

    if S <= 32 and Bg <= 16:
        # full static unroll: maximal scheduler visibility, static offsets
        for t in range(1, S):
            carry = body(t, carry)
    else:
        unroll = 8 if Bg <= 16 else (4 if Bg <= 32 else 2)
        carry = lax.fori_loop(1, S, body, carry, unroll=unroll)

    h0, c0, h1, c1 = carry
    l1_step(S - 1, h0, h1, c1)                             # epilogue: layer-1, t=S-1
    hid_ref[...] = h0.astype(hid_ref.dtype)                # final layer-0 hidden


def init_params(key, hidden_dim, output_dim):
    """Uniform(-k, k), k = 1/sqrt(output_dim), PyTorch-style. Weights stored
    transposed as [in_features, 4*O]; biases are (b_ih + b_hh), shape [1, 4*O]."""
    H, O = hidden_dim, output_dim
    k = 1.0 / float(O) ** 0.5
    keys = jax.random.split(key, 8)

    def u(kk, shape):
        return jax.random.uniform(kk, shape, jnp.float32, -k, k)

    return {
        "wih0T": u(keys[0], (4 * H, 4 * O)),
        "whh0T": u(keys[1], (O, 4 * O)),
        "b0": u(keys[2], (1, 4 * O)) + u(keys[3], (1, 4 * O)),
        "wih1T": u(keys[4], (O, 4 * O)),
        "whh1T": u(keys[5], (O, 4 * O)),
        "b1": u(keys[6], (1, 4 * O)) + u(keys[7], (1, 4 * O)),
    }


def _pad_gate_cols(w, O, Op):
    """[in, 4*O] -> [in, 4*Op]: zero-pad each of the 4 gate column blocks."""
    if Op == O:
        return w
    n_in = w.shape[0]
    w = w.reshape(n_in, 4, O)
    w = jnp.pad(w, ((0, 0), (0, 0), (0, Op - O)))
    return w.reshape(n_in, 4 * Op)


def _pad_rows(w, D, Dp):
    if Dp == D:
        return w
    return jnp.pad(w, ((0, Dp - D), (0, 0)))


def prepare_kernel_params(params):
    """Pad / pack / cast the LSTM weights to kernel layout ONCE (outside jit).
    Padding is all-zero, which keeps padded lanes exactly 0 through the cell."""
    H = params["wih0T"].shape[0] // 4
    O = params["whh0T"].shape[0]
    Op = _round_up(max(O, 128), 128)
    wih0 = _pad_gate_cols(params["wih0T"], O, Op).astype(jnp.bfloat16)
    whh0 = _pad_rows(_pad_gate_cols(params["whh0T"], O, Op), O, Op).astype(jnp.bfloat16)
    wih1 = _pad_rows(_pad_gate_cols(params["wih1T"], O, Op), O, Op)
    whh1 = _pad_rows(_pad_gate_cols(params["whh1T"], O, Op), O, Op)
    w1 = jnp.concatenate([wih1, whh1], axis=0).astype(jnp.bfloat16)   # [2*Op, 4*Op]
    b0 = _pad_gate_cols(params["b0"], O, Op).astype(jnp.float32)
    b1 = _pad_gate_cols(params["b1"], O, Op).astype(jnp.float32)
    return {"wih0": wih0, "whh0": whh0, "b0": b0, "w1": w1, "b1": b1}


@functools.partial(jax.jit, static_argnames=("output_dim",))
def multi_input_lstm_with_gates(Y, X_p, X_n, Index, self_gate, kparams, *, output_dim):
    """Wrapper mirroring MultiInputLSTMWithGates.forward (eval mode).

    self_gate may be [B, H] (broadcast over seq) or [B, S, H]."""
    B, S, H = Y.shape
    O = output_dim
    G4 = kparams["wih0"].shape[1]
    Op = G4 // 4
    assert kparams["wih0"].shape[0] == 4 * H
    assert self_gate.ndim in (2, 3)

    # Batch groups: a "parallel" grid axis so v7x's two TensorCores can each
    # run an independent batch slice (only engaged for B >= 16).
    NB = 2 if B >= 16 else 1
    Bp = _round_up(max(B, 8), 8 * NB)
    Bg = Bp // NB

    # 4-way feature concat; gating of Xp/Xn/Ix happens in-kernel via a small
    # per-batch gate vector (no [B,S,H] gate broadcast materialized in HBM).
    x4 = jnp.concatenate([Y, X_p, X_n, Index], axis=-1)                 # [B, S, 4H]
    if self_gate.ndim == 3:
        # time-varying gate: fold it into the (already existing) pack fusion
        x4 = x4 * jnp.concatenate(
            [jnp.ones_like(self_gate), self_gate, self_gate, self_gate], axis=-1)
        gate4 = jnp.ones((B, 4 * H), jnp.float32)
    else:
        gate4 = jnp.concatenate(
            [jnp.ones_like(self_gate), self_gate, self_gate, self_gate], axis=-1)

    # pack: pad batch, group, time-major within group, cast to bf16 (half DMA)
    x4 = jnp.pad(x4, ((0, Bp - B), (0, 0), (0, 0)))
    x4 = x4.reshape(NB, Bg, S, 4 * H).transpose(0, 2, 1, 3)             # [NB, S, Bg, 4H]
    x4 = x4.astype(jnp.bfloat16)
    gate4 = jnp.pad(gate4, ((0, Bp - B), (0, 0))).reshape(NB, Bg, 4 * H)
    gate4 = gate4.astype(jnp.float32)

    # VMEM budget: derive the limit from the chip's physical VMEM (~80%).
    need = (2 * S * Bg * 4 * H * 2          # x4 (bf16, double-buffered)
            + 2 * Bg * 4 * H * 4            # gate (f32)
            + (4 * H + 3 * Op) * G4 * 2     # weights (bf16)
            + 2 * G4 * 4                    # biases (f32)
            + 2 * (S * Bg + Bg) * Op * 4    # outputs (f32, double-buffered)
            + 2 * S * Bg * G4 * 2           # g0 scratch (bf16) + packing slack
            + 2 * S * Bg * 4 * H * 4)       # gated f32 temporaries
    cap = _vmem_capacity_bytes()
    vmem_limit = int(min(max(2 * need, 32 * 2 ** 20), int(0.8 * cap)))

    grid_spec = pltpu.PrefetchScalarGridSpec(
        num_scalar_prefetch=0,
        grid=(NB,),
        in_specs=[
            pl.BlockSpec((None, S, Bg, 4 * H), lambda g: (g, 0, 0, 0)),
            pl.BlockSpec((None, Bg, 4 * H), lambda g: (g, 0, 0)),
            pl.BlockSpec((4 * H, G4), lambda g: (0, 0)),
            pl.BlockSpec((Op, G4), lambda g: (0, 0)),
            pl.BlockSpec((1, G4), lambda g: (0, 0)),
            pl.BlockSpec((2 * Op, G4), lambda g: (0, 0)),
            pl.BlockSpec((1, G4), lambda g: (0, 0)),
        ],
        out_specs=(
            pl.BlockSpec((None, S, Bg, Op), lambda g: (g, 0, 0, 0)),
            pl.BlockSpec((None, Bg, Op), lambda g: (g, 0, 0)),
        ),
        scratch_shapes=[pltpu.VMEM((S, Bg, G4), jnp.bfloat16)],
    )

    out4, hid_p = pl.pallas_call(
        _lstm_kernel,
        out_shape=(jax.ShapeDtypeStruct((NB, S, Bg, Op), jnp.float32),
                   jax.ShapeDtypeStruct((NB, Bg, Op), jnp.float32)),
        grid_spec=grid_spec,
        compiler_params=pltpu.CompilerParams(
            dimension_semantics=("parallel",),
            vmem_limit_bytes=vmem_limit),
    )(x4, gate4, kparams["wih0"], kparams["whh0"], kparams["b0"],
      kparams["w1"], kparams["b1"])

    out = out4.transpose(0, 2, 1, 3).reshape(Bp, S, Op)                 # [Bp, S, Op]
    output = out[:B, :, :O]                                             # [B, S, O]
    hidden0 = hid_p.reshape(Bp, Op)[:B, :O]                             # [B, O]
    return output, hidden0


def _reference_forward(Y, X_p, X_n, Index, self_gate, params):
    """Pure-JAX f32 reference of the PyTorch forward (eval mode)."""
    if self_gate.ndim == 2:
        self_gate = self_gate[:, None, :]
    x = jnp.concatenate(
        [Y, X_p * self_gate, X_n * self_gate, Index * self_gate], axis=-1)
    B, S, _ = x.shape
    O = params["whh0T"].shape[0]

    def cell(x_t, h, c, w_ih, w_hh, b):
        g = x_t @ w_ih + h @ w_hh + b
        i = jax.nn.sigmoid(g[:, 0 * O:1 * O])
        f = jax.nn.sigmoid(g[:, 1 * O:2 * O])
        gg = jnp.tanh(g[:, 2 * O:3 * O])
        o = jax.nn.sigmoid(g[:, 3 * O:4 * O])
        c = f * c + i * gg
        return o * jnp.tanh(c), c

    h0 = c0 = h1 = c1 = jnp.zeros((B, O), jnp.float32)
    outs = []
    for t in range(S):
        h0, c0 = cell(x[:, t], h0, c0, params["wih0T"], params["whh0T"], params["b0"])
        h1, c1 = cell(h0, h1, c1, params["wih1T"], params["whh1T"], params["b1"])
        outs.append(h1)
    return jnp.stack(outs, axis=1), h0


if __name__ == "__main__":
    B, S, H, O = 2, 8, 32, 32   # batch, seq, hidden_dim, output_dim

    key = jax.random.PRNGKey(0)
    k_y, k_p, k_n, k_i, k_g, k_w = jax.random.split(key, 6)

    Y = jax.random.normal(k_y, (B, S, H), jnp.float32)
    X_p = jax.random.normal(k_p, (B, S, H), jnp.float32)
    X_n = jax.random.normal(k_n, (B, S, H), jnp.float32)
    Index = jax.random.normal(k_i, (B, S, H), jnp.float32)
    self_gate = jax.random.uniform(k_g, (B, H), jnp.float32)

    params = init_params(k_w, H, O)
    kparams = prepare_kernel_params(params)      # pad/pack/bf16 once, outside jit

    output, hidden0 = multi_input_lstm_with_gates(
        Y, X_p, X_n, Index, self_gate, kparams, output_dim=O)
    jax.block_until_ready((output, hidden0))

    assert output.shape == (B, S, O)
    assert hidden0.shape == (B, O)

    # Loose tolerance: bf16 MXU operands + bf16 projection scratch, f32 accumulation.
    ref_out, ref_hid = _reference_forward(Y, X_p, X_n, Index, self_gate, params)
    assert float(jnp.max(jnp.abs(output - ref_out))) < 0.1
    assert float(jnp.max(jnp.abs(hidden0 - ref_hid))) < 0.1

    print("KERNEL_OK")
</pallas_src>

<mosaic_0001>
module attributes {stable_mosaic.version = 11 : i64} {
  func.func @_lstm_kernel(%arg0: i32, %arg1: memref<1x8x8x128xbf16, #tpu.memory_space<vmem>>, %arg2: memref<1x8x128xf32, #tpu.memory_space<vmem>>, %arg3: memref<128x512xbf16, #tpu.memory_space<vmem>>, %arg4: memref<128x512xbf16, #tpu.memory_space<vmem>>, %arg5: memref<1x512xf32, #tpu.memory_space<vmem>>, %arg6: memref<256x512xbf16, #tpu.memory_space<vmem>>, %arg7: memref<1x512xf32, #tpu.memory_space<vmem>>, %arg8: memref<1x8x8x128xf32, #tpu.memory_space<vmem>>, %arg9: memref<1x8x128xf32, #tpu.memory_space<vmem>>, %arg10: memref<8x8x512xbf16, #tpu.memory_space<vmem>>) attributes {dimension_semantics = [#tpu.dimension_semantics<parallel>], iteration_bounds = array<i64: 1>, scalar_prefetch = 0 : i64, scratch_operands = 1 : i64, tpu.core_type = #tpu.core_type<tc>, window_params = [{transform_indices = @transform_0, window_bounds = array<i64: 1, 8, 8, 128>}, {transform_indices = @transform_1, window_bounds = array<i64: 1, 8, 128>}, {pipeline_mode = #tpu.pipeline_mode<synchronous>, transform_indices = @transform_2, window_bounds = array<i64: 128, 512>}, {pipeline_mode = #tpu.pipeline_mode<synchronous>, transform_indices = @transform_3, window_bounds = array<i64: 128, 512>}, {pipeline_mode = #tpu.pipeline_mode<synchronous>, transform_indices = @transform_4, window_bounds = array<i64: 1, 512>}, {pipeline_mode = #tpu.pipeline_mode<synchronous>, transform_indices = @transform_5, window_bounds = array<i64: 256, 512>}, {pipeline_mode = #tpu.pipeline_mode<synchronous>, transform_indices = @transform_6, window_bounds = array<i64: 1, 512>}, {transform_indices = @transform_7, window_bounds = array<i64: 1, 8, 8, 128>}, {transform_indices = @transform_8, window_bounds = array<i64: 1, 8, 128>}]} {
    %c0 = arith.constant 0 : index
    %c0_0 = arith.constant 0 : index
    %c0_1 = arith.constant 0 : index
    %c0_2 = arith.constant 0 : index
    %0 = vector.load %arg1[%c0, %c0_0, %c0_1, %c0_2] : memref<1x8x8x128xbf16, #tpu.memory_space<vmem>>, vector<1x8x8x128xbf16>
    %1 = vector.shape_cast %0 : vector<1x8x8x128xbf16> to vector<8x8x128xbf16>
    %c0_3 = arith.constant 0 : index
    %c0_4 = arith.constant 0 : index
    %c0_5 = arith.constant 0 : index
    %2 = vector.load %arg2[%c0_3, %c0_4, %c0_5] : memref<1x8x128xf32, #tpu.memory_space<vmem>>, vector<1x8x128xf32>
    %3 = vector.shape_cast %2 : vector<1x8x128xf32> to vector<8x128xf32>
    %4 = vector.shape_cast %3 : vector<8x128xf32> to vector<1x8x128xf32>
    %5 = arith.extf %1 : vector<8x8x128xbf16> to vector<8x8x128xf32>
    %6 = vector.broadcast %4 : vector<1x8x128xf32> to vector<8x8x128xf32>
    %7 = arith.mulf %5, %6 : vector<8x8x128xf32>
    %8 = arith.truncf %7 : vector<8x8x128xf32> to vector<8x8x128xbf16>
    %9 = vector.shape_cast %8 : vector<8x8x128xbf16> to vector<64x128xbf16>
    %c0_6 = arith.constant 0 : index
    %c0_7 = arith.constant 0 : index
    %10 = vector.load %arg3[%c0_6, %c0_7] : memref<128x512xbf16, #tpu.memory_space<vmem>>, vector<128x512xbf16>
    %cst = arith.constant dense<0.000000e+00> : vector<64x512xf32>
    %11 = tpu.matmul %9, %10, %cst {dimension_numbers = #tpu.dot_dimension_numbers<[1], [0], [0], [1], [0, 0, 1, 1], [], []>} : vector<64x128xbf16>, vector<128x512xbf16>, vector<64x512xf32> -> vector<64x512xf32>
    %c0_8 = arith.constant 0 : index
    %c0_9 = arith.constant 0 : index
    %12 = vector.load %arg5[%c0_8, %c0_9] : memref<1x512xf32, #tpu.memory_space<vmem>>, vector<1x512xf32>
    %13 = vector.broadcast %12 : vector<1x512xf32> to vector<64x512xf32>
    %14 = arith.addf %11, %13 : vector<64x512xf32>
    %15 = vector.shape_cast %14 : vector<64x512xf32> to vector<8x8x512xf32>
    %16 = arith.truncf %15 : vector<8x8x512xf32> to vector<8x8x512xbf16>
    %c0_10 = arith.constant 0 : index
    %c0_11 = arith.constant 0 : index
    %c0_12 = arith.constant 0 : index
    %17 = vector.load %arg10[%c0_10, %c0_11, %c0_12] : memref<8x8x512xbf16, #tpu.memory_space<vmem>>, vector<8x8x512xbf16>
    tpu.vector_store %arg10[%c0_10, %c0_11, %c0_12], %16 {strides = array<i32>} : memref<8x8x512xbf16, #tpu.memory_space<vmem>>, vector<8x8x512xbf16>,
    %c0_13 = arith.constant 0 : index
    %c0_14 = arith.constant 0 : index
    %18 = vector.load %arg4[%c0_13, %c0_14] : memref<128x512xbf16, #tpu.memory_space<vmem>>, vector<128x512xbf16>
    %c0_15 = arith.constant 0 : index
    %c0_16 = arith.constant 0 : index
    %19 = vector.load %arg6[%c0_15, %c0_16] : memref<256x512xbf16, #tpu.memory_space<vmem>>, vector<256x512xbf16>
    %c0_17 = arith.constant 0 : index
    %c0_18 = arith.constant 0 : index
    %20 = vector.load %arg7[%c0_17, %c0_18] : memref<1x512xf32, #tpu.memory_space<vmem>>, vector<1x512xf32>
    %21 = vector.shape_cast %20 : vector<1x512xf32> to vector<1x512xf32>
    %22 = vector.broadcast %21 : vector<1x512xf32> to vector<8x512xf32>
    %cst_19 = arith.constant 0.000000e+00 : f32
    %23 = vector.broadcast %cst_19 : f32 to vector<8x128xf32>
    %c0_20 = arith.constant 0 : index
    %c0_21 = arith.constant 0 : index
    %c0_22 = arith.constant 0 : index
    %24 = vector.load %arg10[%c0_20, %c0_21, %c0_22] : memref<8x8x512xbf16, #tpu.memory_space<vmem>>, vector<1x8x512xbf16>
    %25 = vector.shape_cast %24 : vector<1x8x512xbf16> to vector<8x512xbf16>
    %26 = arith.extf %25 : vector<8x512xbf16> to vector<8x512xf32>
    %27 = vector.extract_strided_slice %26 {offsets = [0, 0], sizes = [8, 128], strides = [1, 1]} : vector<8x512xf32> to vector<8x128xf32>
    %28 = arith.negf %27 : vector<8x128xf32>
    %29 = math.exp %28 : vector<8x128xf32>
    %cst_23 = arith.constant 1.000000e+00 : f32
    %30 = vector.broadcast %cst_23 : f32 to vector<8x128xf32>
    %31 = arith.addf %30, %29 : vector<8x128xf32>
    %32 = arith.divf %30, %31 : vector<8x128xf32>
    %33 = vector.extract_strided_slice %26 {offsets = [0, 128], sizes = [8, 128], strides = [1, 1]} : vector<8x512xf32> to vector<8x128xf32>
    %34 = arith.negf %33 : vector<8x128xf32>
    %35 = math.exp %34 : vector<8x128xf32>
    %cst_24 = arith.constant 1.000000e+00 : f32
    %36 = vector.broadcast %cst_24 : f32 to vector<8x128xf32>
    %37 = arith.addf %36, %35 : vector<8x128xf32>
    %38 = arith.divf %36, %37 : vector<8x128xf32>
    %39 = vector.extract_strided_slice %26 {offsets = [0, 256], sizes = [8, 128], strides = [1, 1]} : vector<8x512xf32> to vector<8x128xf32>
    %40 = math.tanh %39 : vector<8x128xf32>
    %41 = vector.extract_strided_slice %26 {offsets = [0, 384], sizes = [8, 128], strides = [1, 1]} : vector<8x512xf32> to vector<8x128xf32>
    %42 = arith.negf %41 : vector<8x128xf32>
    %43 = math.exp %42 : vector<8x128xf32>
    %cst_25 = arith.constant 1.000000e+00 : f32
    %44 = vector.broadcast %cst_25 : f32 to vector<8x128xf32>
    %45 = arith.addf %44, %43 : vector<8x128xf32>
    %46 = arith.divf %44, %45 : vector<8x128xf32>
    %47 = arith.mulf %38, %23 : vector<8x128xf32>
    %48 = arith.mulf %32, %40 : vector<8x128xf32>
    %49 = arith.addf %47, %48 : vector<8x128xf32>
    %50 = math.tanh %49 : vector<8x128xf32>
    %51 = arith.mulf %46, %50 : vector<8x128xf32>
    %c1 = arith.constant 1 : index
    %c0_26 = arith.constant 0 : index
    %c0_27 = arith.constant 0 : index
    %52 = vector.load %arg10[%c1, %c0_26, %c0_27] : memref<8x8x512xbf16, #tpu.memory_space<vmem>>, vector<1x8x512xbf16>
    %53 = vector.shape_cast %52 : vector<1x8x512xbf16> to vector<8x512xbf16>
    %54 = arith.extf %53 : vector<8x512xbf16> to vector<8x512xf32>
    %55 = arith.truncf %51 : vector<8x128xf32> to vector<8x128xbf16>
    %cst_28 = arith.constant dense<0.000000e+00> : vector<8x512xf32>
    %56 = tpu.matmul %55, %18, %cst_28 {dimension_numbers = #tpu.dot_dimension_numbers<[1], [0], [0], [1], [0, 0, 1, 1], [], []>} : vector<8x128xbf16>, vector<128x512xbf16>, vector<8x512xf32> -> vector<8x512xf32>
    %57 = arith.addf %54, %56 : vector<8x512xf32>
    %58 = vector.extract_strided_slice %57 {offsets = [0, 0], sizes = [8, 128], strides = [1, 1]} : vector<8x512xf32> to vector<8x128xf32>
    %59 = arith.negf %58 : vector<8x128xf32>
    %60 = math.exp %59 : vector<8x128xf32>
    %cst_29 = arith.constant 1.000000e+00 : f32
    %61 = vector.broadcast %cst_29 : f32 to vector<8x128xf32>
    %62 = arith.addf %61, %60 : vector<8x128xf32>
    %63 = arith.divf %61, %62 : vector<8x128xf32>
    %64 = vector.extract_strided_slice %57 {offsets = [0, 128], sizes = [8, 128], strides = [1, 1]} : vector<8x512xf32> to vector<8x128xf32>
    %65 = arith.negf %64 : vector<8x128xf32>
    %66 = math.exp %65 : vector<8x128xf32>
    %cst_30 = arith.constant 1.000000e+00 : f32
    %67 = vector.broadcast %cst_30 : f32 to vector<8x128xf32>
    %68 = arith.addf %67, %66 : vector<8x128xf32>
    %69 = arith.divf %67, %68 : vector<8x128xf32>
    %70 = vector.extract_strided_slice %57 {offsets = [0, 256], sizes = [8, 128], strides = [1, 1]} : vector<8x512xf32> to vector<8x128xf32>
    %71 = math.tanh %70 : vector<8x128xf32>
    %72 = vector.extract_strided_slice %57 {offsets = [0, 384], sizes = [8, 128], strides = [1, 1]} : vector<8x512xf32> to vector<8x128xf32>
    %73 = arith.negf %72 : vector<8x128xf32>
    %74 = math.exp %73 : vector<8x128xf32>
    %cst_31 = arith.constant 1.000000e+00 : f32
    %75 = vector.broadcast %cst_31 : f32 to vector<8x128xf32>
    %76 = arith.addf %75, %74 : vector<8x128xf32>
    %77 = arith.divf %75, %76 : vector<8x128xf32>
    %78 = arith.mulf %69, %49 : vector<8x128xf32>
    %79 = arith.mulf %63, %71 : vector<8x128xf32>
    %80 = arith.addf %78, %79 : vector<8x128xf32>
    %81 = math.tanh %80 : vector<8x128xf32>
    %82 = arith.mulf %77, %81 : vector<8x128xf32>
    %83 = arith.truncf %51 : vector<8x128xf32> to vector<8x128xbf16>
    %84 = arith.truncf %23 : vector<8x128xf32> to vector<8x128xbf16>
    %85 = tpu.concatenate %83, %84 in 1 : vector<8x128xbf16>, vector<8x128xbf16> -> vector<8x256xbf16>
    %cst_32 = arith.constant dense<0.000000e+00> : vector<8x512xf32>
    %86 = tpu.matmul %85, %19, %cst_32 {dimension_numbers = #tpu.dot_dimension_numbers<[1], [0], [0], [1], [0, 0, 1, 1], [], []>} : vector<8x256xbf16>, vector<256x512xbf16>, vector<8x512xf32> -> vector<8x512xf32>
    %87 = arith.addf %86, %22 : vector<8x512xf32>
    %88 = vector.extract_strided_slice %87 {offsets = [0, 0], sizes = [8, 128], strides = [1, 1]} : vector<8x512xf32> to vector<8x128xf32>
    %89 = arith.negf %88 : vector<8x128xf32>
    %90 = math.exp %89 : vector<8x128xf32>
    %cst_33 = arith.constant 1.000000e+00 : f32
    %91 = vector.broadcast %cst_33 : f32 to vector<8x128xf32>
    %92 = arith.addf %91, %90 : vector<8x128xf32>
    %93 = arith.divf %91, %92 : vector<8x128xf32>
    %94 = vector.extract_strided_slice %87 {offsets = [0, 128], sizes = [8, 128], strides = [1, 1]} : vector<8x512xf32> to vector<8x128xf32>
    %95 = arith.negf %94 : vector<8x128xf32>
    %96 = math.exp %95 : vector<8x128xf32>
    %cst_34 = arith.constant 1.000000e+00 : f32
    %97 = vector.broadcast %cst_34 : f32 to vector<8x128xf32>
    %98 = arith.addf %97, %96 : vector<8x128xf32>
    %99 = arith.divf %97, %98 : vector<8x128xf32>
    %100 = vector.extract_strided_slice %87 {offsets = [0, 256], sizes = [8, 128], strides = [1, 1]} : vector<8x512xf32> to vector<8x128xf32>
    %101 = math.tanh %100 : vector<8x128xf32>
    %102 = vector.extract_strided_slice %87 {offsets = [0, 384], sizes = [8, 128], strides = [1, 1]} : vector<8x512xf32> to vector<8x128xf32>
    %103 = arith.negf %102 : vector<8x128xf32>
    %104 = math.exp %103 : vector<8x128xf32>
    %cst_35 = arith.constant 1.000000e+00 : f32
    %105 = vector.broadcast %cst_35 : f32 to vector<8x128xf32>
    %106 = arith.addf %105, %104 : vector<8x128xf32>
    %107 = arith.divf %105, %106 : vector<8x128xf32>
    %108 = arith.mulf %99, %23 : vector<8x128xf32>
    %109 = arith.mulf %93, %101 : vector<8x128xf32>
    %110 = arith.addf %108, %109 : vector<8x128xf32>
    %111 = math.tanh %110 : vector<8x128xf32>
    %112 = arith.mulf %107, %111 : vector<8x128xf32>
    %c0_36 = arith.constant 0 : index
    %c0_37 = arith.constant 0 : index
    %c0_38 = arith.constant 0 : index
    %c0_39 = arith.constant 0 : index
    %113 = vector.load %arg8[%c0_36, %c0_37, %c0_38, %c0_39] : memref<1x8x8x128xf32, #tpu.memory_space<vmem>>, vector<1x1x8x128xf32>
    %114 = vector.shape_cast %113 : vector<1x1x8x128xf32> to vector<8x128xf32>
    %115 = vector.shape_cast %112 : vector<8x128xf32> to vector<1x1x8x128xf32>
    tpu.vector_store %arg8[%c0_36, %c0_37, %c0_38, %c0_39], %115 {strides = array<i32>} : memref<1x8x8x128xf32, #tpu.memory_space<vmem>>, vector<1x1x8x128xf32>,
    %c2 = arith.constant 2 : index
    %c0_40 = arith.constant 0 : index
    %c0_41 = arith.constant 0 : index
    %116 = vector.load %arg10[%c2, %c0_40, %c0_41] : memref<8x8x512xbf16, #tpu.memory_space<vmem>>, vector<1x8x512xbf16>
    %117 = vector.shape_cast %116 : vector<1x8x512xbf16> to vector<8x512xbf16>
    %118 = arith.extf %117 : vector<8x512xbf16> to vector<8x512xf32>
    %119 = arith.truncf %82 : vector<8x128xf32> to vector<8x128xbf16>
    %cst_42 = arith.constant dense<0.000000e+00> : vector<8x512xf32>
    %120 = tpu.matmul %119, %18, %cst_42 {dimension_numbers = #tpu.dot_dimension_numbers<[1], [0], [0], [1], [0, 0, 1, 1], [], []>} : vector<8x128xbf16>, vector<128x512xbf16>, vector<8x512xf32> -> vector<8x512xf32>
    %121 = arith.addf %118, %120 : vector<8x512xf32>
    %122 = vector.extract_strided_slice %121 {offsets = [0, 0], sizes = [8, 128], strides = [1, 1]} : vector<8x512xf32> to vector<8x128xf32>
    %123 = arith.negf %122 : vector<8x128xf32>
    %124 = math.exp %123 : vector<8x128xf32>
    %cst_43 = arith.constant 1.000000e+00 : f32
    %125 = vector.broadcast %cst_43 : f32 to vector<8x128xf32>
    %126 = arith.addf %125, %124 : vector<8x128xf32>
    %127 = arith.divf %125, %126 : vector<8x128xf32>
    %128 = vector.extract_strided_slice %121 {offsets = [0, 128], sizes = [8, 128], strides = [1, 1]} : vector<8x512xf32> to vector<8x128xf32>
    %129 = arith.negf %128 : vector<8x128xf32>
    %130 = math.exp %129 : vector<8x128xf32>
    %cst_44 = arith.constant 1.000000e+00 : f32
    %131 = vector.broadcast %cst_44 : f32 to vector<8x128xf32>
    %132 = arith.addf %131, %130 : vector<8x128xf32>
    %133 = arith.divf %131, %132 : vector<8x128xf32>
    %134 = vector.extract_strided_slice %121 {offsets = [0, 256], sizes = [8, 128], strides = [1, 1]} : vector<8x512xf32> to vector<8x128xf32>
    %135 = math.tanh %134 : vector<8x128xf32>
    %136 = vector.extract_strided_slice %121 {offsets = [0, 384], sizes = [8, 128], strides = [1, 1]} : vector<8x512xf32> to vector<8x128xf32>
    %137 = arith.negf %136 : vector<8x128xf32>
    %138 = math.exp %137 : vector<8x128xf32>
    %cst_45 = arith.constant 1.000000e+00 : f32
    %139 = vector.broadcast %cst_45 : f32 to vector<8x128xf32>
    %140 = arith.addf %139, %138 : vector<8x128xf32>
    %141 = arith.divf %139, %140 : vector<8x128xf32>
    %142 = arith.mulf %133, %80 : vector<8x128xf32>
    %143 = arith.mulf %127, %135 : vector<8x128xf32>
    %144 = arith.addf %142, %143 : vector<8x128xf32>
    %145 = math.tanh %144 : vector<8x128xf32>
    %146 = arith.mulf %141, %145 : vector<8x128xf32>
    %147 = arith.truncf %82 : vector<8x128xf32> to vector<8x128xbf16>
    %148 = arith.truncf %112 : vector<8x128xf32> to vector<8x128xbf16>
    %149 = tpu.concatenate %147, %148 in 1 : vector<8x128xbf16>, vector<8x128xbf16> -> vector<8x256xbf16>
    %cst_46 = arith.constant dense<0.000000e+00> : vector<8x512xf32>
    %150 = tpu.matmul %149, %19, %cst_46 {dimension_numbers = #tpu.dot_dimension_numbers<[1], [0], [0], [1], [0, 0, 1, 1], [], []>} : vector<8x256xbf16>, vector<256x512xbf16>, vector<8x512xf32> -> vector<8x512xf32>
    %151 = arith.addf %150, %22 : vector<8x512xf32>
    %152 = vector.extract_strided_slice %151 {offsets = [0, 0], sizes = [8, 128], strides = [1, 1]} : vector<8x512xf32> to vector<8x128xf32>
    %153 = arith.negf %152 : vector<8x128xf32>
    %154 = math.exp %153 : vector<8x128xf32>
    %cst_47 = arith.constant 1.000000e+00 : f32
    %155 = vector.broadcast %cst_47 : f32 to vector<8x128xf32>
    %156 = arith.addf %155, %154 : vector<8x128xf32>
    %157 = arith.divf %155, %156 : vector<8x128xf32>
    %158 = vector.extract_strided_slice %151 {offsets = [0, 128], sizes = [8, 128], strides = [1, 1]} : vector<8x512xf32> to vector<8x128xf32>
    %159 = arith.negf %158 : vector<8x128xf32>
    %160 = math.exp %159 : vector<8x128xf32>
    %cst_48 = arith.constant 1.000000e+00 : f32
    %161 = vector.broadcast %cst_48 : f32 to vector<8x128xf32>
    %162 = arith.addf %161, %160 : vector<8x128xf32>
    %163 = arith.divf %161, %162 : vector<8x128xf32>
    %164 = vector.extract_strided_slice %151 {offsets = [0, 256], sizes = [8, 128], strides = [1, 1]} : vector<8x512xf32> to vector<8x128xf32>
    %165 = math.tanh %164 : vector<8x128xf32>
    %166 = vector.extract_strided_slice %151 {offsets = [0, 384], sizes = [8, 128], strides = [1, 1]} : vector<8x512xf32> to vector<8x128xf32>
    %167 = arith.negf %166 : vector<8x128xf32>
    %168 = math.exp %167 : vector<8x128xf32>
    %cst_49 = arith.constant 1.000000e+00 : f32
    %169 = vector.broadcast %cst_49 : f32 to vector<8x128xf32>
    %170 = arith.addf %169, %168 : vector<8x128xf32>
    %171 = arith.divf %169, %170 : vector<8x128xf32>
    %172 = arith.mulf %163, %110 : vector<8x128xf32>
    %173 = arith.mulf %157, %165 : vector<8x128xf32>
    %174 = arith.addf %172, %173 : vector<8x128xf32>
    %175 = math.tanh %174 : vector<8x128xf32>
    %176 = arith.mulf %171, %175 : vector<8x128xf32>
    %c0_50 = arith.constant 0 : index
    %c1_51 = arith.constant 1 : index
    %c0_52 = arith.constant 0 : index
    %c0_53 = arith.constant 0 : index
    %177 = vector.load %arg8[%c0_50, %c1_51, %c0_52, %c0_53] : memref<1x8x8x128xf32, #tpu.memory_space<vmem>>, vector<1x1x8x128xf32>
    %178 = vector.shape_cast %177 : vector<1x1x8x128xf32> to vector<8x128xf32>
    %179 = vector.shape_cast %176 : vector<8x128xf32> to vector<1x1x8x128xf32>
    tpu.vector_store %arg8[%c0_50, %c1_51, %c0_52, %c0_53], %179 {strides = array<i32>} : memref<1x8x8x128xf32, #tpu.memory_space<vmem>>, vector<1x1x8x128xf32>,
    %c3 = arith.constant 3 : index
    %c0_54 = arith.constant 0 : index
    %c0_55 = arith.constant 0 : index
    %180 = vector.load %arg10[%c3, %c0_54, %c0_55] : memref<8x8x512xbf16, #tpu.memory_space<vmem>>, vector<1x8x512xbf16>
    %181 = vector.shape_cast %180 : vector<1x8x512xbf16> to vector<8x512xbf16>
    %182 = arith.extf %181 : vector<8x512xbf16> to vector<8x512xf32>
    %183 = arith.truncf %146 : vector<8x128xf32> to vector<8x128xbf16>
    %cst_56 = arith.constant dense<0.000000e+00> : vector<8x512xf32>
    %184 = tpu.matmul %183, %18, %cst_56 {dimension_numbers = #tpu.dot_dimension_numbers<[1], [0], [0], [1], [0, 0, 1, 1], [], []>} : vector<8x128xbf16>, vector<128x512xbf16>, vector<8x512xf32> -> vector<8x512xf32>
    %185 = arith.addf %182, %184 : vector<8x512xf32>
    %186 = vector.extract_strided_slice %185 {offsets = [0, 0], sizes = [8, 128], strides = [1, 1]} : vector<8x512xf32> to vector<8x128xf32>
    %187 = arith.negf %186 : vector<8x128xf32>
    %188 = math.exp %187 : vector<8x128xf32>
    %cst_57 = arith.constant 1.000000e+00 : f32
    %189 = vector.broadcast %cst_57 : f32 to vector<8x128xf32>
    %190 = arith.addf %189, %188 : vector<8x128xf32>
    %191 = arith.divf %189, %190 : vector<8x128xf32>
    %192 = vector.extract_strided_slice %185 {offsets = [0, 128], sizes = [8, 128], strides = [1, 1]} : vector<8x512xf32> to vector<8x128xf32>
    %193 = arith.negf %192 : vector<8x128xf32>
    %194 = math.exp %193 : vector<8x128xf32>
    %cst_58 = arith.constant 1.000000e+00 : f32
    %195 = vector.broadcast %cst_58 : f32 to vector<8x128xf32>
    %196 = arith.addf %195, %194 : vector<8x128xf32>
    %197 = arith.divf %195, %196 : vector<8x128xf32>
    %198 = vector.extract_strided_slice %185 {offsets = [0, 256], sizes = [8, 128], strides = [1, 1]} : vector<8x512xf32> to vector<8x128xf32>
    %199 = math.tanh %198 : vector<8x128xf32>
    %200 = vector.extract_strided_slice %185 {offsets = [0, 384], sizes = [8, 128], strides = [1, 1]} : vector<8x512xf32> to vector<8x128xf32>
    %201 = arith.negf %200 : vector<8x128xf32>
    %202 = math.exp %201 : vector<8x128xf32>
    %cst_59 = arith.constant 1.000000e+00 : f32
    %203 = vector.broadcast %cst_59 : f32 to vector<8x128xf32>
    %204 = arith.addf %203, %202 : vector<8x128xf32>
    %205 = arith.divf %203, %204 : vector<8x128xf32>
    %206 = arith.mulf %197, %144 : vector<8x128xf32>
    %207 = arith.mulf %191, %199 : vector<8x128xf32>
    %208 = arith.addf %206, %207 : vector<8x128xf32>
    %209 = math.tanh %208 : vector<8x128xf32>
    %210 = arith.mulf %205, %209 : vector<8x128xf32>
    %211 = arith.truncf %146 : vector<8x128xf32> to vector<8x128xbf16>
    %212 = arith.truncf %176 : vector<8x128xf32> to vector<8x128xbf16>
    %213 = tpu.concatenate %211, %212 in 1 : vector<8x128xbf16>, vector<8x128xbf16> -> vector<8x256xbf16>
    %cst_60 = arith.constant dense<0.000000e+00> : vector<8x512xf32>
    %214 = tpu.matmul %213, %19, %cst_60 {dimension_numbers = #tpu.dot_dimension_numbers<[1], [0], [0], [1], [0, 0, 1, 1], [], []>} : vector<8x256xbf16>, vector<256x512xbf16>, vector<8x512xf32> -> vector<8x512xf32>
    %215 = arith.addf %214, %22 : vector<8x512xf32>
    %216 = vector.extract_strided_slice %215 {offsets = [0, 0], sizes = [8, 128], strides = [1, 1]} : vector<8x512xf32> to vector<8x128xf32>
    %217 = arith.negf %216 : vector<8x128xf32>
    %218 = math.exp %217 : vector<8x128xf32>
    %cst_61 = arith.constant 1.000000e+00 : f32
    %219 = vector.broadcast %cst_61 : f32 to vector<8x128xf32>
    %220 = arith.addf %219, %218 : vector<8x128xf32>
    %221 = arith.divf %219, %220 : vector<8x128xf32>
    %222 = vector.extract_strided_slice %215 {offsets = [0, 128], sizes = [8, 128], strides = [1, 1]} : vector<8x512xf32> to vector<8x128xf32>
    %223 = arith.negf %222 : vector<8x128xf32>
    %224 = math.exp %223 : vector<8x128xf32>
    %cst_62 = arith.constant 1.000000e+00 : f32
    %225 = vector.broadcast %cst_62 : f32 to vector<8x128xf32>
    %226 = arith.addf %225, %224 : vector<8x128xf32>
    %227 = arith.divf %225, %226 : vector<8x128xf32>
    %228 = vector.extract_strided_slice %215 {offsets = [0, 256], sizes = [8, 128], strides = [1, 1]} : vector<8x512xf32> to vector<8x128xf32>
    %229 = math.tanh %228 : vector<8x128xf32>
    %230 = vector.extract_strided_slice %215 {offsets = [0, 384], sizes = [8, 128], strides = [1, 1]} : vector<8x512xf32> to vector<8x128xf32>
    %231 = arith.negf %230 : vector<8x128xf32>
    %232 = math.exp %231 : vector<8x128xf32>
    %cst_63 = arith.constant 1.000000e+00 : f32
    %233 = vector.broadcast %cst_63 : f32 to vector<8x128xf32>
    %234 = arith.addf %233, %232 : vector<8x128xf32>
    %235 = arith.divf %233, %234 : vector<8x128xf32>
    %236 = arith.mulf %227, %174 : vector<8x128xf32>
    %237 = arith.mulf %221, %229 : vector<8x128xf32>
    %238 = arith.addf %236, %237 : vector<8x128xf32>
    %239 = math.tanh %238 : vector<8x128xf32>
    %240 = arith.mulf %235, %239 : vector<8x128xf32>
    %c0_64 = arith.constant 0 : index
    %c2_65 = arith.constant 2 : index
    %c0_66 = arith.constant 0 : index
    %c0_67 = arith.constant 0 : index
    %241 = vector.load %arg8[%c0_64, %c2_65, %c0_66, %c0_67] : memref<1x8x8x128xf32, #tpu.memory_space<vmem>>, vector<1x1x8x128xf32>
    %242 = vector.shape_cast %241 : vector<1x1x8x128xf32> to vector<8x128xf32>
    %243 = vector.shape_cast %240 : vector<8x128xf32> to vector<1x1x8x128xf32>
    tpu.vector_store %arg8[%c0_64, %c2_65, %c0_66, %c0_67], %243 {strides = array<i32>} : memref<1x8x8x128xf32, #tpu.memory_space<vmem>>, vector<1x1x8x128xf32>,
    %c4 = arith.constant 4 : index
    %c0_68 = arith.constant 0 : index
    %c0_69 = arith.constant 0 : index
    %244 = vector.load %arg10[%c4, %c0_68, %c0_69] : memref<8x8x512xbf16, #tpu.memory_space<vmem>>, vector<1x8x512xbf16>
    %245 = vector.shape_cast %244 : vector<1x8x512xbf16> to vector<8x512xbf16>
    %246 = arith.extf %245 : vector<8x512xbf16> to vector<8x512xf32>
    %247 = arith.truncf %210 : vector<8x128xf32> to vector<8x128xbf16>
    %cst_70 = arith.constant dense<0.000000e+00> : vector<8x512xf32>
    %248 = tpu.matmul %247, %18, %cst_70 {dimension_numbers = #tpu.dot_dimension_numbers<[1], [0], [0], [1], [0, 0, 1, 1], [], []>} : vector<8x128xbf16>, vector<128x512xbf16>, vector<8x512xf32> -> vector<8x512xf32>
    %249 = arith.addf %246, %248 : vector<8x512xf32>
    %250 = vector.extract_strided_slice %249 {offsets = [0, 0], sizes = [8, 128], strides = [1, 1]} : vector<8x512xf32> to vector<8x128xf32>
    %251 = arith.negf %250 : vector<8x128xf32>
    %252 = math.exp %251 : vector<8x128xf32>
    %cst_71 = arith.constant 1.000000e+00 : f32
    %253 = vector.broadcast %cst_71 : f32 to vector<8x128xf32>
    %254 = arith.addf %253, %252 : vector<8x128xf32>
    %255 = arith.divf %253, %254 : vector<8x128xf32>
    %256 = vector.extract_strided_slice %249 {offsets = [0, 128], sizes = [8, 128], strides = [1, 1]} : vector<8x512xf32> to vector<8x128xf32>
    %257 = arith.negf %256 : vector<8x128xf32>
    %258 = math.exp %257 : vector<8x128xf32>
    %cst_72 = arith.constant 1.000000e+00 : f32
    %259 = vector.broadcast %cst_72 : f32 to vector<8x128xf32>
    %260 = arith.addf %259, %258 : vector<8x128xf32>
    %261 = arith.divf %259, %260 : vector<8x128xf32>
    %262 = vector.extract_strided_slice %249 {offsets = [0, 256], sizes = [8, 128], strides = [1, 1]} : vector<8x512xf32> to vector<8x128xf32>
    %263 = math.tanh %262 : vector<8x128xf32>
    %264 = vector.extract_strided_slice %249 {offsets = [0, 384], sizes = [8, 128], strides = [1, 1]} : vector<8x512xf32> to vector<8x128xf32>
    %265 = arith.negf %264 : vector<8x128xf32>
    %266 = math.exp %265 : vector<8x128xf32>
    %cst_73 = arith.constant 1.000000e+00 : f32
    %267 = vector.broadcast %cst_73 : f32 to vector<8x128xf32>
    %268 = arith.addf %267, %266 : vector<8x128xf32>
    %269 = arith.divf %267, %268 : vector<8x128xf32>
    %270 = arith.mulf %261, %208 : vector<8x128xf32>
    %271 = arith.mulf %255, %263 : vector<8x128xf32>
    %272 = arith.addf %270, %271 : vector<8x128xf32>
    %273 = math.tanh %272 : vector<8x128xf32>
    %274 = arith.mulf %269, %273 : vector<8x128xf32>
    %275 = arith.truncf %210 : vector<8x128xf32> to vector<8x128xbf16>
    %276 = arith.truncf %240 : vector<8x128xf32> to vector<8x128xbf16>
    %277 = tpu.concatenate %275, %276 in 1 : vector<8x128xbf16>, vector<8x128xbf16> -> vector<8x256xbf16>
    %cst_74 = arith.constant dense<0.000000e+00> : vector<8x512xf32>
    %278 = tpu.matmul %277, %19, %cst_74 {dimension_numbers = #tpu.dot_dimension_numbers<[1], [0], [0], [1], [0, 0, 1, 1], [], []>} : vector<8x256xbf16>, vector<256x512xbf16>, vector<8x512xf32> -> vector<8x512xf32>
    %279 = arith.addf %278, %22 : vector<8x512xf32>
    %280 = vector.extract_strided_slice %279 {offsets = [0, 0], sizes = [8, 128], strides = [1, 1]} : vector<8x512xf32> to vector<8x128xf32>
    %281 = arith.negf %280 : vector<8x128xf32>
    %282 = math.exp %281 : vector<8x128xf32>
    %cst_75 = arith.constant 1.000000e+00 : f32
    %283 = vector.broadcast %cst_75 : f32 to vector<8x128xf32>
    %284 = arith.addf %283, %282 : vector<8x128xf32>
    %285 = arith.divf %283, %284 : vector<8x128xf32>
    %286 = vector.extract_strided_slice %279 {offsets = [0, 128], sizes = [8, 128], strides = [1, 1]} : vector<8x512xf32> to vector<8x128xf32>
    %287 = arith.negf %286 : vector<8x128xf32>
    %288 = math.exp %287 : vector<8x128xf32>
    %cst_76 = arith.constant 1.000000e+00 : f32
    %289 = vector.broadcast %cst_76 : f32 to vector<8x128xf32>
    %290 = arith.addf %289, %288 : vector<8x128xf32>
    %291 = arith.divf %289, %290 : vector<8x128xf32>
    %292 = vector.extract_strided_slice %279 {offsets = [0, 256], sizes = [8, 128], strides = [1, 1]} : vector<8x512xf32> to vector<8x128xf32>
    %293 = math.tanh %292 : vector<8x128xf32>
    %294 = vector.extract_strided_slice %279 {offsets = [0, 384], sizes = [8, 128], strides = [1, 1]} : vector<8x512xf32> to vector<8x128xf32>
    %295 = arith.negf %294 : vector<8x128xf32>
    %296 = math.exp %295 : vector<8x128xf32>
    %cst_77 = arith.constant 1.000000e+00 : f32
    %297 = vector.broadcast %cst_77 : f32 to vector<8x128xf32>
    %298 = arith.addf %297, %296 : vector<8x128xf32>
    %299 = arith.divf %297, %298 : vector<8x128xf32>
    %300 = arith.mulf %291, %238 : vector<8x128xf32>
    %301 = arith.mulf %285, %293 : vector<8x128xf32>
    %302 = arith.addf %300, %301 : vector<8x128xf32>
    %303 = math.tanh %302 : vector<8x128xf32>
    %304 = arith.mulf %299, %303 : vector<8x128xf32>
    %c0_78 = arith.constant 0 : index
    %c3_79 = arith.constant 3 : index
    %c0_80 = arith.constant 0 : index
    %c0_81 = arith.constant 0 : index
    %305 = vector.load %arg8[%c0_78, %c3_79, %c0_80, %c0_81] : memref<1x8x8x128xf32, #tpu.memory_space<vmem>>, vector<1x1x8x128xf32>
    %306 = vector.shape_cast %305 : vector<1x1x8x128xf32> to vector<8x128xf32>
    %307 = vector.shape_cast %304 : vector<8x128xf32> to vector<1x1x8x128xf32>
    tpu.vector_store %arg8[%c0_78, %c3_79, %c0_80, %c0_81], %307 {strides = array<i32>} : memref<1x8x8x128xf32, #tpu.memory_space<vmem>>, vector<1x1x8x128xf32>,
    %c5 = arith.constant 5 : index
    %c0_82 = arith.constant 0 : index
    %c0_83 = arith.constant 0 : index
    %308 = vector.load %arg10[%c5, %c0_82, %c0_83] : memref<8x8x512xbf16, #tpu.memory_space<vmem>>, vector<1x8x512xbf16>
    %309 = vector.shape_cast %308 : vector<1x8x512xbf16> to vector<8x512xbf16>
    %310 = arith.extf %309 : vector<8x512xbf16> to vector<8x512xf32>
    %311 = arith.truncf %274 : vector<8x128xf32> to vector<8x128xbf16>
    %cst_84 = arith.constant dense<0.000000e+00> : vector<8x512xf32>
    %312 = tpu.matmul %311, %18, %cst_84 {dimension_numbers = #tpu.dot_dimension_numbers<[1], [0], [0], [1], [0, 0, 1, 1], [], []>} : vector<8x128xbf16>, vector<128x512xbf16>, vector<8x512xf32> -> vector<8x512xf32>
    %313 = arith.addf %310, %312 : vector<8x512xf32>
    %314 = vector.extract_strided_slice %313 {offsets = [0, 0], sizes = [8, 128], strides = [1, 1]} : vector<8x512xf32> to vector<8x128xf32>
    %315 = arith.negf %314 : vector<8x128xf32>
    %316 = math.exp %315 : vector<8x128xf32>
    %cst_85 = arith.constant 1.000000e+00 : f32
    %317 = vector.broadcast %cst_85 : f32 to vector<8x128xf32>
    %318 = arith.addf %317, %316 : vector<8x128xf32>
    %319 = arith.divf %317, %318 : vector<8x128xf32>
    %320 = vector.extract_strided_slice %313 {offsets = [0, 128], sizes = [8, 128], strides = [1, 1]} : vector<8x512xf32> to vector<8x128xf32>
    %321 = arith.negf %320 : vector<8x128xf32>
    %322 = math.exp %321 : vector<8x128xf32>
    %cst_86 = arith.constant 1.000000e+00 : f32
    %323 = vector.broadcast %cst_86 : f32 to vector<8x128xf32>
    %324 = arith.addf %323, %322 : vector<8x128xf32>
    %325 = arith.divf %323, %324 : vector<8x128xf32>
    %326 = vector.extract_strided_slice %313 {offsets = [0, 256], sizes = [8, 128], strides = [1, 1]} : vector<8x512xf32> to vector<8x128xf32>
    %327 = math.tanh %326 : vector<8x128xf32>
    %328 = vector.extract_strided_slice %313 {offsets = [0, 384], sizes = [8, 128], strides = [1, 1]} : vector<8x512xf32> to vector<8x128xf32>
    %329 = arith.negf %328 : vector<8x128xf32>
    %330 = math.exp %329 : vector<8x128xf32>
    %cst_87 = arith.constant 1.000000e+00 : f32
    %331 = vector.broadcast %cst_87 : f32 to vector<8x128xf32>
    %332 = arith.addf %331, %330 : vector<8x128xf32>
    %333 = arith.divf %331, %332 : vector<8x128xf32>
    %334 = arith.mulf %325, %272 : vector<8x128xf32>
    %335 = arith.mulf %319, %327 : vector<8x128xf32>
    %336 = arith.addf %334, %335 : vector<8x128xf32>
    %337 = math.tanh %336 : vector<8x128xf32>
    %338 = arith.mulf %333, %337 : vector<8x128xf32>
    %339 = arith.truncf %274 : vector<8x128xf32> to vector<8x128xbf16>
    %340 = arith.truncf %304 : vector<8x128xf32> to vector<8x128xbf16>
    %341 = tpu.concatenate %339, %340 in 1 : vector<8x128xbf16>, vector<8x128xbf16> -> vector<8x256xbf16>
    %cst_88 = arith.constant dense<0.000000e+00> : vector<8x512xf32>
    %342 = tpu.matmul %341, %19, %cst_88 {dimension_numbers = #tpu.dot_dimension_numbers<[1], [0], [0], [1], [0, 0, 1, 1], [], []>} : vector<8x256xbf16>, vector<256x512xbf16>, vector<8x512xf32> -> vector<8x512xf32>
    %343 = arith.addf %342, %22 : vector<8x512xf32>
    %344 = vector.extract_strided_slice %343 {offsets = [0, 0], sizes = [8, 128], strides = [1, 1]} : vector<8x512xf32> to vector<8x128xf32>
    %345 = arith.negf %344 : vector<8x128xf32>
    %346 = math.exp %345 : vector<8x128xf32>
    %cst_89 = arith.constant 1.000000e+00 : f32
    %347 = vector.broadcast %cst_89 : f32 to vector<8x128xf32>
    %348 = arith.addf %347, %346 : vector<8x128xf32>
    %349 = arith.divf %347, %348 : vector<8x128xf32>
    %350 = vector.extract_strided_slice %343 {offsets = [0, 128], sizes = [8, 128], strides = [1, 1]} : vector<8x512xf32> to vector<8x128xf32>
    %351 = arith.negf %350 : vector<8x128xf32>
    %352 = math.exp %351 : vector<8x128xf32>
    %cst_90 = arith.constant 1.000000e+00 : f32
    %353 = vector.broadcast %cst_90 : f32 to vector<8x128xf32>
    %354 = arith.addf %353, %352 : vector<8x128xf32>
    %355 = arith.divf %353, %354 : vector<8x128xf32>
    %356 = vector.extract_strided_slice %343 {offsets = [0, 256], sizes = [8, 128], strides = [1, 1]} : vector<8x512xf32> to vector<8x128xf32>
    %357 = math.tanh %356 : vector<8x128xf32>
    %358 = vector.extract_strided_slice %343 {offsets = [0, 384], sizes = [8, 128], strides = [1, 1]} : vector<8x512xf32> to vector<8x128xf32>
    %359 = arith.negf %358 : vector<8x128xf32>
    %360 = math.exp %359 : vector<8x128xf32>
    %cst_91 = arith.constant 1.000000e+00 : f32
    %361 = vector.broadcast %cst_91 : f32 to vector<8x128xf32>
    %362 = arith.addf %361, %360 : vector<8x128xf32>
    %363 = arith.divf %361, %362 : vector<8x128xf32>
    %364 = arith.mulf %355, %302 : vector<8x128xf32>
    %365 = arith.mulf %349, %357 : vector<8x128xf32>
    %366 = arith.addf %364, %365 : vector<8x128xf32>
    %367 = math.tanh %366 : vector<8x128xf32>
    %368 = arith.mulf %363, %367 : vector<8x128xf32>
    %c0_92 = arith.constant 0 : index
    %c4_93 = arith.constant 4 : index
    %c0_94 = arith.constant 0 : index
    %c0_95 = arith.constant 0 : index
    %369 = vector.load %arg8[%c0_92, %c4_93, %c0_94, %c0_95] : memref<1x8x8x128xf32, #tpu.memory_space<vmem>>, vector<1x1x8x128xf32>
    %370 = vector.shape_cast %369 : vector<1x1x8x128xf32> to vector<8x128xf32>
    %371 = vector.shape_cast %368 : vector<8x128xf32> to vector<1x1x8x128xf32>
    tpu.vector_store %arg8[%c0_92, %c4_93, %c0_94, %c0_95], %371 {strides = array<i32>} : memref<1x8x8x128xf32, #tpu.memory_space<vmem>>, vector<1x1x8x128xf32>,
    %c6 = arith.constant 6 : index
    %c0_96 = arith.constant 0 : index
    %c0_97 = arith.constant 0 : index
    %372 = vector.load %arg10[%c6, %c0_96, %c0_97] : memref<8x8x512xbf16, #tpu.memory_space<vmem>>, vector<1x8x512xbf16>
    %373 = vector.shape_cast %372 : vector<1x8x512xbf16> to vector<8x512xbf16>
    %374 = arith.extf %373 : vector<8x512xbf16> to vector<8x512xf32>
    %375 = arith.truncf %338 : vector<8x128xf32> to vector<8x128xbf16>
    %cst_98 = arith.constant dense<0.000000e+00> : vector<8x512xf32>
    %376 = tpu.matmul %375, %18, %cst_98 {dimension_numbers = #tpu.dot_dimension_numbers<[1], [0], [0], [1], [0, 0, 1, 1], [], []>} : vector<8x128xbf16>, vector<128x512xbf16>, vector<8x512xf32> -> vector<8x512xf32>
    %377 = arith.addf %374, %376 : vector<8x512xf32>
    %378 = vector.extract_strided_slice %377 {offsets = [0, 0], sizes = [8, 128], strides = [1, 1]} : vector<8x512xf32> to vector<8x128xf32>
    %379 = arith.negf %378 : vector<8x128xf32>
    %380 = math.exp %379 : vector<8x128xf32>
    %cst_99 = arith.constant 1.000000e+00 : f32
    %381 = vector.broadcast %cst_99 : f32 to vector<8x128xf32>
    %382 = arith.addf %381, %380 : vector<8x128xf32>
    %383 = arith.divf %381, %382 : vector<8x128xf32>
    %384 = vector.extract_strided_slice %377 {offsets = [0, 128], sizes = [8, 128], strides = [1, 1]} : vector<8x512xf32> to vector<8x128xf32>
    %385 = arith.negf %384 : vector<8x128xf32>
    %386 = math.exp %385 : vector<8x128xf32>
    %cst_100 = arith.constant 1.000000e+00 : f32
    %387 = vector.broadcast %cst_100 : f32 to vector<8x128xf32>
    %388 = arith.addf %387, %386 : vector<8x128xf32>
    %389 = arith.divf %387, %388 : vector<8x128xf32>
    %390 = vector.extract_strided_slice %377 {offsets = [0, 256], sizes = [8, 128], strides = [1, 1]} : vector<8x512xf32> to vector<8x128xf32>
    %391 = math.tanh %390 : vector<8x128xf32>
    %392 = vector.extract_strided_slice %377 {offsets = [0, 384], sizes = [8, 128], strides = [1, 1]} : vector<8x512xf32> to vector<8x128xf32>
    %393 = arith.negf %392 : vector<8x128xf32>
    %394 = math.exp %393 : vector<8x128xf32>
    %cst_101 = arith.constant 1.000000e+00 : f32
    %395 = vector.broadcast %cst_101 : f32 to vector<8x128xf32>
    %396 = arith.addf %395, %394 : vector<8x128xf32>
    %397 = arith.divf %395, %396 : vector<8x128xf32>
    %398 = arith.mulf %389, %336 : vector<8x128xf32>
    %399 = arith.mulf %383, %391 : vector<8x128xf32>
    %400 = arith.addf %398, %399 : vector<8x128xf32>
    %401 = math.tanh %400 : vector<8x128xf32>
    %402 = arith.mulf %397, %401 : vector<8x128xf32>
    %403 = arith.truncf %338 : vector<8x128xf32> to vector<8x128xbf16>
    %404 = arith.truncf %368 : vector<8x128xf32> to vector<8x128xbf16>
    %405 = tpu.concatenate %403, %404 in 1 : vector<8x128xbf16>, vector<8x128xbf16> -> vector<8x256xbf16>
    %cst_102 = arith.constant dense<0.000000e+00> : vector<8x512xf32>
    %406 = tpu.matmul %405, %19, %cst_102 {dimension_numbers = #tpu.dot_dimension_numbers<[1], [0], [0], [1], [0, 0, 1, 1], [], []>} : vector<8x256xbf16>, vector<256x512xbf16>, vector<8x512xf32> -> vector<8x512xf32>
    %407 = arith.addf %406, %22 : vector<8x512xf32>
    %408 = vector.extract_strided_slice %407 {offsets = [0, 0], sizes = [8, 128], strides = [1, 1]} : vector<8x512xf32> to vector<8x128xf32>
    %409 = arith.negf %408 : vector<8x128xf32>
    %410 = math.exp %409 : vector<8x128xf32>
    %cst_103 = arith.constant 1.000000e+00 : f32
    %411 = vector.broadcast %cst_103 : f32 to vector<8x128xf32>
    %412 = arith.addf %411, %410 : vector<8x128xf32>
    %413 = arith.divf %411, %412 : vector<8x128xf32>
    %414 = vector.extract_strided_slice %407 {offsets = [0, 128], sizes = [8, 128], strides = [1, 1]} : vector<8x512xf32> to vector<8x128xf32>
    %415 = arith.negf %414 : vector<8x128xf32>
    %416 = math.exp %415 : vector<8x128xf32>
    %cst_104 = arith.constant 1.000000e+00 : f32
    %417 = vector.broadcast %cst_104 : f32 to vector<8x128xf32>
    %418 = arith.addf %417, %416 : vector<8x128xf32>
    %419 = arith.divf %417, %418 : vector<8x128xf32>
    %420 = vector.extract_strided_slice %407 {offsets = [0, 256], sizes = [8, 128], strides = [1, 1]} : vector<8x512xf32> to vector<8x128xf32>
    %421 = math.tanh %420 : vector<8x128xf32>
    %422 = vector.extract_strided_slice %407 {offsets = [0, 384], sizes = [8, 128], strides = [1, 1]} : vector<8x512xf32> to vector<8x128xf32>
    %423 = arith.negf %422 : vector<8x128xf32>
    %424 = math.exp %423 : vector<8x128xf32>
    %cst_105 = arith.constant 1.000000e+00 : f32
    %425 = vector.broadcast %cst_105 : f32 to vector<8x128xf32>
    %426 = arith.addf %425, %424 : vector<8x128xf32>
    %427 = arith.divf %425, %426 : vector<8x128xf32>
    %428 = arith.mulf %419, %366 : vector<8x128xf32>
    %429 = arith.mulf %413, %421 : vector<8x128xf32>
    %430 = arith.addf %428, %429 : vector<8x128xf32>
    %431 = math.tanh %430 : vector<8x128xf32>
    %432 = arith.mulf %427, %431 : vector<8x128xf32>
    %c0_106 = arith.constant 0 : index
    %c5_107 = arith.constant 5 : index
    %c0_108 = arith.constant 0 : index
    %c0_109 = arith.constant 0 : index
    %433 = vector.load %arg8[%c0_106, %c5_107, %c0_108, %c0_109] : memref<1x8x8x128xf32, #tpu.memory_space<vmem>>, vector<1x1x8x128xf32>
    %434 = vector.shape_cast %433 : vector<1x1x8x128xf32> to vector<8x128xf32>
    %435 = vector.shape_cast %432 : vector<8x128xf32> to vector<1x1x8x128xf32>
    tpu.vector_store %arg8[%c0_106, %c5_107, %c0_108, %c0_109], %435 {strides = array<i32>} : memref<1x8x8x128xf32, #tpu.memory_space<vmem>>, vector<1x1x8x128xf32>,
    %c7 = arith.constant 7 : index
    %c0_110 = arith.constant 0 : index
    %c0_111 = arith.constant 0 : index
    %436 = vector.load %arg10[%c7, %c0_110, %c0_111] : memref<8x8x512xbf16, #tpu.memory_space<vmem>>, vector<1x8x512xbf16>
    %437 = vector.shape_cast %436 : vector<1x8x512xbf16> to vector<8x512xbf16>
    %438 = arith.extf %437 : vector<8x512xbf16> to vector<8x512xf32>
    %439 = arith.truncf %402 : vector<8x128xf32> to vector<8x128xbf16>
    %cst_112 = arith.constant dense<0.000000e+00> : vector<8x512xf32>
    %440 = tpu.matmul %439, %18, %cst_112 {dimension_numbers = #tpu.dot_dimension_numbers<[1], [0], [0], [1], [0, 0, 1, 1], [], []>} : vector<8x128xbf16>, vector<128x512xbf16>, vector<8x512xf32> -> vector<8x512xf32>
    %441 = arith.addf %438, %440 : vector<8x512xf32>
    %442 = vector.extract_strided_slice %441 {offsets = [0, 0], sizes = [8, 128], strides = [1, 1]} : vector<8x512xf32> to vector<8x128xf32>
    %443 = arith.negf %442 : vector<8x128xf32>
    %444 = math.exp %443 : vector<8x128xf32>
    %cst_113 = arith.constant 1.000000e+00 : f32
    %445 = vector.broadcast %cst_113 : f32 to vector<8x128xf32>
    %446 = arith.addf %445, %444 : vector<8x128xf32>
    %447 = arith.divf %445, %446 : vector<8x128xf32>
    %448 = vector.extract_strided_slice %441 {offsets = [0, 128], sizes = [8, 128], strides = [1, 1]} : vector<8x512xf32> to vector<8x128xf32>
    %449 = arith.negf %448 : vector<8x128xf32>
    %450 = math.exp %449 : vector<8x128xf32>
    %cst_114 = arith.constant 1.000000e+00 : f32
    %451 = vector.broadcast %cst_114 : f32 to vector<8x128xf32>
    %452 = arith.addf %451, %450 : vector<8x128xf32>
    %453 = arith.divf %451, %452 : vector<8x128xf32>
    %454 = vector.extract_strided_slice %441 {offsets = [0, 256], sizes = [8, 128], strides = [1, 1]} : vector<8x512xf32> to vector<8x128xf32>
    %455 = math.tanh %454 : vector<8x128xf32>
    %456 = vector.extract_strided_slice %441 {offsets = [0, 384], sizes = [8, 128], strides = [1, 1]} : vector<8x512xf32> to vector<8x128xf32>
    %457 = arith.negf %456 : vector<8x128xf32>
    %458 = math.exp %457 : vector<8x128xf32>
    %cst_115 = arith.constant 1.000000e+00 : f32
    %459 = vector.broadcast %cst_115 : f32 to vector<8x128xf32>
    %460 = arith.addf %459, %458 : vector<8x128xf32>
    %461 = arith.divf %459, %460 : vector<8x128xf32>
    %462 = arith.mulf %453, %400 : vector<8x128xf32>
    %463 = arith.mulf %447, %455 : vector<8x128xf32>
    %464 = arith.addf %462, %463 : vector<8x128xf32>
    %465 = math.tanh %464 : vector<8x128xf32>
    %466 = arith.mulf %461, %465 : vector<8x128xf32>
    %467 = arith.truncf %402 : vector<8x128xf32> to vector<8x128xbf16>
    %468 = arith.truncf %432 : vector<8x128xf32> to vector<8x128xbf16>
    %469 = tpu.concatenate %467, %468 in 1 : vector<8x128xbf16>, vector<8x128xbf16> -> vector<8x256xbf16>
    %cst_116 = arith.constant dense<0.000000e+00> : vector<8x512xf32>
    %470 = tpu.matmul %469, %19, %cst_116 {dimension_numbers = #tpu.dot_dimension_numbers<[1], [0], [0], [1], [0, 0, 1, 1], [], []>} : vector<8x256xbf16>, vector<256x512xbf16>, vector<8x512xf32> -> vector<8x512xf32>
    %471 = arith.addf %470, %22 : vector<8x512xf32>
    %472 = vector.extract_strided_slice %471 {offsets = [0, 0], sizes = [8, 128], strides = [1, 1]} : vector<8x512xf32> to vector<8x128xf32>
    %473 = arith.negf %472 : vector<8x128xf32>
    %474 = math.exp %473 : vector<8x128xf32>
    %cst_117 = arith.constant 1.000000e+00 : f32
    %475 = vector.broadcast %cst_117 : f32 to vector<8x128xf32>
    %476 = arith.addf %475, %474 : vector<8x128xf32>
    %477 = arith.divf %475, %476 : vector<8x128xf32>
    %478 = vector.extract_strided_slice %471 {offsets = [0, 128], sizes = [8, 128], strides = [1, 1]} : vector<8x512xf32> to vector<8x128xf32>
    %479 = arith.negf %478 : vector<8x128xf32>
    %480 = math.exp %479 : vector<8x128xf32>
    %cst_118 = arith.constant 1.000000e+00 : f32
    %481 = vector.broadcast %cst_118 : f32 to vector<8x128xf32>
    %482 = arith.addf %481, %480 : vector<8x128xf32>
    %483 = arith.divf %481, %482 : vector<8x128xf32>
    %484 = vector.extract_strided_slice %471 {offsets = [0, 256], sizes = [8, 128], strides = [1, 1]} : vector<8x512xf32> to vector<8x128xf32>
    %485 = math.tanh %484 : vector<8x128xf32>
    %486 = vector.extract_strided_slice %471 {offsets = [0, 384], sizes = [8, 128], strides = [1, 1]} : vector<8x512xf32> to vector<8x128xf32>
    %487 = arith.negf %486 : vector<8x128xf32>
    %488 = math.exp %487 : vector<8x128xf32>
    %cst_119 = arith.constant 1.000000e+00 : f32
    %489 = vector.broadcast %cst_119 : f32 to vector<8x128xf32>
    %490 = arith.addf %489, %488 : vector<8x128xf32>
    %491 = arith.divf %489, %490 : vector<8x128xf32>
    %492 = arith.mulf %483, %430 : vector<8x128xf32>
    %493 = arith.mulf %477, %485 : vector<8x128xf32>
    %494 = arith.addf %492, %493 : vector<8x128xf32>
    %495 = math.tanh %494 : vector<8x128xf32>
    %496 = arith.mulf %491, %495 : vector<8x128xf32>
    %c0_120 = arith.constant 0 : index
    %c6_121 = arith.constant 6 : index
    %c0_122 = arith.constant 0 : index
    %c0_123 = arith.constant 0 : index
    %497 = vector.load %arg8[%c0_120, %c6_121, %c0_122, %c0_123] : memref<1x8x8x128xf32, #tpu.memory_space<vmem>>, vector<1x1x8x128xf32>
    %498 = vector.shape_cast %497 : vector<1x1x8x128xf32> to vector<8x128xf32>
    %499 = vector.shape_cast %496 : vector<8x128xf32> to vector<1x1x8x128xf32>
    tpu.vector_store %arg8[%c0_120, %c6_121, %c0_122, %c0_123], %499 {strides = array<i32>} : memref<1x8x8x128xf32, #tpu.memory_space<vmem>>, vector<1x1x8x128xf32>,
    %500 = arith.truncf %466 : vector<8x128xf32> to vector<8x128xbf16>
    %501 = arith.truncf %496 : vector<8x128xf32> to vector<8x128xbf16>
    %502 = tpu.concatenate %500, %501 in 1 : vector<8x128xbf16>, vector<8x128xbf16> -> vector<8x256xbf16>
    %cst_124 = arith.constant dense<0.000000e+00> : vector<8x512xf32>
    %503 = tpu.matmul %502, %19, %cst_124 {dimension_numbers = #tpu.dot_dimension_numbers<[1], [0], [0], [1], [0, 0, 1, 1], [], []>} : vector<8x256xbf16>, vector<256x512xbf16>, vector<8x512xf32> -> vector<8x512xf32>
    %504 = arith.addf %503, %22 : vector<8x512xf32>
    %505 = vector.extract_strided_slice %504 {offsets = [0, 0], sizes = [8, 128], strides = [1, 1]} : vector<8x512xf32> to vector<8x128xf32>
    %506 = arith.negf %505 : vector<8x128xf32>
    %507 = math.exp %506 : vector<8x128xf32>
    %cst_125 = arith.constant 1.000000e+00 : f32
    %508 = vector.broadcast %cst_125 : f32 to vector<8x128xf32>
    %509 = arith.addf %508, %507 : vector<8x128xf32>
    %510 = arith.divf %508, %509 : vector<8x128xf32>
    %511 = vector.extract_strided_slice %504 {offsets = [0, 128], sizes = [8, 128], strides = [1, 1]} : vector<8x512xf32> to vector<8x128xf32>
    %512 = arith.negf %511 : vector<8x128xf32>
    %513 = math.exp %512 : vector<8x128xf32>
    %cst_126 = arith.constant 1.000000e+00 : f32
    %514 = vector.broadcast %cst_126 : f32 to vector<8x128xf32>
    %515 = arith.addf %514, %513 : vector<8x128xf32>
    %516 = arith.divf %514, %515 : vector<8x128xf32>
    %517 = vector.extract_strided_slice %504 {offsets = [0, 256], sizes = [8, 128], strides = [1, 1]} : vector<8x512xf32> to vector<8x128xf32>
    %518 = math.tanh %517 : vector<8x128xf32>
    %519 = vector.extract_strided_slice %504 {offsets = [0, 384], sizes = [8, 128], strides = [1, 1]} : vector<8x512xf32> to vector<8x128xf32>
    %520 = arith.negf %519 : vector<8x128xf32>
    %521 = math.exp %520 : vector<8x128xf32>
    %cst_127 = arith.constant 1.000000e+00 : f32
    %522 = vector.broadcast %cst_127 : f32 to vector<8x128xf32>
    %523 = arith.addf %522, %521 : vector<8x128xf32>
    %524 = arith.divf %522, %523 : vector<8x128xf32>
    %525 = arith.mulf %516, %494 : vector<8x128xf32>
    %526 = arith.mulf %510, %518 : vector<8x128xf32>
    %527 = arith.addf %525, %526 : vector<8x128xf32>
    %528 = math.tanh %527 : vector<8x128xf32>
    %529 = arith.mulf %524, %528 : vector<8x128xf32>
    %c0_128 = arith.constant 0 : index
    %c7_129 = arith.constant 7 : index
    %c0_130 = arith.constant 0 : index
    %c0_131 = arith.constant 0 : index
    %530 = vector.load %arg8[%c0_128, %c7_129, %c0_130, %c0_131] : memref<1x8x8x128xf32, #tpu.memory_space<vmem>>, vector<1x1x8x128xf32>
    %531 = vector.shape_cast %530 : vector<1x1x8x128xf32> to vector<8x128xf32>
    %532 = vector.shape_cast %529 : vector<8x128xf32> to vector<1x1x8x128xf32>
    tpu.vector_store %arg8[%c0_128, %c7_129, %c0_130, %c0_131], %532 {strides = array<i32>} : memref<1x8x8x128xf32, #tpu.memory_space<vmem>>, vector<1x1x8x128xf32>,
    %c0_132 = arith.constant 0 : index
    %c0_133 = arith.constant 0 : index
    %c0_134 = arith.constant 0 : index
    %533 = vector.load %arg9[%c0_132, %c0_133, %c0_134] : memref<1x8x128xf32, #tpu.memory_space<vmem>>, vector<1x8x128xf32>
    %534 = vector.shape_cast %533 : vector<1x8x128xf32> to vector<8x128xf32>
    %535 = vector.shape_cast %466 : vector<8x128xf32> to vector<1x8x128xf32>
    tpu.vector_store %arg9[%c0_132, %c0_133, %c0_134], %535 {strides = array<i32>} : memref<1x8x128xf32, #tpu.memory_space<vmem>>, vector<1x8x128xf32>,
    return
  }
  func.func @transform_0(%arg0: i32) -> (i32, i32, i32, i32) {
    %c0_i32 = arith.constant 0 : i32
    %c0_i32_0 = arith.constant 0 : i32
    %c0_i32_1 = arith.constant 0 : i32
    %c0_i32_2 = arith.constant 0 : i32
    return %arg0, %c0_i32, %c0_i32_0, %c0_i32_1 : i32, i32, i32, i32
  }
  func.func @transform_1(%arg0: i32) -> (i32, i32, i32) {
    %c0_i32 = arith.constant 0 : i32
    %c0_i32_0 = arith.constant 0 : i32
    %c0_i32_1 = arith.constant 0 : i32
    return %arg0, %c0_i32, %c0_i32_0 : i32, i32, i32
  }
  func.func @transform_2(%arg0: i32) -> (i32, i32) {
    %c0_i32 = arith.constant 0 : i32
    %c0_i32_0 = arith.constant 0 : i32
    %c0_i32_1 = arith.constant 0 : i32
    return %c0_i32, %c0_i32_0 : i32, i32
  }
  func.func @transform_3(%arg0: i32) -> (i32, i32) {
    %c0_i32 = arith.constant 0 : i32
    %c0_i32_0 = arith.constant 0 : i32
    %c0_i32_1 = arith.constant 0 : i32
    return %c0_i32, %c0_i32_0 : i32, i32
  }
  func.func @transform_4(%arg0: i32) -> (i32, i32) {
    %c0_i32 = arith.constant 0 : i32
    %c0_i32_0 = arith.constant 0 : i32
    %c0_i32_1 = arith.constant 0 : i32
    return %c0_i32, %c0_i32_0 : i32, i32
  }
  func.func @transform_5(%arg0: i32) -> (i32, i32) {
    %c0_i32 = arith.constant 0 : i32
    %c0_i32_0 = arith.constant 0 : i32
    %c0_i32_1 = arith.constant 0 : i32
    return %c0_i32, %c0_i32_0 : i32, i32
  }
  func.func @transform_6(%arg0: i32) -> (i32, i32) {
    %c0_i32 = arith.constant 0 : i32
    %c0_i32_0 = arith.constant 0 : i32
    %c0_i32_1 = arith.constant 0 : i32
    return %c0_i32, %c0_i32_0 : i32, i32
  }
  func.func @transform_7(%arg0: i32) -> (i32, i32, i32, i32) {
    %c0_i32 = arith.constant 0 : i32
    %c0_i32_0 = arith.constant 0 : i32
    %c0_i32_1 = arith.constant 0 : i32
    %c0_i32_2 = arith.constant 0 : i32
    return %arg0, %c0_i32, %c0_i32_0, %c0_i32_1 : i32, i32, i32, i32
  }
  func.func @transform_8(%arg0: i32) -> (i32, i32, i32) {
    %c0_i32 = arith.constant 0 : i32
    %c0_i32_0 = arith.constant 0 : i32
    %c0_i32_1 = arith.constant 0 : i32
    return %arg0, %c0_i32, %c0_i32_0 : i32, i32, i32
  }
}

</mosaic_0001>

<bundles_post_ra>
// kernel: multi_input_lstm_with_gates.1
= control target key start
LH: loop header
LB: loop body
LE: loop exit
PB: predicated region body
PF: predicated region fallthrough
CT: control target
= control target key end

     0   :  { %14 = vsyncpa [#allocation4], 0  ;;  %s5573_s0 = inlined_call_operand.vmem [shape: bf16[1,8,8,128], index: 0, kind: input, shape index: {}]   ;;  %s5574_s1 = inlined_call_operand.vmem [shape: f32[1,8,128], index: 1, kind: input, shape index: {}]   ;;  %s5575_s2 = inlined_call_operand.hbm [shape: bf16[128,512], index: 2, kind: input, shape index: {}]   ;;  %s5576_s3 = inlined_call_operand.hbm [shape: bf16[128,512], index: 3, kind: input, shape index: {}]   ;;  %s5577_s4 = inlined_call_operand.vmem [shape: f32[1,512], index: 4, kind: input, shape index: {}]   ;;  %s5578_s5 = inlined_call_operand.hbm [shape: bf16[256,512], index: 5, kind: input, shape index: {}]   ;;  %s5579_s6 = inlined_call_operand.vmem [shape: f32[1,512], index: 6, kind: input, shape index: {}]   ;;  %s5580_s7 = inlined_call_operand.vmem [shape: f32[1,8,8,128], index: 7, kind: output, shape index: {0}]   ;;  %s5581_s8 = inlined_call_operand.vmem [shape: f32[1,8,128], index: 8, kind: output, shape index: {1}]  }
   0x1   :  { %15 = vsyncpa [#allocation6], 0  ;;  %s3919_s27 = smov [#allocation5]   ;;  %s3920_s29 = smov [#allocation3]  }
   0x2   :  { %s37_s28 = sshll.u32 %s3919_s27, 4  ;;  %s25_s30 = sshll.u32 %s3920_s29, 4  ;;  %s38_s28 = int_to_ptr.vmem [resolvable:$true] %s37_s28  ;;  %s26_s30 = int_to_ptr.vmem [resolvable:$true] %s25_s30 }
   0x3   :  { %s3863_s9 = scalar_lea.vmem %s38_s28, 4096  ;;  %p3868_p1 = scmp.lt.s32.totalorder %s38_s28, %s38_s28 }
   0x4   :  { %p3864_p0 = scmp.ne.s32.totalorder %s38_s28, %s3863_s9  ;;  %p3869_p2 = scmp.lt.s32.totalorder %s3863_s9, %s3863_s9 }
   0x6   :  { %p3870_p3 = por %p3869_p2, %p3868_p1 }
   0x8   :  { %p3871_p4 = pnand %p3870_p3, %p3864_p0 }
   0xa   :  { %3874 = shalt.err (!%p3871_p4)
}
   0xb   :  { %s3921_s10 = smov 256   ;;  %s3922_s11 = smov 16  }
   0xc   :  { %43 = dma.hbm_to_vmem [thread:$0]  %s5576_s3, 4096, %s38_s28, [#allocation6], %s3921_s10, %s3921_s10, %s3922_s11  }
   0xd   :  { %s3883_s14 = scalar_lea.vmem %s26_s30, 4096  ;;  %p3888_p6 = scmp.lt.s32.totalorder %s26_s30, %s26_s30 }
   0xe   :  { %p3884_p5 = scmp.ne.s32.totalorder %s26_s30, %s3883_s14  ;;  %p3889_p7 = scmp.lt.s32.totalorder %s3883_s14, %s3883_s14 }
  0x10   :  { %p3890_p8 = por %p3889_p7, %p3888_p6 }
  0x12   :  { %p3891_p9 = pnand %p3890_p8, %p3884_p5 }
  0x14   :  { %3894 = shalt.err (!%p3891_p9)
}
  0x15   :  { %31 = dma.hbm_to_vmem [thread:$0]  %s5575_s2, 4096, %s26_s30, [#allocation4], %s3921_s10, %s3921_s10, %s3922_s11  }
  0x16   :  { %s3923_s17 = smov [#allocation7]  }
  0x17   :  { %s51_s18 = sshll.u32 %s3923_s17, 4  ;;  %s52_s18 = int_to_ptr.vmem [resolvable:$true] %s51_s18 }
  0x18   :  { %s3903_s19 = scalar_lea.vmem %s52_s18, 8192  ;;  %p3908_p11 = scmp.lt.s32.totalorder %s52_s18, %s52_s18 }
  0x19   :  { %p3904_p10 = scmp.ne.s32.totalorder %s52_s18, %s3903_s19  ;;  %p3909_p12 = scmp.lt.s32.totalorder %s3903_s19, %s3903_s19 }
  0x1b   :  { %p3910_p13 = por %p3909_p12, %p3908_p11 }
  0x1d   :  { %p3911_p0 = pnand %p3910_p13, %p3904_p10 }
  0x1f   :  { %3914 = shalt.err (!%p3911_p0)
}
  0x20   :  { %57 = dma.hbm_to_vmem [thread:$0]  %s5578_s5, 8192, %s52_s18, [#allocation6], %s3921_s10, %s3921_s10, %s3922_s11  }
  0x21   :  { %3915 = dma.done.wait [#allocation4], 4096  }
  0x22   :  { %3916 = vsyncadd [#allocation4], 4294963200 }
  0x23   :  { %3917 = dma.done.wait [#allocation6], 12288  }
  0x24   :  { %3918 = vsyncadd [#allocation6], 4294955008  ;;  %v5586_v0 = vmov 0   ;;  %v3215_v1 = vld [vmem:[#allocation3 + $0xe4] ss:$16 sps:$4 sm:$0xff]   ;;  %v3206_v40 = vld [vmem:[%s5573_s0 + $0x8] sm:$0xff]  }
  0x25   :  { %373 = vmatprep.mubr.bf16.mxu0 %v5586_v0  ;;  %446 = vmatprep.mubr.bf16.mxu1 %v5586_v0  ;;  %v3217_v2 = vld [vmem:[#allocation3 + $0xe0] ss:$16 sps:$4 sm:$0xff]   ;;  %v3218_v3 = vld [vmem:[#allocation3 + $0xc4] ss:$16 sps:$4 sm:$0xff]   ;;  %v3226_v6 = vld [vmem:[#allocation3 + $0xec] ss:$16 sps:$4 sm:$0xff]   ;;  %v3196_v41 = vunpack.c.l.bf16 %v3206_v40  ;;  %v3197_v42 = vunpack.c.h.bf16 %v3206_v40 }
  0x26   :  { %341 = vmatprep.subr.bf16.mxu0 %v3215_v1  ;;  %v3220_v4 = vld [vmem:[#allocation3 + $0xc0] ss:$16 sps:$4 sm:$0xff]   ;;  %v3221_v5 = vld [vmem:[#allocation3 + $0xa4] ss:$16 sps:$4 sm:$0xff]   ;;  %v3229_v7 = vld [vmem:[#allocation3 + $0xe8] ss:$16 sps:$4 sm:$0xff]   ;;  %414 = vmatprep.subr.bf16.mxu1 %v3226_v6 }
  0x27   :  { %342 = vmatpush1.bf16.msra.mxu0 %v3217_v2  ;;  %v3223_v8 = vld [vmem:[#allocation3 + $0xa0] ss:$16 sps:$4 sm:$0xff]   ;;  %v3224_v9 = vld [vmem:[#allocation3 + $0x84] ss:$16 sps:$4 sm:$0xff]   ;;  %415 = vmatpush1.bf16.msra.mxu1 %v3229_v7  ;;  %v3232_v10 = vld [vmem:[#allocation3 + $0xcc] ss:$16 sps:$4 sm:$0xff]  }
  0x28   :  { %343 = vmatprep.subr.bf16.mxu0 %v3218_v3  ;;  %v3235_v11 = vld [vmem:[#allocation3 + $0xc8] ss:$16 sps:$4 sm:$0xff]   ;;  %416 = vmatprep.subr.bf16.mxu1 %v3232_v10  ;;  %v3228_v12 = vld [vmem:[#allocation3 + $0x80] ss:$16 sps:$4 sm:$0xff]   ;;  %v3230_v13 = vld [vmem:[#allocation3 + $0x64] ss:$16 sps:$4 sm:$0xff]  }
  0x29   :  { %v3238_v14 = vld [vmem:[#allocation3 + $0xac] ss:$16 sps:$4 sm:$0xff]   ;;  %v3241_v15 = vld [vmem:[#allocation3 + $0xa8] ss:$16 sps:$4 sm:$0xff]   ;;  %v3234_v17 = vld [vmem:[#allocation3 + $0x60] ss:$16 sps:$4 sm:$0xff]  }
  0x2a   :  { %v3244_v16 = vld [vmem:[#allocation3 + $0x8c] ss:$16 sps:$4 sm:$0xff]   ;;  %v3236_v18 = vld [vmem:[#allocation3 + $0x44] ss:$16 sps:$4 sm:$0xff]   ;;  %v3247_v19 = vld [vmem:[#allocation3 + $0x88] ss:$16 sps:$4 sm:$0xff]  }
  0x2b   :  { %344 = vmatpush1.bf16.msra.mxu0 %v3220_v4  ;;  %417 = vmatpush1.bf16.msra.mxu1 %v3235_v11  ;;  %v3250_v20 = vld [vmem:[#allocation3 + $0x6c] ss:$16 sps:$4 sm:$0xff]   ;;  %v3240_v21 = vld [vmem:[#allocation3 + $0x40] ss:$16 sps:$4 sm:$0xff]   ;;  %v3242_v23 = vld [vmem:[#allocation3 + $0x24] ss:$16 sps:$4 sm:$0xff]  }
  0x2c   :  { %345 = vmatprep.subr.bf16.mxu0 %v3221_v5  ;;  %418 = vmatprep.subr.bf16.mxu1 %v3238_v14  ;;  %v3191_v22 = vld [vmem:[%s5573_s0] sm:$0xff]   ;;  %v3253_v24 = vld [vmem:[#allocation3 + $0x68] ss:$16 sps:$4 sm:$0xff]   ;;  %v3254_v27 = vld [vmem:[#allocation3 + $0x4c] ss:$16 sps:$4 sm:$0xff]  }
  0x2d   :  { %v3246_v25 = vld [vmem:[#allocation3 + $0x20] ss:$16 sps:$4 sm:$0xff]   ;;  %v3248_v28 = vld [vmem:[#allocation3 + $0x4] ss:$16 sps:$4 sm:$0xff]   ;;  %v3192_v29 = vunpack.c.l.bf16 %v3191_v22  ;;  %v3193_v30 = vunpack.c.h.bf16 %v3191_v22  ;;  %v3256_v31 = vld [vmem:[#allocation3 + $0x48] ss:$16 sps:$4 sm:$0xff]  }
  0x2e   :  { %v3987_v26 = vld [vmem:[%s5574_s1] sm:$0xff]  ;;  %v3257_v32 = vld [vmem:[#allocation3 + $0x2c] ss:$16 sps:$4 sm:$0xff]   ;;  %v3259_v36 = vld [vmem:[#allocation3 + $0x28] ss:$16 sps:$4 sm:$0xff]  }
  0x2f   :  { %346 = vmatpush1.bf16.msra.mxu0 %v3223_v8  ;;  %419 = vmatpush1.bf16.msra.mxu1 %v3241_v15  ;;  %v3252_v33 = vld [vmem:[#allocation3] ss:$16 sps:$4 sm:$0xff]   ;;  %v87_v34 = vmul.f32 %v3192_v29, %v3987_v26  ;;  %v88_v35 = vmul.f32 %v3193_v30, %v3987_v26  ;;  %v3260_v37 = vld [vmem:[#allocation3 + $0xc] ss:$16 sps:$4 sm:$0xff]   ;;  %v3262_v39 = vld [vmem:[#allocation3 + $0x8] ss:$16 sps:$4 sm:$0xff]   ;;  %v89_v47 = vmul.f32 %v3196_v41, %v3987_v26  ;;  %v137_v29 = vlaneseq }
  0x30   :  { %347 = vmatprep.subr.bf16.mxu0 %v3224_v9  ;;  %420 = vmatprep.subr.bf16.mxu1 %v3244_v16  ;;  %v3996_v43 = vld [vmem:[#allocation5 + $0xe4] ss:$16 sps:$4 sm:$0xff]   ;;  %v3998_v44 = vld [vmem:[#allocation5 + $0xec] ss:$16 sps:$4 sm:$0xff]   ;;  %v4000_v45 = vld [vmem:[#allocation5 + $0xe0] ss:$16 sps:$4 sm:$0xff]   ;;  %v90_v48 = vmul.f32 %v3197_v42, %v3987_v26 }
  0x31   :  { %v3170_v38 = vpack.c.bf16 %v88_v35, %v87_v34  ;;  %v4002_v46 = vld [vmem:[#allocation5 + $0xe8] ss:$16 sps:$4 sm:$0xff]   ;;  %v4010_v50 = vld [vmem:[#allocation5 + $0xc4] ss:$16 sps:$4 sm:$0xff]   ;;  %v4012_v51 = vld [vmem:[#allocation5 + $0xcc] ss:$16 sps:$4 sm:$0xff]  }
  0x32   :  { %v3171_v49 = vpack.c.bf16 %v90_v48, %v89_v47  ;;  %v4014_v52 = vld [vmem:[#allocation5 + $0xc0] ss:$16 sps:$4 sm:$0xff]   ;;  %v4016_v53 = vld [vmem:[#allocation5 + $0xc8] ss:$16 sps:$4 sm:$0xff]   ;;  %v4025_v57 = vld [vmem:[#allocation5 + $0xa4] ss:$16 sps:$4 sm:$0xff]  }
  0x33   :  { %348 = vmatpush1.bf16.msra.mxu0 %v3228_v12  ;;  %421 = vmatpush1.bf16.msra.mxu1 %v3247_v19  ;;  %v3207_v54 = vld [vmem:[%s5573_s0 + $0x10] sm:$0xff]   ;;  %v4027_v58 = vld [vmem:[#allocation5 + $0xac] ss:$16 sps:$4 sm:$0xff]   ;;  %v4033_v60 = vld [vmem:[#allocation5 + $0xa8] ss:$16 sps:$4 sm:$0xff]   ;;  %v4116_v30 = vshrl.u32 %v137_v29, 7 }
  0x34   :  { %349 = vmatprep.subr.bf16.mxu0 %v3230_v13  ;;  %422 = vmatprep.subr.bf16.mxu1 %v3250_v20  ;;  %v3200_v55 = vunpack.c.l.bf16 %v3207_v54  ;;  %v3201_v56 = vunpack.c.h.bf16 %v3207_v54  ;;  %v4031_v59 = vld [vmem:[#allocation5 + $0xa0] ss:$16 sps:$4 sm:$0xff]   ;;  %v4041_v1 = vld [vmem:[#allocation5 + $0x84] ss:$16 sps:$4 sm:$0xff]   ;;  %v4043_v2 = vld [vmem:[#allocation5 + $0x8c] ss:$16 sps:$4 sm:$0xff]  }
  0x35   :  { %v4045_v3 = vld [vmem:[#allocation5 + $0x80] ss:$16 sps:$4 sm:$0xff]   ;;  %v4047_v4 = vld [vmem:[#allocation5 + $0x88] ss:$16 sps:$4 sm:$0xff]   ;;  %v4056_v8 = vld [vmem:[#allocation5 + $0x64] ss:$16 sps:$4 sm:$0xff]  }
  0x36   :  { %v91_v61 = vmul.f32 %v3200_v55, %v3987_v26  ;;  %v92_v62 = vmul.f32 %v3201_v56, %v3987_v26  ;;  %v3208_v5 = vld [vmem:[%s5573_s0 + $0x18] sm:$0xff]   ;;  %v4062_v10 = vld [vmem:[#allocation5 + $0x60] ss:$16 sps:$4 sm:$0xff]   ;;  %v4068_v14 = vld [vmem:[#allocation5 + $0x44] ss:$16 sps:$4 sm:$0xff]   ;;  %5832 = vst [vmem:[#allocation10_spill] sm:$0xff] %v4116_v30 }
  0x37   :  { %350 = vmatpush1.bf16.msra.mxu0 %v3234_v17  ;;  %423 = vmatpush1.bf16.msra.mxu1 %v3253_v24  ;;  %v3204_v6 = vunpack.c.l.bf16 %v3208_v5  ;;  %v3205_v7 = vunpack.c.h.bf16 %v3208_v5  ;;  %v4058_v9 = vld [vmem:[#allocation5 + $0x6c] ss:$16 sps:$4 sm:$0xff]   ;;  %v4064_v11 = vld [vmem:[#allocation5 + $0x68] ss:$16 sps:$4 sm:$0xff]   ;;  %v4076_v17 = vld [vmem:[#allocation5 + $0x40] ss:$16 sps:$4 sm:$0xff]  }
  0x38   :  { %351 = vmatprep.subr.bf16.mxu0 %v3236_v18  ;;  %424 = vmatprep.subr.bf16.mxu1 %v3254_v27  ;;  %v3172_v63 = vpack.c.bf16 %v92_v62, %v91_v61  ;;  %v4072_v15 = vld [vmem:[#allocation5 + $0x4c] ss:$16 sps:$4 sm:$0xff]   ;;  %v4078_v18 = vld [vmem:[#allocation5 + $0x48] ss:$16 sps:$4 sm:$0xff]   ;;  %v4082_v19 = vld [vmem:[#allocation5 + $0x24] ss:$16 sps:$4 sm:$0xff]  }
  0x39   :  { %v93_v12 = vmul.f32 %v3204_v6, %v3987_v26  ;;  %v94_v13 = vmul.f32 %v3205_v7, %v3987_v26  ;;  %v4084_v20 = vld [vmem:[#allocation5 + $0x2c] ss:$16 sps:$4 sm:$0xff]   ;;  %v4092_v22 = vld [vmem:[#allocation5 + $0x28] ss:$16 sps:$4 sm:$0xff]   ;;  %v4108_v27 = vld [vmem:[#allocation7 + $0xe4] ss:$16 sps:$4 sm:$0xff]  }
  0x3a   :  { %v4098_v24 = vld [vmem:[#allocation5 + $0xc] ss:$16 sps:$4 sm:$0xff]   ;;  %v4104_v26 = vld [vmem:[#allocation5 + $0x8] ss:$16 sps:$4 sm:$0xff]  }
  0x3b   :  { %352 = vmatpush1.bf16.msra.mxu0 %v3240_v21  ;;  %425 = vmatpush1.bf16.msra.mxu1 %v3256_v31  ;;  %v3173_v16 = vpack.c.bf16 %v94_v13, %v93_v12  ;;  %v4090_v21 = vld [vmem:[#allocation5 + $0x20] ss:$16 sps:$4 sm:$0xff]   ;;  %v5585_v31 = vsub.s32 0, %v4116_v30 }
  0x3c   :  { %353 = vmatprep.subr.bf16.mxu0 %v3242_v23  ;;  %426 = vmatprep.subr.bf16.mxu1 %v3257_v32  ;;  %v4096_v23 = vld [vmem:[#allocation5 + $0x4] ss:$16 sps:$4 sm:$0xff]   ;;  %v5584_v32 = vsub.s32 1, %v4116_v30 }
  0x3f   :  { %354 = vmatpush1.bf16.msra.mxu0 %v3246_v25  ;;  %427 = vmatpush1.bf16.msra.mxu1 %v3259_v36  ;;  %v4102_v25 = vld [vmem:[#allocation5] ss:$16 sps:$4 sm:$0xff]  }
  0x40   :  { %355 = vmatprep.subr.bf16.mxu0 %v3248_v28  ;;  %428 = vmatprep.subr.bf16.mxu1 %v3260_v37  ;;  %v4110_v28 = vld [vmem:[#allocation7 + $0xec] ss:$16 sps:$4 sm:$0xff]   ;;  %v5582_v37 = vsub.s32 2, %v4116_v30 }
  0x43   :  { %356 = vmatpush1.bf16.msra.mxu0 %v3252_v33  ;;  %429 = vmatpush1.bf16.msra.mxu1 %v3262_v39  ;;  %v135_v33 = vld [vmem:[%s5577_s4] sm:$0xf] }
  0x44   :  { %947 = vmatprep.subr.bf16.mxu0 %v3996_v43  ;;  %988 = vmatprep.subr.bf16.mxu1 %v3998_v44  ;;  %v4125_v34 = vrot.slane %v135_v33, %v5585_v31  ;;  %v4129_v35 = vrot.slane %v135_v33, %v5584_v32  ;;  %v4137_v47 = vrot.slane %v135_v33, %v5582_v37  ;;  %v4206_v37 = vld [vmem:[#allocation7 + $0x44] ss:$16 sps:$4 sm:$0xff]   ;;  %v4212_v32 = vld [vmem:[#allocation7 + $0x40] ss:$16 sps:$4 sm:$0xff]   ;;  %v4214_v31 = vld [vmem:[#allocation7 + $0x48] ss:$16 sps:$4 sm:$0xff]  }
  0x45   :  { %5854 = vst [vmem:[#allocation32_spill] sm:$0xff] %v4206_v37  ;;  %5856 = vst [vmem:[#allocation34_spill] sm:$0xff] %v4212_v32 }
  0x46   :  { %374 = vmatmul.mubr.bf16.vlgmr.msra.gmra.mxu0 %v3170_v38  ;;  %447 = vmatmul.mubr.bf16.vlgmr.msra.gmra.mxu1 %v3170_v38  ;;  %5833 = vst [vmem:[#allocation11_spill] sm:$0xff] %v4125_v34  ;;  %5834 = vst [vmem:[#allocation12_spill] sm:$0xff] %v4129_v35  ;;  %v5583_v38 = vsub.s32 3, %v4116_v30 }
  0x47   :  { %383 = vmatprep.mubr.bf16.mxu0 %v5586_v0  ;;  %456 = vmatprep.mubr.bf16.mxu1 %v5586_v0  ;;  %5835 = vst [vmem:[#allocation13_spill] sm:$0xff] %v4137_v47  ;;  %5857 = vst [vmem:[#allocation35_spill] sm:$0xff] %v4214_v31 }
  0x48   :  { %948 = vmatpush1.bf16.msra.mxu0 %v4000_v45  ;;  %989 = vmatpush1.bf16.msra.mxu1 %v4002_v46 }
  0x49   :  { %949 = vmatprep.subr.bf16.mxu0 %v4010_v50  ;;  %990 = vmatprep.subr.bf16.mxu1 %v4012_v51 }
  0x4c   :  { %950 = vmatpush1.bf16.msra.mxu0 %v4014_v52  ;;  %991 = vmatpush1.bf16.msra.mxu1 %v4016_v53 }
  0x4d   :  { %951 = vmatprep.subr.bf16.mxu0 %v4025_v57  ;;  %992 = vmatprep.subr.bf16.mxu1 %v4027_v58 }
  0x4e   :  { %384 = vmatmul.mubr.bf16.gmra.mxu0 %v3171_v49  ;;  %457 = vmatmul.mubr.bf16.gmra.mxu1 %v3171_v49  ;;  %v4141_v49 = vrot.slane %v135_v33, %v5583_v38  ;;  %v4208_v38 = vld [vmem:[#allocation7 + $0x4c] ss:$16 sps:$4 sm:$0xff]  }
  0x4f   :  { %393 = vmatprep.mubr.bf16.mxu0 %v5586_v0  ;;  %466 = vmatprep.mubr.bf16.mxu1 %v5586_v0  ;;  %5855 = vst [vmem:[#allocation33_spill] sm:$0xff] %v4208_v38 }
  0x50   :  { %952 = vmatpush1.bf16.msra.mxu0 %v4031_v59  ;;  %993 = vmatpush1.bf16.msra.mxu1 %v4033_v60  ;;  %5836 = vst [vmem:[#allocation14_spill] sm:$0xff] %v4141_v49 }
  0x51   :  { %953 = vmatprep.subr.bf16.mxu0 %v4041_v1  ;;  %994 = vmatprep.subr.bf16.mxu1 %v4043_v2 }
  0x54   :  { %954 = vmatpush1.bf16.msra.mxu0 %v4045_v3  ;;  %995 = vmatpush1.bf16.msra.mxu1 %v4047_v4 }
  0x55   :  { %955 = vmatprep.subr.bf16.mxu0 %v4056_v8  ;;  %996 = vmatprep.subr.bf16.mxu1 %v4058_v9 }
  0x56   :  { %394 = vmatmul.mubr.bf16.gmra.mxu0 %v3172_v63  ;;  %467 = vmatmul.mubr.bf16.gmra.mxu1 %v3172_v63 }
  0x57   :  { %403 = vmatprep.mubr.bf16.mxu0 %v5586_v0  ;;  %476 = vmatprep.mubr.bf16.mxu1 %v5586_v0 }
  0x58   :  { %956 = vmatpush1.bf16.msra.mxu0 %v4062_v10  ;;  %997 = vmatpush1.bf16.msra.mxu1 %v4064_v11 }
  0x59   :  { %957 = vmatprep.subr.bf16.mxu0 %v4068_v14  ;;  %998 = vmatprep.subr.bf16.mxu1 %v4072_v15 }
  0x5c   :  { %958 = vmatpush1.bf16.msra.mxu0 %v4076_v17  ;;  %999 = vmatpush1.bf16.msra.mxu1 %v4078_v18 }
  0x5d   :  { %959 = vmatprep.subr.bf16.mxu0 %v4082_v19  ;;  %1000 = vmatprep.subr.bf16.mxu1 %v4084_v20 }
  0x5e   :  { %404 = vmatmul.mubr.bf16.gmra.mxu0 %v3173_v16  ;;  %477 = vmatmul.mubr.bf16.gmra.mxu1 %v3173_v16 }
  0x5f   :  { %979 = vmatprep.mubr.bf16.mxu0 %v5586_v0  ;;  %1020 = vmatprep.mubr.bf16.mxu1 %v5586_v0 }
  0x60   :  { %960 = vmatpush1.bf16.msra.mxu0 %v4090_v21  ;;  %1001 = vmatpush1.bf16.msra.mxu1 %v4092_v22 }
  0x61   :  { %961 = vmatprep.subr.bf16.mxu0 %v4096_v23  ;;  %1002 = vmatprep.subr.bf16.mxu1 %v4098_v24 }
  0x64   :  { %962 = vmatpush1.bf16.msra.mxu0 %v4102_v25  ;;  %1003 = vmatpush1.bf16.msra.mxu1 %v4104_v26 }
  0x65   :  { %1377 = vmatprep.subr.bf16.mxu0 %v4108_v27  ;;  %1418 = vmatprep.subr.bf16.mxu1 %v4110_v28 }
 0x106   :  { %v375_v36 = vpop.f32.mrf.mxu0  ;;  %v448_v48 = vpop.f32.mrf.mxu1 }
 0x107   :  { %v376_v40 = vadd.f32 %v375_v36, %v4125_v34  ;;  %v449_v63 = vadd.f32 %v448_v48, %v4137_v47 }
 0x108   :  { %v377_v39 = vpop.f32.mrf.mxu0  ;;  %v450_v56 = vpop.f32.mrf.mxu1 }
 0x109   :  { %v378_v41 = vadd.f32 %v377_v39, %v4129_v35  ;;  %v451_v5 = vadd.f32 %v450_v56, %v4141_v49 }
 0x10b   :  { %v3174_v42 = vpack.c.bf16 %v378_v41, %v376_v40  ;;  %v3175_v6 = vpack.c.bf16 %v451_v5, %v449_v63  ;;  %v4148_v5 = vld [vmem:[#allocation7 + $0xe0] ss:$16 sps:$4 sm:$0xff]  }
 0x10d   :  { %v751_v54 = vunpack.c.l.bf16 %v3174_v42  ;;  %v752_v55 = vunpack.c.h.bf16 %v3174_v42  ;;  %v754_v7 = vunpack.c.h.bf16 %v3175_v6  ;;  %v753_v13 = vunpack.c.l.bf16 %v3175_v6  ;;  %v4150_v6 = vld [vmem:[#allocation7 + $0xe8] ss:$16 sps:$4 sm:$0xff]  }
 0x10e   :  { %5837 = vst [vmem:[#allocation15_spill] sm:$0xff] %v4150_v6 }
 0x10f   :  { %v3019_v61 = vmul.f32 -1.442695, %v751_v54  ;;  %v3020_v62 = vmul.f32 -1.442695, %v752_v55  ;;  %v3021_v12 = vmul.f32 -1.442695, %v754_v7 }
 0x111   :  { %3407 = vpow2.f32 %v3019_v61 }
 0x112   :  { %3409 = vpow2.f32 %v3020_v62 }
 0x113   :  { %3411 = vpow2.f32 %v3021_v12  ;;  %v4154_v12 = vld [vmem:[#allocation7 + $0xc4] ss:$16 sps:$4 sm:$0xff]  }
 0x114   :  { %3413 = vtanh.f32 %v753_v13  ;;  %5838 = vst [vmem:[#allocation16_spill] sm:$0xff] %v4154_v12  ;;  %v4156_v13 = vld [vmem:[#allocation7 + $0xcc] ss:$16 sps:$4 sm:$0xff]  }
 0x115   :  { %5839 = vst [vmem:[#allocation17_spill] sm:$0xff] %v4156_v13 }
 0x11e   :  { %v3408_v16 = vpop.eup %3407 }
 0x11f   :  { %v3410_v29 = vpop.eup %3409  ;;  %v758_v36 = vadd.f32 1.0, %v3408_v16  ;;  %v4162_v16 = vld [vmem:[#allocation7 + $0xc0] ss:$16 sps:$4 sm:$0xff]  }
 0x120   :  { %v764_v33 = vadd.f32 1.0, %v3410_v29  ;;  %v3412_v39 = vpop.eup %3411  ;;  %5840 = vst [vmem:[#allocation18_spill] sm:$0xff] %v4162_v16  ;;  %v4164_v29 = vld [vmem:[#allocation7 + $0xc8] ss:$16 sps:$4 sm:$0xff]  }
 0x121   :  { %3415 = vrcp.f32 %v758_v36  ;;  %v3414_v40 = vpop.eup %3413  ;;  %v771_v48 = vadd.f32 1.0, %v3412_v39  ;;  %5841 = vst [vmem:[#allocation19_spill] sm:$0xff] %v4164_v29  ;;  %v4168_v36 = vld [vmem:[#allocation7 + $0xa4] ss:$16 sps:$4 sm:$0xff]   ;;  %v4176_v39 = vld [vmem:[#allocation7 + $0xa0] ss:$16 sps:$4 sm:$0xff]  }
 0x122   :  { %3417 = vrcp.f32 %v764_v33  ;;  %5842 = vst [vmem:[#allocation20_spill] sm:$0xff] %v4168_v36  ;;  %v4170_v33 = vld [vmem:[#allocation7 + $0xac] ss:$16 sps:$4 sm:$0xff]   ;;  %5844 = vst [vmem:[#allocation22_spill] sm:$0xff] %v4176_v39 }
 0x123   :  { %3419 = vrcp.f32 %v771_v48  ;;  %5843 = vst [vmem:[#allocation21_spill] sm:$0xff] %v4170_v33  ;;  %v4188_v48 = vld [vmem:[#allocation7 + $0x80] ss:$16 sps:$4 sm:$0xff]  }
 0x124   :  { %5848 = vst [vmem:[#allocation26_spill] sm:$0xff] %v4188_v48 }
 0x12e   :  { %v3416_v41 = vpop.eup %3415 }
 0x12f   :  { %v3418_v42 = vpop.eup %3417  ;;  %v775_v54 = vmul.f32 %v3416_v41, %v3414_v40  ;;  %v4178_v40 = vld [vmem:[#allocation7 + $0xa8] ss:$16 sps:$4 sm:$0xff]   ;;  %v4182_v41 = vld [vmem:[#allocation7 + $0x84] ss:$16 sps:$4 sm:$0xff]  }
 0x130   :  { %v774_v55 = vmul.f32 0.0, %v3418_v42  ;;  %v3420_v61 = vpop.eup %3419  ;;  %5845 = vst [vmem:[#allocation23_spill] sm:$0xff] %v4178_v40  ;;  %5846 = vst [vmem:[#allocation24_spill] sm:$0xff] %v4182_v41  ;;  %v4184_v42 = vld [vmem:[#allocation7 + $0x8c] ss:$16 sps:$4 sm:$0xff]  }
 0x131   :  { %5847 = vst [vmem:[#allocation25_spill] sm:$0xff] %v4184_v42 }
 0x132   :  { %v4145_v56 = vadd.f32 %v775_v54, %v774_v55  ;;  %v4190_v54 = vld [vmem:[#allocation7 + $0x88] ss:$16 sps:$4 sm:$0xff]   ;;  %v4194_v55 = vld [vmem:[#allocation7 + $0x64] ss:$16 sps:$4 sm:$0xff]  }
 0x133   :  { %5849 = vst [vmem:[#allocation27_spill] sm:$0xff] %v4190_v54  ;;  %5850 = vst [vmem:[#allocation28_spill] sm:$0xff] %v4194_v55 }
 0x134   :  { %3421 = vtanh.f32 %v4145_v56 }
 0x141   :  { %v3422_v62 = vpop.eup %3421 }
 0x142   :  { %v778_v63 = vmul.f32 %v3422_v62, %v3420_v61  ;;  %v4196_v61 = vld [vmem:[#allocation7 + $0x6c] ss:$16 sps:$4 sm:$0xff]   ;;  %v4200_v62 = vld [vmem:[#allocation7 + $0x60] ss:$16 sps:$4 sm:$0xff]  }
 0x143   :  { %5851 = vst [vmem:[#allocation29_spill] sm:$0xff] %v4196_v61  ;;  %5852 = vst [vmem:[#allocation30_spill] sm:$0xff] %v4200_v62 }
 0x144   :  { %v4152_v7 = vpack.c.bf16 %v778_v63, %v778_v63  ;;  %v4202_v63 = vld [vmem:[#allocation7 + $0x68] ss:$16 sps:$4 sm:$0xff]  }
 0x145   :  { %5853 = vst [vmem:[#allocation31_spill] sm:$0xff] %v4202_v63 }
 0x146   :  { %980 = vmatmul.mubr.bf16.vlgmr.msra.gmra.mxu0 %v4152_v7  ;;  %1021 = vmatmul.mubr.bf16.vlgmr.msra.gmra.mxu1 %v4152_v7 }
 0x147   :  { %1378 = vmatpush1.bf16.msra.mxu0 %v4148_v5  ;;  %1419 = vmatpush1.bf16.msra.mxu1 %v4150_v6 }
 0x148   :  { %1379 = vmatprep.subr.bf16.mxu0 %v4154_v12  ;;  %1420 = vmatprep.subr.bf16.mxu1 %v4156_v13 }
 0x149   :  { %1409 = vmatprep.mubr.bf16.mxu0 %v5586_v0  ;;  %1450 = vmatprep.mubr.bf16.mxu1 %v5586_v0  ;;  %v4218_v0 = vld [vmem:[#allocation7 + $0x24] ss:$16 sps:$4 sm:$0xff]  }
 0x14a   :  { %5858 = vst [vmem:[#allocation36_spill] sm:$0xff] %v4218_v0 }
 0x14b   :  { %1380 = vmatpush1.bf16.msra.mxu0 %v4162_v16  ;;  %1421 = vmatpush1.bf16.msra.mxu1 %v4164_v29 }
 0x14c   :  { %1381 = vmatprep.subr.bf16.mxu0 %v4168_v36  ;;  %1422 = vmatprep.subr.bf16.mxu1 %v4170_v33  ;;  %v4282_v36 = vld [vmem:[#allocation7 + $0x1a0] ss:$16 sps:$4 sm:$0xff]  }
 0x14d   :  { %5876 = vst [vmem:[#allocation54_spill] sm:$0xff] %v4282_v36 }
 0x14f   :  { %1382 = vmatpush1.bf16.msra.mxu0 %v4176_v39  ;;  %1423 = vmatpush1.bf16.msra.mxu1 %v4178_v40 }
 0x150   :  { %1383 = vmatprep.subr.bf16.mxu0 %v4182_v41  ;;  %1424 = vmatprep.subr.bf16.mxu1 %v4184_v42 }
 0x153   :  { %1384 = vmatpush1.bf16.msra.mxu0 %v4188_v48  ;;  %1425 = vmatpush1.bf16.msra.mxu1 %v4190_v54  ;;  %v4248_v54 = vpop.f32.mrf.mxu1 }
 0x154   :  { %1385 = vmatprep.subr.bf16.mxu0 %v4194_v55  ;;  %1426 = vmatprep.subr.bf16.mxu1 %v4196_v61  ;;  %v4220_v55 = vld [vmem:[#allocation7 + $0x2c] ss:$16 sps:$4 sm:$0xff]   ;;  %v4224_v61 = vld [vmem:[#allocation7 + $0x20] ss:$16 sps:$4 sm:$0xff]  }
 0x155   :  { %5859 = vst [vmem:[#allocation37_spill] sm:$0xff] %v4220_v55  ;;  %5860 = vst [vmem:[#allocation38_spill] sm:$0xff] %v4224_v61  ;;  %v4264_v42 = vpop.f32.mrf.mxu1 }
 0x157   :  { %1386 = vmatpush1.bf16.msra.mxu0 %v4200_v62  ;;  %1427 = vmatpush1.bf16.msra.mxu1 %v4202_v63  ;;  %v4226_v62 = vld [vmem:[#allocation7 + $0x28] ss:$16 sps:$4 sm:$0xff]   ;;  %v4230_v63 = vld [vmem:[#allocation7 + $0x4] ss:$16 sps:$4 sm:$0xff]   ;;  %v458_v40 = vpop.f32.mrf.mxu1 }
 0x158   :  { %1387 = vmatprep.subr.bf16.mxu0 %v4206_v37  ;;  %1428 = vmatprep.subr.bf16.mxu1 %v4208_v38  ;;  %5861 = vst [vmem:[#allocation39_spill] sm:$0xff] %v4226_v62  ;;  %5862 = vst [vmem:[#allocation40_spill] sm:$0xff] %v4230_v63  ;;  %v4232_v37 = vld [vmem:[#allocation7 + $0xc] ss:$16 sps:$4 sm:$0xff]   ;;  %v4236_v38 = vld [vmem:[#allocation7] ss:$16 sps:$4 sm:$0xff]  }
 0x159   :  { %5863 = vst [vmem:[#allocation41_spill] sm:$0xff] %v4232_v37  ;;  %5864 = vst [vmem:[#allocation42_spill] sm:$0xff] %v4236_v38 }
 0x15b   :  { %1388 = vmatpush1.bf16.msra.mxu0 %v4212_v32  ;;  %1429 = vmatpush1.bf16.msra.mxu1 %v4214_v31  ;;  %v4238_v32 = vld [vmem:[#allocation7 + $0x8] ss:$16 sps:$4 sm:$0xff]   ;;  %v4242_v31 = vld [vmem:[#allocation7 + $0x1e4] ss:$16 sps:$4 sm:$0xff]  }
 0x15c   :  { %1389 = vmatprep.subr.bf16.mxu0 %v4218_v0  ;;  %1430 = vmatprep.subr.bf16.mxu1 %v4220_v55  ;;  %5865 = vst [vmem:[#allocation43_spill] sm:$0xff] %v4238_v32  ;;  %5866 = vst [vmem:[#allocation44_spill] sm:$0xff] %v4242_v31  ;;  %v4244_v0 = vld [vmem:[#allocation7 + $0x1ec] ss:$16 sps:$4 sm:$0xff]   ;;  %v4246_v55 = vpop.f32.mrf.mxu0 }
 0x15d   :  { %5867 = vst [vmem:[#allocation45_spill] sm:$0xff] %v4244_v0 }
 0x15e   :  { %v4262_v48 = vpop.f32.mrf.mxu0 }
 0x15f   :  { %1390 = vmatpush1.bf16.msra.mxu0 %v4224_v61  ;;  %1431 = vmatpush1.bf16.msra.mxu1 %v4226_v62  ;;  %v4252_v62 = vld [vmem:[#allocation7 + $0x1e0] ss:$16 sps:$4 sm:$0xff]   ;;  %v4254_v61 = vld [vmem:[#allocation7 + $0x1e8] ss:$16 sps:$4 sm:$0xff]  }
 0x160   :  { %1391 = vmatprep.subr.bf16.mxu0 %v4230_v63  ;;  %1432 = vmatprep.subr.bf16.mxu1 %v4232_v37  ;;  %5868 = vst [vmem:[#allocation46_spill] sm:$0xff] %v4252_v62  ;;  %5869 = vst [vmem:[#allocation47_spill] sm:$0xff] %v4254_v61  ;;  %v4258_v37 = vld [vmem:[#allocation7 + $0x1c4] ss:$16 sps:$4 sm:$0xff]   ;;  %v4260_v63 = vld [vmem:[#allocation7 + $0x1cc] ss:$16 sps:$4 sm:$0xff]   ;;  %v385_v41 = vpop.f32.mrf.mxu0 }
 0x161   :  { %5870 = vst [vmem:[#allocation48_spill] sm:$0xff] %v4258_v37  ;;  %5871 = vst [vmem:[#allocation49_spill] sm:$0xff] %v4260_v63  ;;  %v386_v39 = vadd.f32 %v385_v41, %v4125_v34  ;;  %v4290_v41 = vld [vmem:[#allocation7 + $0x184] ss:$16 sps:$4 sm:$0xff]  }
 0x162   :  { %v387_v33 = vpop.f32.mrf.mxu0  ;;  %5878 = vst [vmem:[#allocation56_spill] sm:$0xff] %v4290_v41 }
 0x163   :  { %1392 = vmatpush1.bf16.msra.mxu0 %v4236_v38  ;;  %1433 = vmatpush1.bf16.msra.mxu1 %v4238_v32  ;;  %v4268_v32 = vld [vmem:[#allocation7 + $0x1c0] ss:$16 sps:$4 sm:$0xff]   ;;  %v4270_v38 = vld [vmem:[#allocation7 + $0x1c8] ss:$16 sps:$4 sm:$0xff]  }
 0x164   :  { %1393 = vmatprep.subr.bf16.mxu0 %v4242_v31  ;;  %1434 = vmatprep.subr.bf16.mxu1 %v4244_v0  ;;  %5872 = vst [vmem:[#allocation50_spill] sm:$0xff] %v4268_v32  ;;  %5873 = vst [vmem:[#allocation51_spill] sm:$0xff] %v4270_v38  ;;  %v4274_v0 = vld [vmem:[#allocation7 + $0x1a4] ss:$16 sps:$4 sm:$0xff]   ;;  %v4276_v31 = vld [vmem:[#allocation7 + $0x1ac] ss:$16 sps:$4 sm:$0xff]   ;;  %v389_v16 = vpop.f32.mrf.mxu0 }
 0x165   :  { %5874 = vst [vmem:[#allocation52_spill] sm:$0xff] %v4274_v0  ;;  %5875 = vst [vmem:[#allocation53_spill] sm:$0xff] %v4276_v31 }
 0x166   :  { %v391_v30 = vpop.f32.mrf.mxu0 }
 0x167   :  { %1394 = vmatpush2.bf16.msra.mxu0 %v4252_v62  ;;  %1435 = vmatpush2.bf16.msra.mxu1 %v4254_v61  ;;  %v459_v62 = vadd.f32 %v458_v40, %v4137_v47  ;;  %v460_v61 = vpop.f32.mrf.mxu1  ;;  %v4292_v40 = vld [vmem:[#allocation7 + $0x18c] ss:$16 sps:$4 sm:$0xff]   ;;  %v392_v6 = vadd.f32 %v391_v30, %v4129_v35 }
 0x168   :  { %1395 = vmatprep.subr.bf16.mxu0 %v4258_v37  ;;  %1436 = vmatprep.subr.bf16.mxu1 %v4260_v63  ;;  %v4284_v37 = vld [vmem:[#allocation7 + $0x1a8] ss:$16 sps:$4 sm:$0xff]   ;;  %v388_v63 = vadd.f32 %v387_v33, %v4129_v35  ;;  %v461_v29 = vadd.f32 %v460_v61, %v4141_v49  ;;  %5879 = vst [vmem:[#allocation57_spill] sm:$0xff] %v4292_v40 }
 0x169   :  { %5877 = vst [vmem:[#allocation55_spill] sm:$0xff] %v4284_v37 }
 0x16a   :  { %v4294_v13 = vpack.c.bf16 %v388_v63, %v386_v39  ;;  %v4297_v12 = vpack.c.bf16 %v461_v29, %v459_v62  ;;  %v395_v29 = vpop.f32.mrf.mxu0 }
 0x16b   :  { %1396 = vmatpush2.bf16.msra.mxu0 %v4268_v32  ;;  %1437 = vmatpush2.bf16.msra.mxu1 %v4270_v38  ;;  %v462_v32 = vpop.f32.mrf.mxu1  ;;  %v390_v38 = vadd.f32 %v389_v16, %v4125_v34  ;;  %v4310_v16 = vld [vmem:[#allocation7 + $0x164] ss:$16 sps:$4 sm:$0xff]  }
 0x16c   :  { %1397 = vmatprep.subr.bf16.mxu0 %v4274_v0  ;;  %1438 = vmatprep.subr.bf16.mxu1 %v4276_v31  ;;  %5880 = vst [vmem:[#allocation58_spill] sm:$0xff] %v4294_v13  ;;  %5881 = vst [vmem:[#allocation59_spill] sm:$0xff] %v4297_v12  ;;  %v463_v33 = vadd.f32 %v462_v32, %v4137_v47  ;;  %v4302_v31 = vld [vmem:[#allocation7 + $0x180] ss:$16 sps:$4 sm:$0xff]   ;;  %v4304_v0 = vld [vmem:[#allocation7 + $0x188] ss:$16 sps:$4 sm:$0xff]   ;;  %v396_v12 = vadd.f32 %v395_v29, %v4125_v34 }
 0x16d   :  { %v464_v61 = vpop.f32.mrf.mxu1  ;;  %5882 = vst [vmem:[#allocation60_spill] sm:$0xff] %v4302_v31  ;;  %5883 = vst [vmem:[#allocation61_spill] sm:$0xff] %v4304_v0  ;;  %v4312_v32 = vld [vmem:[#allocation7 + $0x16c] ss:$16 sps:$4 sm:$0xff]   ;;  %v4314_v63 = vpack.c.bf16 %v392_v6, %v390_v38  ;;  %v4330_v6 = vld [vmem:[#allocation7 + $0x144] ss:$16 sps:$4 sm:$0xff]  }
 0x16e   :  { %v465_v39 = vadd.f32 %v464_v61, %v4141_v49  ;;  %5884 = vst [vmem:[#allocation62_spill] sm:$0xff] %v4310_v16  ;;  %5885 = vst [vmem:[#allocation63_spill] sm:$0xff] %v4312_v32 }
 0x16f   :  { %1398 = vmatpush2.bf16.msra.mxu0 %v4282_v36  ;;  %1439 = vmatpush2.bf16.msra.mxu1 %v4284_v37  ;;  %v468_v62 = vpop.f32.mrf.mxu1  ;;  %5886 = vst [vmem:[#allocation64_spill] sm:$0xff] %v4314_v63  ;;  %v397_v37 = vpop.f32.mrf.mxu0  ;;  %5890 = vst [vmem:[#allocation68_spill] sm:$0xff] %v4330_v6 }
 0x170   :  { %1399 = vmatprep.subr.bf16.mxu0 %v4290_v41  ;;  %1440 = vmatprep.subr.bf16.mxu1 %v4292_v40  ;;  %v4317_v13 = vpack.c.bf16 %v465_v39, %v463_v33  ;;  %v469_v30 = vadd.f32 %v468_v62, %v4137_v47  ;;  %v4322_v40 = vld [vmem:[#allocation7 + $0x160] ss:$16 sps:$4 sm:$0xff]   ;;  %v4324_v41 = vld [vmem:[#allocation7 + $0x168] ss:$16 sps:$4 sm:$0xff]   ;;  %v398_v36 = vadd.f32 %v397_v37, %v4129_v35  ;;  %v4332_v33 = vld [vmem:[#allocation7 + $0x14c] ss:$16 sps:$4 sm:$0xff]  }
 0x171   :  { %v470_v61 = vpop.f32.mrf.mxu1  ;;  %5888 = vst [vmem:[#allocation66_spill] sm:$0xff] %v4322_v40  ;;  %5889 = vst [vmem:[#allocation67_spill] sm:$0xff] %v4324_v41  ;;  %v399_v39 = vpop.f32.mrf.mxu0 }
 0x172   :  { %5887 = vst [vmem:[#allocation65_spill] sm:$0xff] %v4317_v13  ;;  %v471_v38 = vadd.f32 %v470_v61, %v4141_v49  ;;  %5891 = vst [vmem:[#allocation69_spill] sm:$0xff] %v4332_v33  ;;  %v4334_v62 = vpack.c.bf16 %v398_v36, %v396_v12  ;;  %v400_v13 = vadd.f32 %v399_v39, %v4125_v34  ;;  %v4350_v36 = vld [vmem:[#allocation7 + $0x124] ss:$16 sps:$4 sm:$0xff]  }
 0x173   :  { %1400 = vmatpush2.bf16.msra.mxu0 %v4302_v31  ;;  %1441 = vmatpush2.bf16.msra.mxu1 %v4304_v0  ;;  %v472_v29 = vpop.f32.mrf.mxu1  ;;  %v401_v0 = vpop.f32.mrf.mxu0  ;;  %5894 = vst [vmem:[#allocation72_spill] sm:$0xff] %v4350_v36 }
 0x174   :  { %1401 = vmatprep.subr.bf16.mxu0 %v4310_v16  ;;  %1442 = vmatprep.subr.bf16.mxu1 %v4312_v32  ;;  %5892 = vst [vmem:[#allocation70_spill] sm:$0xff] %v4334_v62  ;;  %v4337_v63 = vpack.c.bf16 %v471_v38, %v469_v30  ;;  %v473_v37 = vadd.f32 %v472_v29, %v4137_v47  ;;  %v4342_v32 = vld [vmem:[#allocation7 + $0x140] ss:$16 sps:$4 sm:$0xff]   ;;  %v4344_v16 = vld [vmem:[#allocation7 + $0x148] ss:$16 sps:$4 sm:$0xff]  }
 0x175   :  { %v474_v61 = vpop.f32.mrf.mxu1  ;;  %v402_v31 = vadd.f32 %v401_v0, %v4129_v35  ;;  %v4352_v30 = vld [vmem:[#allocation7 + $0x12c] ss:$16 sps:$4 sm:$0xff]   ;;  %v405_v38 = vpop.f32.mrf.mxu0 }
 0x176   :  { %5893 = vst [vmem:[#allocation71_spill] sm:$0xff] %v4337_v63  ;;  %v475_v12 = vadd.f32 %v474_v61, %v4141_v49  ;;  %5895 = vst [vmem:[#allocation73_spill] sm:$0xff] %v4352_v30  ;;  %v406_v63 = vadd.f32 %v405_v38, %v4125_v34 }
 0x177   :  { %1402 = vmatpush2.bf16.msra.mxu0 %v4322_v40  ;;  %1443 = vmatpush2.bf16.msra.mxu1 %v4324_v41  ;;  %v478_v39 = vpop.f32.mrf.mxu1  ;;  %v4354_v29 = vpack.c.bf16 %v402_v31, %v400_v13  ;;  %v407_v41 = vpop.f32.mrf.mxu0  ;;  %v4370_v13 = vld [vmem:[#allocation7 + $0x104] ss:$16 sps:$4 sm:$0xff]  }
 0x178   :  { %1403 = vmatprep.subr.bf16.mxu0 %v4330_v6  ;;  %1444 = vmatprep.subr.bf16.mxu1 %v4332_v33  ;;  %v4357_v62 = vpack.c.bf16 %v475_v12, %v473_v37  ;;  %v479_v0 = vadd.f32 %v478_v39, %v4137_v47  ;;  %v4362_v33 = vld [vmem:[#allocation7 + $0x120] ss:$16 sps:$4 sm:$0xff]   ;;  %v4364_v6 = vld [vmem:[#allocation7 + $0x128] ss:$16 sps:$4 sm:$0xff]   ;;  %v408_v40 = vadd.f32 %v407_v41, %v4129_v35  ;;  %v4372_v37 = vld [vmem:[#allocation7 + $0x10c] ss:$16 sps:$4 sm:$0xff]  }
 0x179   :  { %5896 = vst [vmem:[#allocation74_spill] sm:$0xff] %v4354_v29  ;;  %v480_v61 = vpop.f32.mrf.mxu1  ;;  %5898 = vst [vmem:[#allocation76_spill] sm:$0xff] %v4364_v6  ;;  %v4380_v39 = vld [vmem:[#allocation7 + $0x100] ss:$16 sps:$4 sm:$0xff]   ;;  %v4382_v41 = vld [vmem:[#allocation7 + $0x108] ss:$16 sps:$4 sm:$0xff]  }
 0x17a   :  { %5897 = vst [vmem:[#allocation75_spill] sm:$0xff] %v4357_v62  ;;  %v481_v31 = vadd.f32 %v480_v61, %v4141_v49  ;;  %v4374_v12 = vpack.c.bf16 %v408_v40, %v406_v63  ;;  %v5901_v40 = vmov 0   ;;  %v5927_v29 = vld [vmem:[#allocation29_spill] sm:$0xff] }
 0x17b   :  { %1404 = vmatpush2.bf16.msra.mxu0 %v4342_v32  ;;  %1445 = vmatpush2.bf16.msra.mxu1 %v4344_v16 }
 0x17c   :  { %1405 = vmatprep.subr.bf16.mxu0 %v4350_v36  ;;  %1446 = vmatprep.subr.bf16.mxu1 %v4352_v30  ;;  %5899 = vst [vmem:[#allocation77_spill] sm:$0xff] %v4374_v12  ;;  %v4376_v38 = vpack.c.bf16 %v481_v31, %v479_v0 }
 0x17e   :  { %5900 = vst [vmem:[#allocation78_spill] sm:$0xff] %v4376_v38 }
 0x17f   :  { %1406 = vmatpush2.bf16.msra.mxu0 %v4362_v33  ;;  %1447 = vmatpush2.bf16.msra.mxu1 %v4364_v6 }
 0x180   :  { %1407 = vmatprep.subr.bf16.mxu0 %v4370_v13  ;;  %1448 = vmatprep.subr.bf16.mxu1 %v4372_v37 }
 0x183   :  { %1408 = vmatpush2.bf16.msra.mxu0 %v4380_v39  ;;  %1449 = vmatpush2.bf16.msra.mxu1 %v4382_v41 }
 0x184   :  { %1492 = vmatprep.subr.bf16.mxu0 %v3996_v43  ;;  %1533 = vmatprep.subr.bf16.mxu1 %v3998_v44  ;;  %v382_v43 = vadd.f32 %v4262_v48, %v4129_v35  ;;  %v4428_v44 = vpop.f32.mrf.mxu1  ;;  %v455_v48 = vadd.f32 %v4264_v42, %v4141_v49 }
 0x185   :  { %5902 = vst [vmem:[#allocation79_spill] sm:$0xff] %v4428_v44 }
 0x186   :  { %1410 = vmatmul.mubr.bf16.vlgmr.msra.gmra.mxu0 %v4152_v7  ;;  %1451 = vmatmul.mubr.bf16.vlgmr.msra.gmra.mxu1 %v4152_v7  ;;  %v453_v7 = vadd.f32 %v4248_v54, %v4137_v47 }
 0x187   :  { %1493 = vmatpush1.bf16.msra.mxu0 %v4000_v45  ;;  %1534 = vmatpush1.bf16.msra.mxu1 %v4002_v46  ;;  %v380_v45 = vadd.f32 %v4246_v55, %v4125_v34  ;;  %v4432_v46 = vpop.f32.mrf.mxu0  ;;  %v5920_v34 = vld [vmem:[#allocation24_spill] sm:$0xff] }
 0x188   :  { %1494 = vmatprep.subr.bf16.mxu0 %v4010_v50  ;;  %1535 = vmatprep.subr.bf16.mxu1 %v4012_v51  ;;  %5903 = vst [vmem:[#allocation80_spill] sm:$0xff] %v4432_v46  ;;  %v4434_v51 = vpop.f32.mrf.mxu1 }
 0x189   :  { %1524 = vmatprep.mubr.bf16.mxu0 %v5901_v40  ;;  %1565 = vmatprep.mubr.bf16.mxu1 %v5901_v40  ;;  %v3176_v50 = vpack.c.bf16 %v382_v43, %v380_v45  ;;  %5904 = vst [vmem:[#allocation81_spill] sm:$0xff] %v4434_v51  ;;  %v3177_v51 = vpack.c.bf16 %v455_v48, %v453_v7 }
 0x18b   :  { %1495 = vmatpush1.bf16.msra.mxu0 %v4014_v52  ;;  %1536 = vmatpush1.bf16.msra.mxu1 %v4016_v53  ;;  %v4436_v52 = vpop.f32.mrf.mxu0  ;;  %v782_v53 = vunpack.c.l.bf16 %v3176_v50 }
 0x18c   :  { %1496 = vmatprep.subr.bf16.mxu0 %v4025_v57  ;;  %1537 = vmatprep.subr.bf16.mxu1 %v4027_v58  ;;  %5905 = vst [vmem:[#allocation82_spill] sm:$0xff] %v4436_v52 }
 0x18f   :  { %1497 = vmatpush1.bf16.msra.mxu0 %v4031_v59  ;;  %1538 = vmatpush1.bf16.msra.mxu1 %v4033_v60  ;;  %v783_v60 = vunpack.c.h.bf16 %v3176_v50 }
 0x190   :  { %1498 = vmatprep.subr.bf16.mxu0 %v4041_v1  ;;  %1539 = vmatprep.subr.bf16.mxu1 %v4043_v2 }
 0x193   :  { %1499 = vmatpush1.bf16.msra.mxu0 %v4045_v3  ;;  %1540 = vmatpush1.bf16.msra.mxu1 %v4047_v4 }
 0x194   :  { %1500 = vmatprep.subr.bf16.mxu0 %v4056_v8  ;;  %1541 = vmatprep.subr.bf16.mxu1 %v4058_v9 }
 0x197   :  { %1501 = vmatpush1.bf16.msra.mxu0 %v4062_v10  ;;  %1542 = vmatpush1.bf16.msra.mxu1 %v4064_v11 }
 0x198   :  { %1502 = vmatprep.subr.bf16.mxu0 %v4068_v14  ;;  %1543 = vmatprep.subr.bf16.mxu1 %v4072_v15 }
 0x19b   :  { %1503 = vmatpush1.bf16.msra.mxu0 %v4076_v17  ;;  %1544 = vmatpush1.bf16.msra.mxu1 %v4078_v18 }
 0x19c   :  { %1504 = vmatprep.subr.bf16.mxu0 %v4082_v19  ;;  %1545 = vmatprep.subr.bf16.mxu1 %v4084_v20 }
 0x19f   :  { %1505 = vmatpush1.bf16.msra.mxu0 %v4090_v21  ;;  %1546 = vmatpush1.bf16.msra.mxu1 %v4092_v22 }
 0x1a0   :  { %1506 = vmatprep.subr.bf16.mxu0 %v4096_v23  ;;  %1547 = vmatprep.subr.bf16.mxu1 %v4098_v24 }
 0x1a3   :  { %1507 = vmatpush1.bf16.msra.mxu0 %v4102_v25  ;;  %1548 = vmatpush1.bf16.msra.mxu1 %v4104_v26 }
 0x1a4   :  { %1603 = vmatprep.subr.bf16.mxu0 %v4108_v27  ;;  %1644 = vmatprep.subr.bf16.mxu1 %v4110_v28 }
 0x206   :  { %v981_v57 = vpop.f32.mrf.mxu0  ;;  %v1022_v58 = vpop.f32.mrf.mxu1 }
 0x207   :  { %v1029_v59 = vadd.f32 %v981_v57, %v782_v53  ;;  %v785_v53 = vunpack.c.h.bf16 %v3177_v51  ;;  %v784_v57 = vunpack.c.l.bf16 %v3177_v51 }
 0x208   :  { %v983_v63 = vpop.f32.mrf.mxu0  ;;  %v1024_v55 = vpop.f32.mrf.mxu1 }
 0x209   :  { %v3054_v0 = vmul.f32 -1.442695, %v1029_v59  ;;  %v1030_v61 = vadd.f32 %v983_v63, %v783_v60  ;;  %v1032_v50 = vadd.f32 %v1024_v55, %v785_v53  ;;  %v1031_v47 = vadd.f32 %v1022_v58, %v784_v57  ;;  %v5911_v53 = vld [vmem:[#allocation17_spill] sm:$0xff] }
 0x20a   :  { %v985_v31 = vpop.f32.mrf.mxu0  ;;  %v1026_v43 = vpop.f32.mrf.mxu1 }
 0x20b   :  { %3423 = vpow2.f32 %v3054_v0  ;;  %v3055_v45 = vmul.f32 -1.442695, %v1030_v61  ;;  %v3056_v35 = vmul.f32 -1.442695, %v1032_v50  ;;  %v5907_v61 = vld [vmem:[#allocation10_spill] sm:$0xff] }
 0x20c   :  { %v986_v44 = vpop.f32.mrf.mxu0  ;;  %v1027_v52 = vpop.f32.mrf.mxu1  ;;  %v5908_v31 = vsub.s32 0, %v5907_v61  ;;  %v5912_v50 = vsub.s32 1, %v5907_v61  ;;  %v5922_v62 = vsub.s32 3, %v5907_v61 }
 0x20d   :  { %3425 = vpow2.f32 %v3055_v45  ;;  %v5910_v45 = vld [vmem:[#allocation16_spill] sm:$0xff] }
 0x20e   :  { %3427 = vpow2.f32 %v3056_v35 }
 0x218   :  { %v3424_v54 = vpop.eup %3423 }
 0x219   :  { %v1036_v46 = vadd.f32 1.0, %v3424_v54 }
 0x21a   :  { %v3426_v42 = vpop.eup %3425 }
 0x21b   :  { %3429 = vrcp.f32 %v1036_v46  ;;  %v1042_v59 = vadd.f32 1.0, %v3426_v42  ;;  %v3428_v60 = vpop.eup %3427 }
 0x21c   :  { %3431 = vtanh.f32 %v1031_v47  ;;  %v1049_v44 = vadd.f32 1.0, %v3428_v60  ;;  %v727_v47 = vld [vmem:[%s5579_s6] sm:$0xf]  ;;  %v5915_v60 = vld [vmem:[#allocation19_spill] sm:$0xff] }
 0x21d   :  { %3433 = vrcp.f32 %v1042_v59  ;;  %v4457_v43 = vrot.slane %v727_v47, %v5908_v31  ;;  %v4463_v57 = vrot.slane %v727_v47, %v5912_v50  ;;  %v5914_v59 = vld [vmem:[#allocation18_spill] sm:$0xff]  ;;  %v5919_v50 = vld [vmem:[#allocation23_spill] sm:$0xff] }
 0x21e   :  { %3435 = vrcp.f32 %v1049_v44  ;;  %v5918_v31 = vld [vmem:[#allocation22_spill] sm:$0xff] }
 0x21f   :  { %5913 = vst [vmem:[#allocation10_spill] sm:$0xff] %v4463_v57 }
 0x228   :  { %v3430_v63 = vpop.eup %3429 }
 0x229   :  { %v3432_v0 = vpop.eup %3431 }
 0x22a   :  { %v3434_v7 = vpop.eup %3433  ;;  %v1053_v52 = vmul.f32 %v3432_v0, %v3430_v63  ;;  %v5916_v0 = vld [vmem:[#allocation20_spill] sm:$0xff] }
 0x22b   :  { %v1052_v48 = vmul.f32 %v3434_v7, %v4145_v56  ;;  %v3436_v51 = vpop.eup %3435  ;;  %v5906_v56 = vld [vmem:[#allocation15_spill] sm:$0xff]  ;;  %v5917_v7 = vld [vmem:[#allocation21_spill] sm:$0xff] }
 0x22c   :  { %5909 = vst [vmem:[#allocation15_spill] sm:$0xff] %v4457_v43 }
 0x22d   :  { %v4443_v55 = vadd.f32 %v1053_v52, %v1052_v48 }
 0x22f   :  { %3437 = vtanh.f32 %v4443_v55 }
 0x23c   :  { %v3438_v58 = vpop.eup %3437 }
 0x23d   :  { %v1056_v35 = vmul.f32 %v3438_v58, %v3436_v51 }
 0x23f   :  { %v4446_v46 = vpack.c.bf16 %v1056_v35, %v1056_v35 }
 0x241   :  { %1525 = vmatmul.mubr.bf16.vlgmr.msra.gmra.mxu0 %v4446_v46  ;;  %1566 = vmatmul.mubr.bf16.vlgmr.msra.gmra.mxu1 %v4446_v46 }
 0x242   :  { %1604 = vmatpush1.bf16.msra.mxu0 %v4148_v5  ;;  %1645 = vmatpush1.bf16.msra.mxu1 %v5906_v56 }
 0x243   :  { %1605 = vmatprep.subr.bf16.mxu0 %v5910_v45  ;;  %1646 = vmatprep.subr.bf16.mxu1 %v5911_v53 }
 0x246   :  { %v1411_v54 = vpop.f32.mrf.mxu0  ;;  %v1452_v42 = vpop.f32.mrf.mxu1  ;;  %1606 = vmatpush1.bf16.msra.mxu0 %v5914_v59  ;;  %1647 = vmatpush1.bf16.msra.mxu1 %v5915_v60 }
 0x247   :  { %v1412_v63 = vadd.f32 %v1411_v54, %v4457_v43  ;;  %1607 = vmatprep.subr.bf16.mxu0 %v5916_v0  ;;  %1648 = vmatprep.subr.bf16.mxu1 %v5917_v7  ;;  %v5921_v54 = vld [vmem:[#allocation25_spill] sm:$0xff] }
 0x248   :  { %v1413_v44 = vpop.f32.mrf.mxu0  ;;  %v1454_v52 = vpop.f32.mrf.mxu1 }
 0x249   :  { %v3121_v48 = vmul.f32 -1.442695, %v1412_v63  ;;  %v1414_v51 = vadd.f32 %v1413_v44, %v4463_v57  ;;  %v4477_v63 = vrot.slane %v727_v47, %v5922_v62  ;;  %v5924_v44 = vld [vmem:[#allocation26_spill] sm:$0xff]  ;;  %v5932_v62 = vsub.s32 2, %v5907_v61  ;;  %v5939_v61 = vld [vmem:[#allocation39_spill] sm:$0xff] }
 0x24a   :  { %v1415_v58 = vpop.f32.mrf.mxu0  ;;  %v1456_v35 = vpop.f32.mrf.mxu1  ;;  %1608 = vmatpush1.bf16.msra.mxu0 %v5918_v31  ;;  %1649 = vmatpush1.bf16.msra.mxu1 %v5919_v50 }
 0x24b   :  { %3439 = vpow2.f32 %v3121_v48  ;;  %v3122_v49 = vmul.f32 -1.442695, %v1414_v51  ;;  %1609 = vmatprep.subr.bf16.mxu0 %v5920_v34  ;;  %1650 = vmatprep.subr.bf16.mxu1 %v5921_v54  ;;  %5923 = vst [vmem:[#allocation16_spill] sm:$0xff] %v4477_v63  ;;  %v5925_v58 = vld [vmem:[#allocation27_spill] sm:$0xff]  ;;  %v5926_v35 = vld [vmem:[#allocation28_spill] sm:$0xff]  ;;  %v1455_v48 = vadd.f32 %v1454_v52, %v4477_v63  ;;  %v5928_v51 = vld [vmem:[#allocation30_spill] sm:$0xff] }
 0x24c   :  { %v1416_v38 = vpop.f32.mrf.mxu0  ;;  %v1457_v12 = vpop.f32.mrf.mxu1  ;;  %v5929_v54 = vld [vmem:[#allocation31_spill] sm:$0xff]  ;;  %v5937_v52 = vld [vmem:[#allocation37_spill] sm:$0xff] }
 0x24d   :  { %3441 = vpow2.f32 %v3122_v49  ;;  %v5930_v12 = vld [vmem:[#allocation32_spill] sm:$0xff]  ;;  %v5931_v49 = vld [vmem:[#allocation33_spill] sm:$0xff]  ;;  %v4490_v38 = vrot.slane %v727_v47, %v5932_v62 }
 0x24e   :  { %1610 = vmatpush1.bf16.msra.mxu0 %v5924_v44  ;;  %1651 = vmatpush1.bf16.msra.mxu1 %v5925_v58  ;;  %v3123_v44 = vmul.f32 -1.442695, %v1455_v48  ;;  %v5934_v58 = vld [vmem:[#allocation34_spill] sm:$0xff]  ;;  %v5940_v48 = vld [vmem:[#allocation40_spill] sm:$0xff]  ;;  %v5941_v62 = vld [vmem:[#allocation41_spill] sm:$0xff] }
 0x24f   :  { %1611 = vmatprep.subr.bf16.mxu0 %v5926_v35  ;;  %1652 = vmatprep.subr.bf16.mxu1 %v5927_v29  ;;  %5933 = vst [vmem:[#allocation17_spill] sm:$0xff] %v4490_v38  ;;  %v5935_v35 = vld [vmem:[#allocation35_spill] sm:$0xff]  ;;  %v5936_v29 = vld [vmem:[#allocation36_spill] sm:$0xff] }
 0x250   :  { %3443 = vpow2.f32 %v3123_v44  ;;  %v5946_v44 = vld [vmem:[#allocation46_spill] sm:$0xff] }
 0x252   :  { %1612 = vmatpush1.bf16.msra.mxu0 %v5928_v51  ;;  %1653 = vmatpush1.bf16.msra.mxu1 %v5929_v54  ;;  %v1453_v54 = vadd.f32 %v1452_v42, %v4490_v38  ;;  %v5944_v42 = vld [vmem:[#allocation44_spill] sm:$0xff] }
 0x253   :  { %1613 = vmatprep.subr.bf16.mxu0 %v5930_v12  ;;  %1654 = vmatprep.subr.bf16.mxu1 %v5931_v49  ;;  %v5938_v49 = vld [vmem:[#allocation38_spill] sm:$0xff] }
 0x256   :  { %1614 = vmatpush1.bf16.msra.mxu0 %v5934_v58  ;;  %1655 = vmatpush1.bf16.msra.mxu1 %v5935_v35 }
 0x257   :  { %1615 = vmatprep.subr.bf16.mxu0 %v5936_v29  ;;  %1656 = vmatprep.subr.bf16.mxu1 %v5937_v52  ;;  %v5942_v29 = vld [vmem:[#allocation42_spill] sm:$0xff]  ;;  %v5943_v52 = vld [vmem:[#allocation43_spill] sm:$0xff] }
 0x258   :  { %v3440_v63 = vpop.eup %3439 }
 0x259   :  { %v1462_v51 = vadd.f32 1.0, %v3440_v63  ;;  %v5945_v63 = vld [vmem:[#allocation45_spill] sm:$0xff] }
 0x25a   :  { %v3442_v12 = vpop.eup %3441  ;;  %1616 = vmatpush1.bf16.msra.mxu0 %v5938_v49  ;;  %1657 = vmatpush1.bf16.msra.mxu1 %v5939_v61  ;;  %v5947_v49 = vld [vmem:[#allocation47_spill] sm:$0xff] }
 0x25b   :  { %3445 = vrcp.f32 %v1462_v51  ;;  %v1468_v47 = vadd.f32 1.0, %v3442_v12  ;;  %1617 = vmatprep.subr.bf16.mxu0 %v5940_v48  ;;  %1658 = vmatprep.subr.bf16.mxu1 %v5941_v62  ;;  %v5948_v51 = vld [vmem:[#allocation48_spill] sm:$0xff]  ;;  %v5949_v12 = vld [vmem:[#allocation49_spill] sm:$0xff]  ;;  %v5950_v48 = vld [vmem:[#allocation50_spill] sm:$0xff] }
 0x25c   :  { %3447 = vtanh.f32 %v1453_v54  ;;  %v5951_v54 = vld [vmem:[#allocation51_spill] sm:$0xff] }
 0x25d   :  { %3449 = vrcp.f32 %v1468_v47  ;;  %v3444_v47 = vpop.eup %3443 }
 0x25e   :  { %1618 = vmatpush1.bf16.msra.mxu0 %v5942_v29  ;;  %1659 = vmatpush1.bf16.msra.mxu1 %v5943_v52  ;;  %v5952_v29 = vld [vmem:[#allocation52_spill] sm:$0xff]  ;;  %v5953_v52 = vld [vmem:[#allocation53_spill] sm:$0xff]  ;;  %v1475_v61 = vadd.f32 1.0, %v3444_v47  ;;  %v5960_v47 = vld [vmem:[#allocation62_spill] sm:$0xff] }
 0x25f   :  { %1619 = vmatprep.subr.bf16.mxu0 %v5944_v42  ;;  %1660 = vmatprep.subr.bf16.mxu1 %v5945_v63 }
 0x260   :  { %3451 = vrcp.f32 %v1475_v61 }
 0x262   :  { %1620 = vmatpush2.bf16.msra.mxu0 %v5946_v44  ;;  %1661 = vmatpush2.bf16.msra.mxu1 %v5947_v49  ;;  %v5954_v44 = vld [vmem:[#allocation54_spill] sm:$0xff]  ;;  %v5955_v49 = vld [vmem:[#allocation55_spill] sm:$0xff] }
 0x263   :  { %1621 = vmatprep.subr.bf16.mxu0 %v5948_v51  ;;  %1662 = vmatprep.subr.bf16.mxu1 %v5949_v12  ;;  %v5956_v12 = vld [vmem:[#allocation56_spill] sm:$0xff] }
 0x266   :  { %1622 = vmatpush2.bf16.msra.mxu0 %v5950_v48  ;;  %1663 = vmatpush2.bf16.msra.mxu1 %v5951_v54  ;;  %v5957_v48 = vld [vmem:[#allocation57_spill] sm:$0xff] }
 0x267   :  { %1623 = vmatprep.subr.bf16.mxu0 %v5952_v29  ;;  %1664 = vmatprep.subr.bf16.mxu1 %v5953_v52  ;;  %v5958_v29 = vld [vmem:[#allocation60_spill] sm:$0xff]  ;;  %v5959_v52 = vld [vmem:[#allocation61_spill] sm:$0xff] }
 0x268   :  { %v3446_v42 = vpop.eup %3445 }
 0x269   :  { %v3448_v62 = vpop.eup %3447 }
 0x26a   :  { %v3450_v63 = vpop.eup %3449  ;;  %1624 = vmatpush2.bf16.msra.mxu0 %v5954_v44  ;;  %1665 = vmatpush2.bf16.msra.mxu1 %v5955_v49  ;;  %v1479_v38 = vmul.f32 %v3448_v62, %v3446_v42  ;;  %v5961_v44 = vld [vmem:[#allocation63_spill] sm:$0xff]  ;;  %v5962_v49 = vld [vmem:[#allocation66_spill] sm:$0xff]  ;;  %v5964_v42 = vld [vmem:[#allocation68_spill] sm:$0xff] }
 0x26b   :  { %v1478_v51 = vmul.f32 0.0, %v3450_v63  ;;  %1625 = vmatprep.subr.bf16.mxu0 %v5956_v12  ;;  %1666 = vmatprep.subr.bf16.mxu1 %v5957_v48  ;;  %v5963_v62 = vld [vmem:[#allocation67_spill] sm:$0xff]  ;;  %v5965_v63 = vld [vmem:[#allocation69_spill] sm:$0xff] }
 0x26d   :  { %v4517_v54 = vadd.f32 %v1479_v38, %v1478_v51  ;;  %v3452_v38 = vpop.eup %3451 }
 0x26e   :  { %1626 = vmatpush2.bf16.msra.mxu0 %v5958_v29  ;;  %1667 = vmatpush2.bf16.msra.mxu1 %v5959_v52 }
 0x26f   :  { %3453 = vtanh.f32 %v4517_v54  ;;  %1627 = vmatprep.subr.bf16.mxu0 %v5960_v47  ;;  %1668 = vmatprep.subr.bf16.mxu1 %v5961_v44 }
 0x272   :  { %1628 = vmatpush2.bf16.msra.mxu0 %v5962_v49  ;;  %1669 = vmatpush2.bf16.msra.mxu1 %v5963_v62 }
 0x273   :  { %1629 = vmatprep.subr.bf16.mxu0 %v5964_v42  ;;  %1670 = vmatprep.subr.bf16.mxu1 %v5965_v63 }
 0x276   :  { %1630 = vmatpush2.bf16.msra.mxu0 %v4342_v32  ;;  %1671 = vmatpush2.bf16.msra.mxu1 %v4344_v16 }
 0x277   :  { %1631 = vmatprep.subr.bf16.mxu0 %v4350_v36  ;;  %1672 = vmatprep.subr.bf16.mxu1 %v4352_v30  ;;  %v4541_v36 = vld [vmem:[#allocation5 + $0xe4] ss:$16 sps:$4 sm:$0xff]  }
 0x278   :  { %5966 = vst [vmem:[#allocation18_spill] sm:$0xff] %v4541_v36 }
 0x27a   :  { %1632 = vmatpush2.bf16.msra.mxu0 %v4362_v33  ;;  %1673 = vmatpush2.bf16.msra.mxu1 %v4364_v6  ;;  %v4544_v6 = vld [vmem:[#allocation5 + $0xec] ss:$16 sps:$4 sm:$0xff]  }
 0x27b   :  { %1633 = vmatprep.subr.bf16.mxu0 %v4370_v13  ;;  %1674 = vmatprep.subr.bf16.mxu1 %v4372_v37 }
 0x27c   :  { %v3454_v61 = vpop.eup %3453 }
 0x27d   :  { %v1482_v51 = vmul.f32 %v3454_v61, %v3452_v38  ;;  %v4549_v38 = vld [vmem:[#allocation5 + $0xe0] ss:$16 sps:$4 sm:$0xff]   ;;  %v4552_v61 = vld [vmem:[#allocation5 + $0xe8] ss:$16 sps:$4 sm:$0xff]  }
 0x27e   :  { %1634 = vmatpush2.bf16.msra.mxu0 %v4380_v39  ;;  %1675 = vmatpush2.bf16.msra.mxu1 %v4382_v41  ;;  %5967 = vst [vmem:[#allocation19_spill] sm:$0xff] %v4552_v61 }
 0x27f   :  { %1483 = vst [vmem:[%s5580_s7] sm:$0xff] %v1482_v51  ;;  %v1602_v30 = vpack.c.bf16 %v1482_v51, %v1482_v51  ;;  %1719 = vmatprep.subr.bf16.mxu0 %v4541_v36  ;;  %1760 = vmatprep.subr.bf16.mxu1 %v4544_v6  ;;  %v4555_v51 = vld [vmem:[#allocation5 + $0xc4] ss:$16 sps:$4 sm:$0xff]   ;;  %v4558_v36 = vld [vmem:[#allocation5 + $0xcc] ss:$16 sps:$4 sm:$0xff]  }
 0x280   :  { %5968 = vst [vmem:[#allocation20_spill] sm:$0xff] %v4555_v51  ;;  %5969 = vst [vmem:[#allocation21_spill] sm:$0xff] %v4558_v36 }
 0x281   :  { %1635 = vmatprep.mubr.bf16.mxu0 %v1602_v30  ;;  %1676 = vmatprep.mubr.bf16.mxu1 %v1602_v30  ;;  %v4563_v30 = vld [vmem:[#allocation5 + $0xc0] ss:$16 sps:$4 sm:$0xff]  }
 0x282   :  { %1636 = vmatmul.mubr.bf16.vlgmr.msra.gmra.mxu0 %v4446_v46  ;;  %1677 = vmatmul.mubr.bf16.vlgmr.msra.gmra.mxu1 %v4446_v46  ;;  %v4566_v46 = vld [vmem:[#allocation5 + $0xc8] ss:$16 sps:$4 sm:$0xff]  }
 0x283   :  { %1720 = vmatpush1.bf16.msra.mxu0 %v4549_v38  ;;  %1761 = vmatpush1.bf16.msra.mxu1 %v4552_v61  ;;  %v4569_v61 = vld [vmem:[#allocation5 + $0xa4] ss:$16 sps:$4 sm:$0xff]  }
 0x284   :  { %1721 = vmatprep.subr.bf16.mxu0 %v4555_v51  ;;  %1762 = vmatprep.subr.bf16.mxu1 %v4558_v36  ;;  %v4572_v51 = vld [vmem:[#allocation5 + $0xac] ss:$16 sps:$4 sm:$0xff]   ;;  %v4575_v36 = vld [vmem:[#allocation5 + $0xa0] ss:$16 sps:$4 sm:$0xff]  }
 0x285   :  { %1751 = vmatprep.mubr.bf16.mxu0 %v5901_v40  ;;  %1792 = vmatprep.mubr.bf16.mxu1 %v5901_v40  ;;  %v4578_v40 = vld [vmem:[#allocation5 + $0xa8] ss:$16 sps:$4 sm:$0xff]  }
 0x287   :  { %1722 = vmatpush1.bf16.msra.mxu0 %v4563_v30  ;;  %1763 = vmatpush1.bf16.msra.mxu1 %v4566_v46 }
 0x288   :  { %1723 = vmatprep.subr.bf16.mxu0 %v4569_v61  ;;  %1764 = vmatprep.subr.bf16.mxu1 %v4572_v51 }
 0x28b   :  { %1724 = vmatpush1.bf16.msra.mxu0 %v4575_v36  ;;  %1765 = vmatpush1.bf16.msra.mxu1 %v4578_v40 }
 0x28c   :  { %1725 = vmatprep.subr.bf16.mxu0 %v4041_v1  ;;  %1766 = vmatprep.subr.bf16.mxu1 %v4043_v2  ;;  %v5970_v1 = vld [vmem:[#allocation58_spill] sm:$0xff] }
 0x28d   :  { %v1487_v2 = vunpack.c.l.bf16 %v5970_v1 }
 0x28f   :  { %1726 = vmatpush1.bf16.msra.mxu0 %v4045_v3  ;;  %1767 = vmatpush1.bf16.msra.mxu1 %v4047_v4 }
 0x290   :  { %1727 = vmatprep.subr.bf16.mxu0 %v4056_v8  ;;  %1768 = vmatprep.subr.bf16.mxu1 %v4058_v9  ;;  %v1488_v9 = vunpack.c.h.bf16 %v5970_v1 }
 0x293   :  { %1728 = vmatpush1.bf16.msra.mxu0 %v4062_v10  ;;  %1769 = vmatpush1.bf16.msra.mxu1 %v4064_v11 }
 0x294   :  { %1729 = vmatprep.subr.bf16.mxu0 %v4068_v14  ;;  %1770 = vmatprep.subr.bf16.mxu1 %v4072_v15 }
 0x297   :  { %1730 = vmatpush1.bf16.msra.mxu0 %v4076_v17  ;;  %1771 = vmatpush1.bf16.msra.mxu1 %v4078_v18 }
 0x298   :  { %1731 = vmatprep.subr.bf16.mxu0 %v4082_v19  ;;  %1772 = vmatprep.subr.bf16.mxu1 %v4084_v20 }
 0x29b   :  { %1732 = vmatpush1.bf16.msra.mxu0 %v4090_v21  ;;  %1773 = vmatpush1.bf16.msra.mxu1 %v4092_v22  ;;  %v5971_v22 = vld [vmem:[#allocation59_spill] sm:$0xff] }
 0x29c   :  { %1733 = vmatprep.subr.bf16.mxu0 %v4096_v23  ;;  %1774 = vmatprep.subr.bf16.mxu1 %v4098_v24  ;;  %v1490_v23 = vunpack.c.h.bf16 %v5971_v22 }
 0x29f   :  { %1734 = vmatpush1.bf16.msra.mxu0 %v4102_v25  ;;  %1775 = vmatpush1.bf16.msra.mxu1 %v4104_v26  ;;  %v1489_v25 = vunpack.c.l.bf16 %v5971_v22 }
 0x2a0   :  { %1830 = vmatprep.subr.bf16.mxu0 %v4108_v27  ;;  %1871 = vmatprep.subr.bf16.mxu1 %v4110_v28 }
 0x301   :  { %v1526_v3 = vpop.f32.mrf.mxu0  ;;  %v1567_v4 = vpop.f32.mrf.mxu1 }
 0x302   :  { %v1574_v8 = vadd.f32 %v1526_v3, %v1487_v2  ;;  %v1576_v26 = vadd.f32 %v1567_v4, %v1489_v25 }
 0x303   :  { %v1528_v10 = vpop.f32.mrf.mxu0  ;;  %v1569_v11 = vpop.f32.mrf.mxu1 }
 0x304   :  { %v3124_v14 = vmul.f32 -1.442695, %v1574_v8  ;;  %v1575_v15 = vadd.f32 %v1528_v10, %v1488_v9  ;;  %v1577_v24 = vadd.f32 %v1569_v11, %v1490_v23 }
 0x305   :  { %v1530_v17 = vpop.f32.mrf.mxu0  ;;  %v1571_v18 = vpop.f32.mrf.mxu1 }
 0x306   :  { %3455 = vpow2.f32 %v3124_v14  ;;  %v3125_v19 = vmul.f32 -1.442695, %v1575_v15  ;;  %v3126_v27 = vmul.f32 -1.442695, %v1577_v24 }
 0x307   :  { %v1531_v20 = vpop.f32.mrf.mxu0  ;;  %v1572_v21 = vpop.f32.mrf.mxu1 }
 0x308   :  { %3457 = vpow2.f32 %v3125_v19 }
 0x309   :  { %3459 = vtanh.f32 %v1576_v26  ;;  %v5973_v26 = vld [vmem:[#allocation26_spill] sm:$0xff] }
 0x30a   :  { %3461 = vpow2.f32 %v3126_v27  ;;  %v5974_v27 = vld [vmem:[#allocation27_spill] sm:$0xff] }
 0x313   :  { %v3456_v28 = vpop.eup %3455 }
 0x314   :  { %v1581_v1 = vadd.f32 1.0, %v3456_v28  ;;  %v5975_v28 = vld [vmem:[#allocation28_spill] sm:$0xff] }
 0x315   :  { %v3458_v2 = vpop.eup %3457 }
 0x316   :  { %3463 = vrcp.f32 %v1581_v1  ;;  %v1587_v3 = vadd.f32 1.0, %v3458_v2  ;;  %v3460_v8 = vpop.eup %3459  ;;  %v5978_v1 = vld [vmem:[#allocation31_spill] sm:$0xff] }
 0x317   :  { %v3462_v9 = vpop.eup %3461 }
 0x318   :  { %3465 = vrcp.f32 %v1587_v3  ;;  %v1594_v17 = vadd.f32 1.0, %v3462_v9  ;;  %v5980_v3 = vld [vmem:[#allocation32_spill] sm:$0xff] }
 0x31a   :  { %3467 = vrcp.f32 %v1594_v17  ;;  %v5984_v17 = vld [vmem:[#allocation17_spill] sm:$0xff] }
 0x323   :  { %v3464_v10 = vpop.eup %3463 }
 0x324   :  { %v1598_v14 = vmul.f32 %v3464_v10, %v3460_v8  ;;  %v5981_v8 = vld [vmem:[#allocation33_spill] sm:$0xff]  ;;  %v5982_v10 = vld [vmem:[#allocation36_spill] sm:$0xff] }
 0x325   :  { %v3466_v15 = vpop.eup %3465 }
 0x326   :  { %v1597_v11 = vmul.f32 %v3466_v15, %v4443_v55 }
 0x327   :  { %v3468_v4 = vpop.eup %3467 }
 0x328   :  { %v4608_v18 = vadd.f32 %v1598_v14, %v1597_v11  ;;  %v5983_v14 = vld [vmem:[#allocation37_spill] sm:$0xff] }
 0x32a   :  { %3469 = vtanh.f32 %v4608_v18 }
 0x337   :  { %v3470_v19 = vpop.eup %3469 }
 0x338   :  { %v1601_v20 = vmul.f32 %v3470_v19, %v3468_v4  ;;  %v5985_v19 = vld [vmem:[#allocation38_spill] sm:$0xff] }
 0x33a   :  { %v4611_v21 = vpack.c.bf16 %v1601_v20, %v1601_v20  ;;  %v5986_v20 = vld [vmem:[#allocation39_spill] sm:$0xff] }
 0x33c   :  { %1752 = vmatmul.mubr.bf16.vlgmr.msra.gmra.mxu0 %v4611_v21  ;;  %1793 = vmatmul.mubr.bf16.vlgmr.msra.gmra.mxu1 %v4611_v21 }
 0x33d   :  { %1831 = vmatpush1.bf16.msra.mxu0 %v4148_v5  ;;  %1872 = vmatpush1.bf16.msra.mxu1 %v5906_v56 }
 0x33e   :  { %1832 = vmatprep.subr.bf16.mxu0 %v5910_v45  ;;  %1873 = vmatprep.subr.bf16.mxu1 %v5911_v53 }
 0x341   :  { %1833 = vmatpush1.bf16.msra.mxu0 %v5914_v59  ;;  %1874 = vmatpush1.bf16.msra.mxu1 %v5915_v60  ;;  %v5972_v59 = vld [vmem:[#allocation25_spill] sm:$0xff] }
 0x342   :  { %v1637_v55 = vpop.f32.mrf.mxu0  ;;  %v1678_v22 = vpop.f32.mrf.mxu1  ;;  %1834 = vmatprep.subr.bf16.mxu0 %v5916_v0  ;;  %1875 = vmatprep.subr.bf16.mxu1 %v5917_v7 }
 0x343   :  { %v1638_v23 = vadd.f32 %v1637_v55, %v4457_v43  ;;  %v1679_v11 = vadd.f32 %v1678_v22, %v5984_v17  ;;  %v5991_v22 = vld [vmem:[#allocation44_spill] sm:$0xff] }
 0x344   :  { %v1639_v24 = vpop.f32.mrf.mxu0  ;;  %v1680_v5 = vpop.f32.mrf.mxu1 }
 0x345   :  { %v3127_v25 = vmul.f32 -1.442695, %v1638_v23  ;;  %v1640_v56 = vadd.f32 %v1639_v24, %v4463_v57  ;;  %1835 = vmatpush1.bf16.msra.mxu0 %v5918_v31  ;;  %1876 = vmatpush1.bf16.msra.mxu1 %v5919_v50  ;;  %v5976_v31 = vld [vmem:[#allocation29_spill] sm:$0xff]  ;;  %v5977_v50 = vld [vmem:[#allocation30_spill] sm:$0xff]  ;;  %v5987_v23 = vld [vmem:[#allocation40_spill] sm:$0xff] }
 0x346   :  { %v1641_v45 = vpop.f32.mrf.mxu0  ;;  %v1682_v53 = vpop.f32.mrf.mxu1  ;;  %1836 = vmatprep.subr.bf16.mxu0 %v5920_v34  ;;  %1877 = vmatprep.subr.bf16.mxu1 %v5972_v59  ;;  %v5979_v34 = vld [vmem:[#allocation16_spill] sm:$0xff]  ;;  %v5989_v24 = vld [vmem:[#allocation42_spill] sm:$0xff]  ;;  %v5996_v59 = vld [vmem:[#allocation49_spill] sm:$0xff] }
 0x347   :  { %3471 = vpow2.f32 %v3127_v25  ;;  %v3128_v60 = vmul.f32 -1.442695, %v1640_v56  ;;  %v1681_v2 = vadd.f32 %v1680_v5, %v5979_v34  ;;  %v5990_v5 = vld [vmem:[#allocation43_spill] sm:$0xff]  ;;  %v5992_v25 = vld [vmem:[#allocation45_spill] sm:$0xff]  ;;  %v5993_v56 = vld [vmem:[#allocation46_spill] sm:$0xff] }
 0x348   :  { %v1642_v0 = vpop.f32.mrf.mxu0  ;;  %v1683_v7 = vpop.f32.mrf.mxu1  ;;  %v5994_v45 = vld [vmem:[#allocation47_spill] sm:$0xff]  ;;  %v5995_v53 = vld [vmem:[#allocation48_spill] sm:$0xff] }
 0x349   :  { %3473 = vpow2.f32 %v3128_v60  ;;  %1837 = vmatpush1.bf16.msra.mxu0 %v5973_v26  ;;  %1878 = vmatpush1.bf16.msra.mxu1 %v5974_v27  ;;  %v3129_v9 = vmul.f32 -1.442695, %v1681_v2  ;;  %v5997_v60 = vld [vmem:[#allocation50_spill] sm:$0xff]  ;;  %v5998_v0 = vld [vmem:[#allocation51_spill] sm:$0xff]  ;;  %v5999_v7 = vld [vmem:[#allocation52_spill] sm:$0xff] }
 0x34a   :  { %1838 = vmatprep.subr.bf16.mxu0 %v5975_v28  ;;  %1879 = vmatprep.subr.bf16.mxu1 %v5976_v31  ;;  %v6000_v26 = vld [vmem:[#allocation53_spill] sm:$0xff] }
 0x34b   :  { %3475 = vpow2.f32 %v3129_v9 }
 0x34d   :  { %1839 = vmatpush1.bf16.msra.mxu0 %v5977_v50  ;;  %1880 = vmatpush1.bf16.msra.mxu1 %v5978_v1  ;;  %v6001_v50 = vld [vmem:[#allocation54_spill] sm:$0xff]  ;;  %v6002_v1 = vld [vmem:[#allocation55_spill] sm:$0xff] }
 0x34e   :  { %1840 = vmatprep.subr.bf16.mxu0 %v5980_v3  ;;  %1881 = vmatprep.subr.bf16.mxu1 %v5981_v8 }
 0x351   :  { %1841 = vmatpush1.bf16.msra.mxu0 %v5934_v58  ;;  %1882 = vmatpush1.bf16.msra.mxu1 %v5935_v35  ;;  %v5988_v58 = vld [vmem:[#allocation41_spill] sm:$0xff] }
 0x352   :  { %1842 = vmatprep.subr.bf16.mxu0 %v5982_v10  ;;  %1883 = vmatprep.subr.bf16.mxu1 %v5983_v14  ;;  %v4725_v14 = vld [vmem:[#allocation5 + $0x68] ss:$16 sps:$4 sm:$0xff]  }
 0x354   :  { %v3472_v15 = vpop.eup %3471 }
 0x355   :  { %v1688_v4 = vadd.f32 1.0, %v3472_v15  ;;  %1843 = vmatpush1.bf16.msra.mxu0 %v5985_v19  ;;  %1884 = vmatpush1.bf16.msra.mxu1 %v5986_v20  ;;  %v4728_v15 = vld [vmem:[#allocation5 + $0x44] ss:$16 sps:$4 sm:$0xff]   ;;  %v4737_v19 = vld [vmem:[#allocation5 + $0x48] ss:$16 sps:$4 sm:$0xff]  }
 0x356   :  { %v3474_v55 = vpop.eup %3473  ;;  %1844 = vmatprep.subr.bf16.mxu0 %v5987_v23  ;;  %1885 = vmatprep.subr.bf16.mxu1 %v5988_v58  ;;  %v4740_v20 = vld [vmem:[#allocation5 + $0x24] ss:$16 sps:$4 sm:$0xff]   ;;  %v4746_v23 = vld [vmem:[#allocation5 + $0x20] ss:$16 sps:$4 sm:$0xff]   ;;  %v4749_v58 = vld [vmem:[#allocation5 + $0x28] ss:$16 sps:$4 sm:$0xff]  }
 0x357   :  { %3477 = vrcp.f32 %v1688_v4  ;;  %v1694_v35 = vadd.f32 1.0, %v3474_v55  ;;  %v4734_v4 = vld [vmem:[#allocation5 + $0x40] ss:$16 sps:$4 sm:$0xff]   ;;  %v4743_v55 = vld [vmem:[#allocation5 + $0x2c] ss:$16 sps:$4 sm:$0xff]  }
 0x358   :  { %3479 = vtanh.f32 %v1679_v11  ;;  %v3476_v27 = vpop.eup %3475  ;;  %v4731_v11 = vld [vmem:[#allocation5 + $0x4c] ss:$16 sps:$4 sm:$0xff]  }
 0x359   :  { %3481 = vrcp.f32 %v1694_v35  ;;  %1845 = vmatpush1.bf16.msra.mxu0 %v5989_v24  ;;  %1886 = vmatpush1.bf16.msra.mxu1 %v5990_v5  ;;  %v1701_v3 = vadd.f32 1.0, %v3476_v27  ;;  %v4752_v35 = vld [vmem:[#allocation5 + $0x4] ss:$16 sps:$4 sm:$0xff]   ;;  %v4755_v24 = vld [vmem:[#allocation5 + $0xc] ss:$16 sps:$4 sm:$0xff]  }
 0x35a   :  { %1846 = vmatprep.subr.bf16.mxu0 %v5991_v22  ;;  %1887 = vmatprep.subr.bf16.mxu1 %v5992_v25  ;;  %v4758_v5 = vld [vmem:[#allocation5] ss:$16 sps:$4 sm:$0xff]   ;;  %v4761_v22 = vld [vmem:[#allocation5 + $0x8] ss:$16 sps:$4 sm:$0xff]   ;;  %v4764_v25 = vld [vmem:[#allocation7 + $0xe4] ss:$16 sps:$4 sm:$0xff]  }
 0x35b   :  { %3483 = vrcp.f32 %v1701_v3  ;;  %6011 = vst [vmem:[#allocation22_spill] sm:$0xff] %v4758_v5  ;;  %6012 = vst [vmem:[#allocation23_spill] sm:$0xff] %v4761_v22 }
 0x35c   :  { %6013 = vst [vmem:[#allocation24_spill] sm:$0xff] %v4764_v25 }
 0x35d   :  { %1847 = vmatpush2.bf16.msra.mxu0 %v5993_v56  ;;  %1888 = vmatpush2.bf16.msra.mxu1 %v5994_v45  ;;  %v4767_v56 = vld [vmem:[#allocation7 + $0xec] ss:$16 sps:$4 sm:$0xff]   ;;  %v6015_v45 = vld [vmem:[#allocation64_spill] sm:$0xff] }
 0x35e   :  { %1848 = vmatprep.subr.bf16.mxu0 %v5995_v53  ;;  %1889 = vmatprep.subr.bf16.mxu1 %v5996_v59  ;;  %6014 = vst [vmem:[#allocation34_spill] sm:$0xff] %v4767_v56  ;;  %v1714_v53 = vunpack.c.l.bf16 %v6015_v45 }
 0x361   :  { %1849 = vmatpush2.bf16.msra.mxu0 %v5997_v60  ;;  %1890 = vmatpush2.bf16.msra.mxu1 %v5998_v0 }
 0x362   :  { %1850 = vmatprep.subr.bf16.mxu0 %v5999_v7  ;;  %1891 = vmatprep.subr.bf16.mxu1 %v6000_v26  ;;  %v1715_v7 = vunpack.c.h.bf16 %v6015_v45 }
 0x364   :  { %v3478_v28 = vpop.eup %3477 }
 0x365   :  { %v3480_v31 = vpop.eup %3479  ;;  %1851 = vmatpush2.bf16.msra.mxu0 %v6001_v50  ;;  %1892 = vmatpush2.bf16.msra.mxu1 %v6002_v1 }
 0x366   :  { %v3482_v2 = vpop.eup %3481  ;;  %1852 = vmatprep.subr.bf16.mxu0 %v5956_v12  ;;  %1893 = vmatprep.subr.bf16.mxu1 %v5957_v48  ;;  %v1705_v8 = vmul.f32 %v3480_v31, %v3478_v28  ;;  %v6005_v48 = vld [vmem:[#allocation76_spill] sm:$0xff] }
 0x367   :  { %v1704_v9 = vmul.f32 %v3482_v2, %v4517_v54  ;;  %v4704_v12 = vld [vmem:[#allocation5 + $0x84] ss:$16 sps:$4 sm:$0xff]   ;;  %v4707_v54 = vld [vmem:[#allocation5 + $0x8c] ss:$16 sps:$4 sm:$0xff]  }
 0x369   :  { %v4664_v10 = vadd.f32 %v1705_v8, %v1704_v9  ;;  %1853 = vmatpush2.bf16.msra.mxu0 %v5958_v29  ;;  %1894 = vmatpush2.bf16.msra.mxu1 %v5959_v52  ;;  %v6003_v29 = vld [vmem:[#allocation72_spill] sm:$0xff]  ;;  %v6004_v52 = vld [vmem:[#allocation73_spill] sm:$0xff] }
 0x36a   :  { %1854 = vmatprep.subr.bf16.mxu0 %v5960_v47  ;;  %1895 = vmatprep.subr.bf16.mxu1 %v5961_v44  ;;  %v4710_v47 = vld [vmem:[#allocation5 + $0x80] ss:$16 sps:$4 sm:$0xff]   ;;  %v6016_v9 = vld [vmem:[#allocation65_spill] sm:$0xff] }
 0x36b   :  { %3485 = vtanh.f32 %v4664_v10 }
 0x36d   :  { %1855 = vmatpush2.bf16.msra.mxu0 %v5962_v49  ;;  %1896 = vmatpush2.bf16.msra.mxu1 %v5963_v62  ;;  %v3484_v49 = vpop.eup %3483  ;;  %v4713_v62 = vld [vmem:[#allocation5 + $0x88] ss:$16 sps:$4 sm:$0xff]  }
 0x36e   :  { %1856 = vmatprep.subr.bf16.mxu0 %v5964_v42  ;;  %1897 = vmatprep.subr.bf16.mxu1 %v5965_v63  ;;  %v4716_v42 = vld [vmem:[#allocation5 + $0x64] ss:$16 sps:$4 sm:$0xff]   ;;  %v4719_v63 = vld [vmem:[#allocation5 + $0x6c] ss:$16 sps:$4 sm:$0xff]  }
 0x371   :  { %1857 = vmatpush2.bf16.msra.mxu0 %v4342_v32  ;;  %1898 = vmatpush2.bf16.msra.mxu1 %v4344_v16  ;;  %v6006_v16 = vld [vmem:[#allocation18_spill] sm:$0xff] }
 0x372   :  { %1858 = vmatprep.subr.bf16.mxu0 %v6003_v29  ;;  %1899 = vmatprep.subr.bf16.mxu1 %v6004_v52  ;;  %v1717_v29 = vunpack.c.h.bf16 %v6016_v9 }
 0x375   :  { %1859 = vmatpush2.bf16.msra.mxu0 %v4362_v33  ;;  %1900 = vmatpush2.bf16.msra.mxu1 %v6005_v48  ;;  %v1716_v48 = vunpack.c.l.bf16 %v6016_v9  ;;  %v4785_v9 = vld [vmem:[#allocation7 + $0xe8] ss:$16 sps:$4 sm:$0xff]  }
 0x376   :  { %1860 = vmatprep.subr.bf16.mxu0 %v4370_v13  ;;  %1901 = vmatprep.subr.bf16.mxu1 %v4372_v37  ;;  %v6007_v13 = vld [vmem:[#allocation19_spill] sm:$0xff]  ;;  %v6008_v37 = vld [vmem:[#allocation20_spill] sm:$0xff] }
 0x378   :  { %v3486_v44 = vpop.eup %3485 }
 0x379   :  { %1861 = vmatpush2.bf16.msra.mxu0 %v4380_v39  ;;  %1902 = vmatpush2.bf16.msra.mxu1 %v4382_v41  ;;  %v1708_v32 = vmul.f32 %v3486_v44, %v3484_v49  ;;  %v6009_v39 = vld [vmem:[#allocation21_spill] sm:$0xff]  ;;  %v6010_v41 = vmov 0  }
 0x37a   :  { %1946 = vmatprep.subr.bf16.mxu0 %v6006_v16  ;;  %1987 = vmatprep.subr.bf16.mxu1 %v4544_v6 }
 0x37b   :  { %3130 = vst [vmem:[%s5580_s7 + $0x8] sm:$0xff] %v1708_v32  ;;  %v1829_v33 = vpack.c.bf16 %v1708_v32, %v1708_v32 }
 0x37d   :  { %1862 = vmatprep.mubr.bf16.mxu0 %v1829_v33  ;;  %1903 = vmatprep.mubr.bf16.mxu1 %v1829_v33 }
 0x37e   :  { %1863 = vmatmul.mubr.bf16.vlgmr.msra.gmra.mxu0 %v4611_v21  ;;  %1904 = vmatmul.mubr.bf16.vlgmr.msra.gmra.mxu1 %v4611_v21  ;;  %v4722_v21 = vld [vmem:[#allocation5 + $0x60] ss:$16 sps:$4 sm:$0xff]  }
 0x37f   :  { %1947 = vmatpush1.bf16.msra.mxu0 %v4549_v38  ;;  %1988 = vmatpush1.bf16.msra.mxu1 %v6007_v13 }
 0x380   :  { %1948 = vmatprep.subr.bf16.mxu0 %v6008_v37  ;;  %1989 = vmatprep.subr.bf16.mxu1 %v6009_v39 }
 0x381   :  { %1978 = vmatprep.mubr.bf16.mxu0 %v6010_v41  ;;  %2019 = vmatprep.mubr.bf16.mxu1 %v6010_v41 }
 0x383   :  { %1949 = vmatpush1.bf16.msra.mxu0 %v4563_v30  ;;  %1990 = vmatpush1.bf16.msra.mxu1 %v4566_v46 }
 0x384   :  { %1950 = vmatprep.subr.bf16.mxu0 %v4569_v61  ;;  %1991 = vmatprep.subr.bf16.mxu1 %v4572_v51 }
 0x387   :  { %1951 = vmatpush1.bf16.msra.mxu0 %v4575_v36  ;;  %1992 = vmatpush1.bf16.msra.mxu1 %v4578_v40 }
 0x388   :  { %1952 = vmatprep.subr.bf16.mxu0 %v4704_v12  ;;  %1993 = vmatprep.subr.bf16.mxu1 %v4707_v54 }
 0x38b   :  { %1953 = vmatpush1.bf16.msra.mxu0 %v4710_v47  ;;  %1994 = vmatpush1.bf16.msra.mxu1 %v4713_v62 }
 0x38c   :  { %1954 = vmatprep.subr.bf16.mxu0 %v4716_v42  ;;  %1995 = vmatprep.subr.bf16.mxu1 %v4719_v63 }
 0x38f   :  { %1955 = vmatpush1.bf16.msra.mxu0 %v4722_v21  ;;  %1996 = vmatpush1.bf16.msra.mxu1 %v4725_v14 }
 0x390   :  { %1956 = vmatprep.subr.bf16.mxu0 %v4728_v15  ;;  %1997 = vmatprep.subr.bf16.mxu1 %v4731_v11 }
 0x393   :  { %1957 = vmatpush1.bf16.msra.mxu0 %v4734_v4  ;;  %1998 = vmatpush1.bf16.msra.mxu1 %v4737_v19 }
 0x394   :  { %1958 = vmatprep.subr.bf16.mxu0 %v4740_v20  ;;  %1999 = vmatprep.subr.bf16.mxu1 %v4743_v55 }
 0x397   :  { %1959 = vmatpush1.bf16.msra.mxu0 %v4746_v23  ;;  %2000 = vmatpush1.bf16.msra.mxu1 %v4749_v58 }
 0x398   :  { %1960 = vmatprep.subr.bf16.mxu0 %v4752_v35  ;;  %2001 = vmatprep.subr.bf16.mxu1 %v4755_v24 }
 0x39b   :  { %1961 = vmatpush1.bf16.msra.mxu0 %v4758_v5  ;;  %2002 = vmatpush1.bf16.msra.mxu1 %v4761_v22 }
 0x39c   :  { %2057 = vmatprep.subr.bf16.mxu0 %v4764_v25  ;;  %2098 = vmatprep.subr.bf16.mxu1 %v4767_v56 }
 0x3fc   :  { %v1753_v59 = vpop.f32.mrf.mxu0  ;;  %v1794_v60 = vpop.f32.mrf.mxu1 }
 0x3fd   :  { %v1801_v0 = vadd.f32 %v1753_v59, %v1714_v53  ;;  %v1803_v49 = vadd.f32 %v1794_v60, %v1716_v48  ;;  %v4797_v48 = vld [vmem:[#allocation7 + $0xc8] ss:$16 sps:$4 sm:$0xff]  }
 0x3fe   :  { %v1755_v26 = vpop.f32.mrf.mxu0  ;;  %v1796_v27 = vpop.f32.mrf.mxu1 }
 0x3ff   :  { %v3131_v28 = vmul.f32 -1.442695, %v1801_v0  ;;  %v1802_v31 = vadd.f32 %v1755_v26, %v1715_v7  ;;  %v1804_v52 = vadd.f32 %v1796_v27, %v1717_v29  ;;  %v4791_v29 = vld [vmem:[#allocation7 + $0xcc] ss:$16 sps:$4 sm:$0xff]  }
 0x400   :  { %v1757_v50 = vpop.f32.mrf.mxu0  ;;  %v1798_v1 = vpop.f32.mrf.mxu1 }
 0x401   :  { %3487 = vpow2.f32 %v3131_v28  ;;  %v3132_v2 = vmul.f32 -1.442695, %v1802_v31  ;;  %v3133_v44 = vmul.f32 -1.442695, %v1804_v52  ;;  %v4794_v52 = vld [vmem:[#allocation7 + $0xc0] ss:$16 sps:$4 sm:$0xff]  }
 0x402   :  { %v1758_v3 = vpop.f32.mrf.mxu0  ;;  %v1799_v8 = vpop.f32.mrf.mxu1 }
 0x403   :  { %3489 = vpow2.f32 %v3132_v2  ;;  %v4782_v8 = vld [vmem:[#allocation7 + $0xe0] ss:$16 sps:$4 sm:$0xff]  }
 0x404   :  { %3491 = vtanh.f32 %v1803_v49  ;;  %v4800_v49 = vld [vmem:[#allocation7 + $0xa4] ss:$16 sps:$4 sm:$0xff]  }
 0x405   :  { %3493 = vpow2.f32 %v3133_v44  ;;  %v4803_v44 = vld [vmem:[#allocation7 + $0xac] ss:$16 sps:$4 sm:$0xff]  }
 0x40e   :  { %v3488_v32 = vpop.eup %3487 }
 0x40f   :  { %v1808_v33 = vadd.f32 1.0, %v3488_v32 }
 0x410   :  { %v3490_v45 = vpop.eup %3489 }
 0x411   :  { %3495 = vrcp.f32 %v1808_v33  ;;  %v1814_v53 = vadd.f32 1.0, %v3490_v45  ;;  %v3492_v59 = vpop.eup %3491 }
 0x412   :  { %v3494_v0 = vpop.eup %3493 }
 0x413   :  { %3497 = vrcp.f32 %v1814_v53  ;;  %v1821_v31 = vadd.f32 1.0, %v3494_v0  ;;  %v4807_v0 = vld [vmem:[#allocation7 + $0xa0] ss:$16 sps:$4 sm:$0xff]  }
 0x414   :  { %6017 = vst [vmem:[#allocation35_spill] sm:$0xff] %v4807_v0 }
 0x415   :  { %3499 = vrcp.f32 %v1821_v31  ;;  %v4814_v31 = vld [vmem:[#allocation7 + $0x84] ss:$16 sps:$4 sm:$0xff]  }
 0x41e   :  { %v3496_v7 = vpop.eup %3495 }
 0x41f   :  { %v1825_v26 = vmul.f32 %v3496_v7, %v3492_v59  ;;  %v4810_v7 = vld [vmem:[#allocation7 + $0xa8] ss:$16 sps:$4 sm:$0xff]  }
 0x420   :  { %v3498_v28 = vpop.eup %3497 }
 0x421   :  { %v1824_v27 = vmul.f32 %v3498_v28, %v4608_v18  ;;  %v4788_v18 = vld [vmem:[#allocation7 + $0xc4] ss:$16 sps:$4 sm:$0xff]  }
 0x422   :  { %v3500_v60 = vpop.eup %3499 }
 0x423   :  { %v4775_v50 = vadd.f32 %v1825_v26, %v1824_v27  ;;  %v4817_v27 = vld [vmem:[#allocation7 + $0x8c] ss:$16 sps:$4 sm:$0xff]  }
 0x425   :  { %3501 = vtanh.f32 %v4775_v50 }
 0x432   :  { %v3502_v1 = vpop.eup %3501 }
 0x433   :  { %v1828_v2 = vmul.f32 %v3502_v1, %v3500_v60 }
 0x435   :  { %v4778_v3 = vpack.c.bf16 %v1828_v2, %v1828_v2 }
 0x437   :  { %1979 = vmatmul.mubr.bf16.vlgmr.msra.gmra.mxu0 %v4778_v3  ;;  %2020 = vmatmul.mubr.bf16.vlgmr.msra.gmra.mxu1 %v4778_v3 }
 0x438   :  { %2058 = vmatpush1.bf16.msra.mxu0 %v4782_v8  ;;  %2099 = vmatpush1.bf16.msra.mxu1 %v4785_v9 }
 0x439   :  { %2059 = vmatprep.subr.bf16.mxu0 %v4788_v18  ;;  %2100 = vmatprep.subr.bf16.mxu1 %v4791_v29 }
 0x43c   :  { %2060 = vmatpush1.bf16.msra.mxu0 %v4794_v52  ;;  %2101 = vmatpush1.bf16.msra.mxu1 %v4797_v48 }
 0x43d   :  { %2061 = vmatprep.subr.bf16.mxu0 %v4800_v49  ;;  %2102 = vmatprep.subr.bf16.mxu1 %v4803_v44 }
 0x43e   :  { %v1864_v32 = vpop.f32.mrf.mxu0  ;;  %v1905_v33 = vpop.f32.mrf.mxu1 }
 0x43f   :  { %v1865_v45 = vadd.f32 %v1864_v32, %v4457_v43  ;;  %v4820_v43 = vld [vmem:[#allocation7 + $0x80] ss:$16 sps:$4 sm:$0xff]  }
 0x440   :  { %v1866_v53 = vpop.f32.mrf.mxu0  ;;  %v1907_v59 = vpop.f32.mrf.mxu1  ;;  %2062 = vmatpush1.bf16.msra.mxu0 %v4807_v0  ;;  %2103 = vmatpush1.bf16.msra.mxu1 %v4810_v7 }
 0x441   :  { %v3134_v26 = vmul.f32 -1.442695, %v1865_v45  ;;  %v1867_v28 = vadd.f32 %v1866_v53, %v4463_v57  ;;  %2063 = vmatprep.subr.bf16.mxu0 %v4814_v31  ;;  %2104 = vmatprep.subr.bf16.mxu1 %v4817_v27  ;;  %v4823_v45 = vld [vmem:[#allocation7 + $0x88] ss:$16 sps:$4 sm:$0xff]   ;;  %v4826_v53 = vld [vmem:[#allocation7 + $0x64] ss:$16 sps:$4 sm:$0xff]  }
 0x442   :  { %v1868_v60 = vpop.f32.mrf.mxu0  ;;  %v1909_v1 = vpop.f32.mrf.mxu1  ;;  %v4829_v57 = vld [vmem:[#allocation7 + $0x6c] ss:$16 sps:$4 sm:$0xff]  }
 0x443   :  { %3503 = vpow2.f32 %v3134_v26  ;;  %v3135_v2 = vmul.f32 -1.442695, %v1867_v28  ;;  %6018 = vst [vmem:[#allocation56_spill] sm:$0xff] %v4829_v57  ;;  %v4832_v26 = vld [vmem:[#allocation7 + $0x60] ss:$16 sps:$4 sm:$0xff]   ;;  %v1908_v1 = vadd.f32 %v1907_v59, %v5979_v34  ;;  %v1906_v59 = vadd.f32 %v1905_v33, %v5984_v17 }
 0x444   :  { %v1869_v32 = vpop.f32.mrf.mxu0  ;;  %v1910_v0 = vpop.f32.mrf.mxu1  ;;  %2064 = vmatpush1.bf16.msra.mxu0 %v4820_v43  ;;  %2105 = vmatpush1.bf16.msra.mxu1 %v4823_v45  ;;  %6019 = vst [vmem:[#allocation57_spill] sm:$0xff] %v4832_v26  ;;  %v4838_v28 = vld [vmem:[#allocation7 + $0x44] ss:$16 sps:$4 sm:$0xff]   ;;  %v4841_v60 = vld [vmem:[#allocation7 + $0x4c] ss:$16 sps:$4 sm:$0xff]  }
 0x445   :  { %3505 = vpow2.f32 %v3135_v2  ;;  %2065 = vmatprep.subr.bf16.mxu0 %v4826_v53  ;;  %2106 = vmatprep.subr.bf16.mxu1 %v4829_v57  ;;  %v4835_v0 = vld [vmem:[#allocation7 + $0x68] ss:$16 sps:$4 sm:$0xff]   ;;  %6021 = vst [vmem:[#allocation61_spill] sm:$0xff] %v4838_v28  ;;  %6022 = vst [vmem:[#allocation62_spill] sm:$0xff] %v4841_v60  ;;  %v4845_v2 = vld [vmem:[#allocation7 + $0x40] ss:$16 sps:$4 sm:$0xff]  }
 0x446   :  { %6020 = vst [vmem:[#allocation60_spill] sm:$0xff] %v4835_v0  ;;  %6023 = vst [vmem:[#allocation63_spill] sm:$0xff] %v4845_v2  ;;  %v4848_v32 = vld [vmem:[#allocation7 + $0x48] ss:$16 sps:$4 sm:$0xff]   ;;  %v4858_v34 = vld [vmem:[#allocation7 + $0x20] ss:$16 sps:$4 sm:$0xff]  }
 0x447   :  { %6024 = vst [vmem:[#allocation66_spill] sm:$0xff] %v4848_v32  ;;  %6027 = vst [vmem:[#allocation69_spill] sm:$0xff] %v4858_v34  ;;  %v4864_v57 = vld [vmem:[#allocation7 + $0x4] ss:$16 sps:$4 sm:$0xff]   ;;  %v4870_v17 = vld [vmem:[#allocation7] ss:$16 sps:$4 sm:$0xff]  }
 0x448   :  { %2066 = vmatpush1.bf16.msra.mxu0 %v4832_v26  ;;  %2107 = vmatpush1.bf16.msra.mxu1 %v4835_v0  ;;  %v4851_v26 = vld [vmem:[#allocation7 + $0x24] ss:$16 sps:$4 sm:$0xff]   ;;  %v4854_v0 = vld [vmem:[#allocation7 + $0x2c] ss:$16 sps:$4 sm:$0xff]   ;;  %6029 = vst [vmem:[#allocation59_spill] sm:$0xff] %v4864_v57  ;;  %6031 = vst [vmem:[#allocation26_spill] sm:$0xff] %v4870_v17 }
 0x449   :  { %2067 = vmatprep.subr.bf16.mxu0 %v4838_v28  ;;  %2108 = vmatprep.subr.bf16.mxu1 %v4841_v60  ;;  %6025 = vst [vmem:[#allocation67_spill] sm:$0xff] %v4851_v26  ;;  %6026 = vst [vmem:[#allocation68_spill] sm:$0xff] %v4854_v0  ;;  %v3136_v28 = vmul.f32 -1.442695, %v1908_v1 }
 0x44b   :  { %3507 = vpow2.f32 %v3136_v28  ;;  %v4882_v28 = vld [vmem:[#allocation7 + $0x1e0] ss:$16 sps:$4 sm:$0xff]  }
 0x44c   :  { %2068 = vmatpush1.bf16.msra.mxu0 %v4845_v2  ;;  %2109 = vmatpush1.bf16.msra.mxu1 %v4848_v32  ;;  %v4861_v2 = vld [vmem:[#allocation7 + $0x28] ss:$16 sps:$4 sm:$0xff]   ;;  %6035 = vst [vmem:[#allocation30_spill] sm:$0xff] %v4882_v28 }
 0x44d   :  { %2069 = vmatprep.subr.bf16.mxu0 %v4851_v26  ;;  %2110 = vmatprep.subr.bf16.mxu1 %v4854_v0  ;;  %6028 = vst [vmem:[#allocation58_spill] sm:$0xff] %v4861_v2  ;;  %v4867_v26 = vld [vmem:[#allocation7 + $0xc] ss:$16 sps:$4 sm:$0xff]   ;;  %v4919_v0 = vld [vmem:[#allocation7 + $0x180] ss:$16 sps:$4 sm:$0xff]  }
 0x44e   :  { %6030 = vst [vmem:[#allocation25_spill] sm:$0xff] %v4867_v26 }
 0x450   :  { %v3504_v60 = vpop.eup %3503  ;;  %2070 = vmatpush1.bf16.msra.mxu0 %v4858_v34  ;;  %2111 = vmatpush1.bf16.msra.mxu1 %v4861_v2  ;;  %v4873_v34 = vld [vmem:[#allocation7 + $0x8] ss:$16 sps:$4 sm:$0xff]  }
 0x451   :  { %v1915_v32 = vadd.f32 1.0, %v3504_v60  ;;  %2071 = vmatprep.subr.bf16.mxu0 %v4864_v57  ;;  %2112 = vmatprep.subr.bf16.mxu1 %v4867_v26  ;;  %6032 = vst [vmem:[#allocation27_spill] sm:$0xff] %v4873_v34  ;;  %v4876_v60 = vld [vmem:[#allocation7 + $0x1e4] ss:$16 sps:$4 sm:$0xff]   ;;  %v4879_v57 = vld [vmem:[#allocation7 + $0x1ec] ss:$16 sps:$4 sm:$0xff]  }
 0x452   :  { %v3506_v1 = vpop.eup %3505  ;;  %6033 = vst [vmem:[#allocation28_spill] sm:$0xff] %v4876_v60  ;;  %6034 = vst [vmem:[#allocation29_spill] sm:$0xff] %v4879_v57 }
 0x453   :  { %3509 = vrcp.f32 %v1915_v32  ;;  %v1921_v33 = vadd.f32 1.0, %v3506_v1  ;;  %v4885_v32 = vld [vmem:[#allocation7 + $0x1e8] ss:$16 sps:$4 sm:$0xff]   ;;  %v4891_v1 = vld [vmem:[#allocation7 + $0x1cc] ss:$16 sps:$4 sm:$0xff]  }
 0x454   :  { %3511 = vtanh.f32 %v1906_v59  ;;  %2072 = vmatpush1.bf16.msra.mxu0 %v4870_v17  ;;  %2113 = vmatpush1.bf16.msra.mxu1 %v4873_v34  ;;  %6036 = vst [vmem:[#allocation31_spill] sm:$0xff] %v4885_v32  ;;  %v4888_v59 = vld [vmem:[#allocation7 + $0x1c4] ss:$16 sps:$4 sm:$0xff]   ;;  %6038 = vst [vmem:[#allocation33_spill] sm:$0xff] %v4891_v1  ;;  %v4906_v34 = vld [vmem:[#allocation7 + $0x1a0] ss:$16 sps:$4 sm:$0xff]  }
 0x455   :  { %3513 = vrcp.f32 %v1921_v33  ;;  %2073 = vmatprep.subr.bf16.mxu0 %v4876_v60  ;;  %2114 = vmatprep.subr.bf16.mxu1 %v4879_v57  ;;  %6037 = vst [vmem:[#allocation32_spill] sm:$0xff] %v4888_v59  ;;  %v4894_v33 = vld [vmem:[#allocation7 + $0x1c0] ss:$16 sps:$4 sm:$0xff]   ;;  %v4897_v57 = vld [vmem:[#allocation7 + $0x1c8] ss:$16 sps:$4 sm:$0xff]   ;;  %6043 = vst [vmem:[#allocation40_spill] sm:$0xff] %v4906_v34 }
 0x456   :  { %6039 = vst [vmem:[#allocation36_spill] sm:$0xff] %v4894_v33  ;;  %6040 = vst [vmem:[#allocation37_spill] sm:$0xff] %v4897_v57 }
 0x458   :  { %2074 = vmatpush2.bf16.msra.mxu0 %v4882_v28  ;;  %2115 = vmatpush2.bf16.msra.mxu1 %v4885_v32  ;;  %v4900_v28 = vld [vmem:[#allocation7 + $0x1a4] ss:$16 sps:$4 sm:$0xff]   ;;  %v4903_v32 = vld [vmem:[#allocation7 + $0x1ac] ss:$16 sps:$4 sm:$0xff]  }
 0x459   :  { %2075 = vmatprep.subr.bf16.mxu0 %v4888_v59  ;;  %2116 = vmatprep.subr.bf16.mxu1 %v4891_v1  ;;  %6041 = vst [vmem:[#allocation38_spill] sm:$0xff] %v4900_v28  ;;  %6042 = vst [vmem:[#allocation39_spill] sm:$0xff] %v4903_v32  ;;  %v3508_v59 = vpop.eup %3507  ;;  %v4909_v1 = vld [vmem:[#allocation7 + $0x1a8] ss:$16 sps:$4 sm:$0xff]  }
 0x45a   :  { %6044 = vst [vmem:[#allocation41_spill] sm:$0xff] %v4909_v1  ;;  %v1928_v17 = vadd.f32 1.0, %v3508_v59  ;;  %v4952_v59 = vld [vmem:[#allocation7 + $0x124] ss:$16 sps:$4 sm:$0xff]  }
 0x45b   :  { %6054 = vst [vmem:[#allocation51_spill] sm:$0xff] %v4952_v59 }
 0x45c   :  { %2076 = vmatpush2.bf16.msra.mxu0 %v4894_v33  ;;  %2117 = vmatpush2.bf16.msra.mxu1 %v4897_v57  ;;  %v4912_v57 = vld [vmem:[#allocation7 + $0x184] ss:$16 sps:$4 sm:$0xff]   ;;  %3515 = vrcp.f32 %v1928_v17  ;;  %v4949_v17 = vld [vmem:[#allocation7 + $0x148] ss:$16 sps:$4 sm:$0xff]  }
 0x45d   :  { %2077 = vmatprep.subr.bf16.mxu0 %v4900_v28  ;;  %2118 = vmatprep.subr.bf16.mxu1 %v4903_v32  ;;  %6045 = vst [vmem:[#allocation42_spill] sm:$0xff] %v4912_v57  ;;  %v4915_v28 = vld [vmem:[#allocation7 + $0x18c] ss:$16 sps:$4 sm:$0xff]   ;;  %6053 = vst [vmem:[#allocation50_spill] sm:$0xff] %v4949_v17 }
 0x45e   :  { %6046 = vst [vmem:[#allocation43_spill] sm:$0xff] %v4915_v28 }
 0x460   :  { %v3510_v60 = vpop.eup %3509  ;;  %2078 = vmatpush2.bf16.msra.mxu0 %v4906_v34  ;;  %2119 = vmatpush2.bf16.msra.mxu1 %v4909_v1  ;;  %v4922_v34 = vld [vmem:[#allocation7 + $0x188] ss:$16 sps:$4 sm:$0xff]  }
 0x461   :  { %v3512_v33 = vpop.eup %3511  ;;  %2079 = vmatprep.subr.bf16.mxu0 %v4912_v57  ;;  %2120 = vmatprep.subr.bf16.mxu1 %v4915_v28  ;;  %v4927_v57 = vld [vmem:[#allocation7 + $0x164] ss:$16 sps:$4 sm:$0xff]   ;;  %v4930_v28 = vld [vmem:[#allocation7 + $0x16c] ss:$16 sps:$4 sm:$0xff]  }
 0x462   :  { %v3514_v32 = vpop.eup %3513  ;;  %v1932_v26 = vmul.f32 %v3512_v33, %v3510_v60  ;;  %6047 = vst [vmem:[#allocation44_spill] sm:$0xff] %v4930_v28  ;;  %v4937_v60 = vld [vmem:[#allocation7 + $0x168] ss:$16 sps:$4 sm:$0xff]   ;;  %v4955_v33 = vld [vmem:[#allocation7 + $0x12c] ss:$16 sps:$4 sm:$0xff]  }
 0x463   :  { %v1931_v2 = vmul.f32 %v3514_v32, %v4664_v10  ;;  %v4934_v10 = vld [vmem:[#allocation7 + $0x160] ss:$16 sps:$4 sm:$0xff]   ;;  %6049 = vst [vmem:[#allocation46_spill] sm:$0xff] %v4937_v60  ;;  %6055 = vst [vmem:[#allocation52_spill] sm:$0xff] %v4955_v33 }
 0x464   :  { %2080 = vmatpush2.bf16.msra.mxu0 %v4919_v0  ;;  %2121 = vmatpush2.bf16.msra.mxu1 %v4922_v34  ;;  %6048 = vst [vmem:[#allocation45_spill] sm:$0xff] %v4934_v10  ;;  %v4946_v32 = vld [vmem:[#allocation7 + $0x140] ss:$16 sps:$4 sm:$0xff]  }
 0x465   :  { %v4925_v1 = vadd.f32 %v1932_v26, %v1931_v2  ;;  %2081 = vmatprep.subr.bf16.mxu0 %v4927_v57  ;;  %2122 = vmatprep.subr.bf16.mxu1 %v4930_v28  ;;  %v4940_v26 = vld [vmem:[#allocation7 + $0x144] ss:$16 sps:$4 sm:$0xff]   ;;  %v4943_v2 = vld [vmem:[#allocation7 + $0x14c] ss:$16 sps:$4 sm:$0xff]   ;;  %6052 = vst [vmem:[#allocation49_spill] sm:$0xff] %v4946_v32 }
 0x466   :  { %6050 = vst [vmem:[#allocation47_spill] sm:$0xff] %v4940_v26  ;;  %6051 = vst [vmem:[#allocation48_spill] sm:$0xff] %v4943_v2 }
 0x467   :  { %3517 = vtanh.f32 %v4925_v1 }
 0x468   :  { %2082 = vmatpush2.bf16.msra.mxu0 %v4934_v10  ;;  %2123 = vmatpush2.bf16.msra.mxu1 %v4937_v60  ;;  %v4970_v10 = vld [vmem:[#allocation7 + $0x100] ss:$16 sps:$4 sm:$0xff]  }
 0x469   :  { %2083 = vmatprep.subr.bf16.mxu0 %v4940_v26  ;;  %2124 = vmatprep.subr.bf16.mxu1 %v4943_v2  ;;  %v4958_v26 = vld [vmem:[#allocation7 + $0x120] ss:$16 sps:$4 sm:$0xff]   ;;  %v4961_v2 = vld [vmem:[#allocation7 + $0x128] ss:$16 sps:$4 sm:$0xff]  }
 0x46a   :  { %6056 = vst [vmem:[#allocation53_spill] sm:$0xff] %v4958_v26 }
 0x46c   :  { %2084 = vmatpush2.bf16.msra.mxu0 %v4946_v32  ;;  %2125 = vmatpush2.bf16.msra.mxu1 %v4949_v17  ;;  %v4964_v32 = vld [vmem:[#allocation7 + $0x104] ss:$16 sps:$4 sm:$0xff]   ;;  %v4967_v17 = vld [vmem:[#allocation7 + $0x10c] ss:$16 sps:$4 sm:$0xff]  }
 0x46d   :  { %2085 = vmatprep.subr.bf16.mxu0 %v4952_v59  ;;  %2126 = vmatprep.subr.bf16.mxu1 %v4955_v33  ;;  %6057 = vst [vmem:[#allocation54_spill] sm:$0xff] %v4967_v17  ;;  %v3516_v59 = vpop.eup %3515  ;;  %v4973_v33 = vld [vmem:[#allocation7 + $0x108] ss:$16 sps:$4 sm:$0xff]  }
 0x46e   :  { %6058 = vst [vmem:[#allocation55_spill] sm:$0xff] %v4973_v33 }
 0x470   :  { %2086 = vmatpush2.bf16.msra.mxu0 %v4958_v26  ;;  %2127 = vmatpush2.bf16.msra.mxu1 %v4961_v2 }
 0x471   :  { %2087 = vmatprep.subr.bf16.mxu0 %v4964_v32  ;;  %2128 = vmatprep.subr.bf16.mxu1 %v4967_v17 }
 0x474   :  { %v3518_v60 = vpop.eup %3517  ;;  %2088 = vmatpush2.bf16.msra.mxu0 %v4970_v10  ;;  %2129 = vmatpush2.bf16.msra.mxu1 %v4973_v33 }
 0x475   :  { %v1935_v26 = vmul.f32 %v3518_v60, %v3516_v59  ;;  %2173 = vmatprep.subr.bf16.mxu0 %v6006_v16  ;;  %2214 = vmatprep.subr.bf16.mxu1 %v4544_v6  ;;  %v6059_v6 = vld [vmem:[#allocation70_spill] sm:$0xff] }
 0x477   :  { %3137 = vst [vmem:[%s5580_s7 + $0x10] sm:$0xff] %v1935_v26  ;;  %v2056_v17 = vpack.c.bf16 %v1935_v26, %v1935_v26 }
 0x479   :  { %2089 = vmatprep.mubr.bf16.mxu0 %v2056_v17  ;;  %2130 = vmatprep.mubr.bf16.mxu1 %v2056_v17  ;;  %v6060_v17 = vld [vmem:[#allocation71_spill] sm:$0xff] }
 0x47a   :  { %2090 = vmatmul.mubr.bf16.vlgmr.msra.gmra.mxu0 %v4778_v3  ;;  %2131 = vmatmul.mubr.bf16.vlgmr.msra.gmra.mxu1 %v4778_v3  ;;  %v1944_v59 = vunpack.c.h.bf16 %v6060_v17 }
 0x47b   :  { %2174 = vmatpush1.bf16.msra.mxu0 %v4549_v38  ;;  %2215 = vmatpush1.bf16.msra.mxu1 %v6007_v13 }
 0x47c   :  { %2175 = vmatprep.subr.bf16.mxu0 %v6008_v37  ;;  %2216 = vmatprep.subr.bf16.mxu1 %v6009_v39 }
 0x47d   :  { %2205 = vmatprep.mubr.bf16.mxu0 %v6010_v41  ;;  %2246 = vmatprep.mubr.bf16.mxu1 %v6010_v41 }
 0x47f   :  { %2176 = vmatpush1.bf16.msra.mxu0 %v4563_v30  ;;  %2217 = vmatpush1.bf16.msra.mxu1 %v4566_v46 }
 0x480   :  { %2177 = vmatprep.subr.bf16.mxu0 %v4569_v61  ;;  %2218 = vmatprep.subr.bf16.mxu1 %v4572_v51  ;;  %v1942_v51 = vunpack.c.h.bf16 %v6059_v6 }
 0x483   :  { %2178 = vmatpush1.bf16.msra.mxu0 %v4575_v36  ;;  %2219 = vmatpush1.bf16.msra.mxu1 %v4578_v40  ;;  %v1941_v36 = vunpack.c.l.bf16 %v6059_v6 }
 0x484   :  { %2179 = vmatprep.subr.bf16.mxu0 %v4704_v12  ;;  %2220 = vmatprep.subr.bf16.mxu1 %v4707_v54 }
 0x487   :  { %2180 = vmatpush1.bf16.msra.mxu0 %v4710_v47  ;;  %2221 = vmatpush1.bf16.msra.mxu1 %v4713_v62 }
 0x488   :  { %2181 = vmatprep.subr.bf16.mxu0 %v4716_v42  ;;  %2222 = vmatprep.subr.bf16.mxu1 %v4719_v63 }
 0x48b   :  { %2182 = vmatpush1.bf16.msra.mxu0 %v4722_v21  ;;  %2223 = vmatpush1.bf16.msra.mxu1 %v4725_v14 }
 0x48c   :  { %2183 = vmatprep.subr.bf16.mxu0 %v4728_v15  ;;  %2224 = vmatprep.subr.bf16.mxu1 %v4731_v11 }
 0x48f   :  { %2184 = vmatpush1.bf16.msra.mxu0 %v4734_v4  ;;  %2225 = vmatpush1.bf16.msra.mxu1 %v4737_v19 }
 0x490   :  { %2185 = vmatprep.subr.bf16.mxu0 %v4740_v20  ;;  %2226 = vmatprep.subr.bf16.mxu1 %v4743_v55 }
 0x493   :  { %2186 = vmatpush1.bf16.msra.mxu0 %v4746_v23  ;;  %2227 = vmatpush1.bf16.msra.mxu1 %v4749_v58 }
 0x494   :  { %2187 = vmatprep.subr.bf16.mxu0 %v4752_v35  ;;  %2228 = vmatprep.subr.bf16.mxu1 %v4755_v24 }
 0x497   :  { %2188 = vmatpush1.bf16.msra.mxu0 %v4758_v5  ;;  %2229 = vmatpush1.bf16.msra.mxu1 %v4761_v22 }
 0x498   :  { %2284 = vmatprep.subr.bf16.mxu0 %v4764_v25  ;;  %2325 = vmatprep.subr.bf16.mxu1 %v4767_v56  ;;  %v1943_v25 = vunpack.c.l.bf16 %v6060_v17  ;;  %v6062_v17 = vld [vmem:[#allocation35_spill] sm:$0xff] }
 0x4f7   :  { %v1980_v40 = vpop.f32.mrf.mxu0  ;;  %v2021_v38 = vpop.f32.mrf.mxu1 }
 0x4f8   :  { %v2028_v61 = vadd.f32 %v1980_v40, %v1941_v36  ;;  %v2030_v22 = vadd.f32 %v2021_v38, %v1943_v25 }
 0x4f9   :  { %v1982_v30 = vpop.f32.mrf.mxu0  ;;  %v2023_v46 = vpop.f32.mrf.mxu1 }
 0x4fa   :  { %v3138_v16 = vmul.f32 -1.442695, %v2028_v61  ;;  %v2029_v13 = vadd.f32 %v1982_v30, %v1942_v51  ;;  %v2031_v56 = vadd.f32 %v2023_v46, %v1944_v59 }
 0x4fb   :  { %v1984_v37 = vpop.f32.mrf.mxu0  ;;  %v2025_v39 = vpop.f32.mrf.mxu1 }
 0x4fc   :  { %3519 = vpow2.f32 %v3138_v16  ;;  %v3139_v3 = vmul.f32 -1.442695, %v2029_v13  ;;  %v3140_v36 = vmul.f32 -1.442695, %v2031_v56 }
 0x4fd   :  { %v1985_v60 = vpop.f32.mrf.mxu0  ;;  %v2026_v26 = vpop.f32.mrf.mxu1 }
 0x4fe   :  { %3521 = vpow2.f32 %v3139_v3  ;;  %v6061_v60 = vld [vmem:[#allocation15_spill] sm:$0xff] }
 0x4ff   :  { %3523 = vtanh.f32 %v2030_v22 }
 0x500   :  { %3525 = vpow2.f32 %v3140_v36 }
 0x509   :  { %v3520_v40 = vpop.eup %3519 }
 0x50a   :  { %v2035_v6 = vadd.f32 1.0, %v3520_v40 }
 0x50b   :  { %v3522_v5 = vpop.eup %3521 }
 0x50c   :  { %3527 = vrcp.f32 %v2035_v6  ;;  %v2041_v61 = vadd.f32 1.0, %v3522_v5  ;;  %v3524_v51 = vpop.eup %3523  ;;  %v6063_v6 = vld [vmem:[#allocation10_spill] sm:$0xff] }
 0x50d   :  { %v3526_v30 = vpop.eup %3525 }
 0x50e   :  { %3529 = vrcp.f32 %v2041_v61  ;;  %v2048_v39 = vadd.f32 1.0, %v3526_v30 }
 0x510   :  { %3531 = vrcp.f32 %v2048_v39  ;;  %v6064_v39 = vld [vmem:[#allocation56_spill] sm:$0xff] }
 0x519   :  { %v3528_v16 = vpop.eup %3527 }
 0x51a   :  { %v2052_v13 = vmul.f32 %v3528_v16, %v3524_v51 }
 0x51b   :  { %v3530_v37 = vpop.eup %3529 }
 0x51c   :  { %v2051_v46 = vmul.f32 %v3530_v37, %v4775_v50 }
 0x51d   :  { %v3532_v25 = vpop.eup %3531 }
 0x51e   :  { %v5022_v3 = vadd.f32 %v2052_v13, %v2051_v46  ;;  %v6065_v46 = vld [vmem:[#allocation57_spill] sm:$0xff] }
 0x520   :  { %3533 = vtanh.f32 %v5022_v3 }
 0x52d   :  { %v3534_v22 = vpop.eup %3533 }
 0x52e   :  { %v2055_v56 = vmul.f32 %v3534_v22, %v3532_v25  ;;  %v6066_v25 = vld [vmem:[#allocation60_spill] sm:$0xff]  ;;  %v6067_v22 = vld [vmem:[#allocation61_spill] sm:$0xff] }
 0x530   :  { %v5025_v38 = vpack.c.bf16 %v2055_v56, %v2055_v56  ;;  %v6068_v56 = vld [vmem:[#allocation62_spill] sm:$0xff] }
 0x532   :  { %2206 = vmatmul.mubr.bf16.vlgmr.msra.gmra.mxu0 %v5025_v38  ;;  %2247 = vmatmul.mubr.bf16.vlgmr.msra.gmra.mxu1 %v5025_v38 }
 0x533   :  { %2285 = vmatpush1.bf16.msra.mxu0 %v4782_v8  ;;  %2326 = vmatpush1.bf16.msra.mxu1 %v4785_v9 }
 0x534   :  { %2286 = vmatprep.subr.bf16.mxu0 %v4788_v18  ;;  %2327 = vmatprep.subr.bf16.mxu1 %v4791_v29 }
 0x537   :  { %2287 = vmatpush1.bf16.msra.mxu0 %v4794_v52  ;;  %2328 = vmatpush1.bf16.msra.mxu1 %v4797_v48 }
 0x538   :  { %2288 = vmatprep.subr.bf16.mxu0 %v4800_v49  ;;  %2329 = vmatprep.subr.bf16.mxu1 %v4803_v44 }
 0x53a   :  { %v2091_v5 = vpop.f32.mrf.mxu0  ;;  %v2132_v50 = vpop.f32.mrf.mxu1 }
 0x53b   :  { %v2092_v26 = vadd.f32 %v2091_v5, %v6061_v60  ;;  %2289 = vmatpush1.bf16.msra.mxu0 %v6062_v17  ;;  %2330 = vmatpush1.bf16.msra.mxu1 %v4810_v7  ;;  %v6069_v5 = vld [vmem:[#allocation16_spill] sm:$0xff] }
 0x53c   :  { %v2093_v59 = vpop.f32.mrf.mxu0  ;;  %v2134_v36 = vpop.f32.mrf.mxu1  ;;  %2290 = vmatprep.subr.bf16.mxu0 %v4814_v31  ;;  %2331 = vmatprep.subr.bf16.mxu1 %v4817_v27 }
 0x53d   :  { %v3141_v40 = vmul.f32 -1.442695, %v2092_v26  ;;  %v2094_v61 = vadd.f32 %v2093_v59, %v6063_v6  ;;  %v2135_v26 = vadd.f32 %v2134_v36, %v6069_v5  ;;  %v6070_v59 = vld [vmem:[#allocation63_spill] sm:$0xff] }
 0x53e   :  { %v2095_v51 = vpop.f32.mrf.mxu0  ;;  %v2136_v30 = vpop.f32.mrf.mxu1 }
 0x53f   :  { %3535 = vpow2.f32 %v3141_v40  ;;  %v3142_v16 = vmul.f32 -1.442695, %v2094_v61  ;;  %2291 = vmatpush1.bf16.msra.mxu0 %v4820_v43  ;;  %2332 = vmatpush1.bf16.msra.mxu1 %v4823_v45  ;;  %v6071_v40 = vld [vmem:[#allocation66_spill] sm:$0xff]  ;;  %v6072_v61 = vld [vmem:[#allocation67_spill] sm:$0xff]  ;;  %v6073_v51 = vld [vmem:[#allocation68_spill] sm:$0xff] }
 0x540   :  { %v2096_v13 = vpop.f32.mrf.mxu0  ;;  %v2137_v37 = vpop.f32.mrf.mxu1  ;;  %2292 = vmatprep.subr.bf16.mxu0 %v4826_v53  ;;  %2333 = vmatprep.subr.bf16.mxu1 %v6064_v39  ;;  %v3143_v30 = vmul.f32 -1.442695, %v2135_v26  ;;  %v6081_v26 = vld [vmem:[#allocation28_spill] sm:$0xff] }
 0x541   :  { %3537 = vpow2.f32 %v3142_v16  ;;  %v6074_v16 = vld [vmem:[#allocation69_spill] sm:$0xff]  ;;  %v6075_v13 = vld [vmem:[#allocation58_spill] sm:$0xff] }
 0x542   :  { %3539 = vpow2.f32 %v3143_v30  ;;  %v6087_v30 = vld [vmem:[#allocation36_spill] sm:$0xff] }
 0x543   :  { %2293 = vmatpush1.bf16.msra.mxu0 %v6065_v46  ;;  %2334 = vmatpush1.bf16.msra.mxu1 %v6066_v25  ;;  %v6076_v25 = vld [vmem:[#allocation17_spill] sm:$0xff]  ;;  %v6077_v46 = vld [vmem:[#allocation59_spill] sm:$0xff] }
 0x544   :  { %2294 = vmatprep.subr.bf16.mxu0 %v6067_v22  ;;  %2335 = vmatprep.subr.bf16.mxu1 %v6068_v56  ;;  %v2133_v22 = vadd.f32 %v2132_v50, %v6076_v25  ;;  %v6078_v56 = vld [vmem:[#allocation25_spill] sm:$0xff]  ;;  %v6083_v50 = vld [vmem:[#allocation30_spill] sm:$0xff]  ;;  %v6084_v25 = vld [vmem:[#allocation31_spill] sm:$0xff] }
 0x547   :  { %2295 = vmatpush1.bf16.msra.mxu0 %v6070_v59  ;;  %2336 = vmatpush1.bf16.msra.mxu1 %v6071_v40 }
 0x548   :  { %2296 = vmatprep.subr.bf16.mxu0 %v6072_v61  ;;  %2337 = vmatprep.subr.bf16.mxu1 %v6073_v51  ;;  %v6079_v61 = vld [vmem:[#allocation26_spill] sm:$0xff]  ;;  %v6080_v51 = vld [vmem:[#allocation27_spill] sm:$0xff] }
 0x54b   :  { %2297 = vmatpush1.bf16.msra.mxu0 %v6074_v16  ;;  %2338 = vmatpush1.bf16.msra.mxu1 %v6075_v13  ;;  %v6082_v13 = vld [vmem:[#allocation29_spill] sm:$0xff] }
 0x54c   :  { %v3536_v37 = vpop.eup %3535  ;;  %2298 = vmatprep.subr.bf16.mxu0 %v6077_v46  ;;  %2339 = vmatprep.subr.bf16.mxu1 %v6078_v56  ;;  %v6085_v56 = vld [vmem:[#allocation32_spill] sm:$0xff] }
 0x54d   :  { %v2142_v36 = vadd.f32 1.0, %v3536_v37  ;;  %v6086_v37 = vld [vmem:[#allocation33_spill] sm:$0xff] }
 0x54e   :  { %v3538_v59 = vpop.eup %3537 }
 0x54f   :  { %3541 = vrcp.f32 %v2142_v36  ;;  %v2148_v40 = vadd.f32 1.0, %v3538_v59  ;;  %2299 = vmatpush1.bf16.msra.mxu0 %v6079_v61  ;;  %2340 = vmatpush1.bf16.msra.mxu1 %v6080_v51  ;;  %v6088_v59 = vld [vmem:[#allocation37_spill] sm:$0xff]  ;;  %v6089_v36 = vld [vmem:[#allocation38_spill] sm:$0xff]  ;;  %v6091_v51 = vld [vmem:[#allocation40_spill] sm:$0xff] }
 0x550   :  { %3543 = vtanh.f32 %v2133_v22  ;;  %2300 = vmatprep.subr.bf16.mxu0 %v6081_v26  ;;  %2341 = vmatprep.subr.bf16.mxu1 %v6082_v13  ;;  %v6090_v22 = vld [vmem:[#allocation39_spill] sm:$0xff]  ;;  %v3540_v26 = vpop.eup %3539  ;;  %v6093_v13 = vld [vmem:[#allocation42_spill] sm:$0xff] }
 0x551   :  { %3545 = vrcp.f32 %v2148_v40  ;;  %v6092_v40 = vld [vmem:[#allocation41_spill] sm:$0xff]  ;;  %v2155_v61 = vadd.f32 1.0, %v3540_v26 }
 0x552   :  { %v6099_v26 = vld [vmem:[#allocation49_spill] sm:$0xff] }
 0x553   :  { %2301 = vmatpush2.bf16.msra.mxu0 %v6083_v50  ;;  %2342 = vmatpush2.bf16.msra.mxu1 %v6084_v25  ;;  %v6094_v25 = vld [vmem:[#allocation43_spill] sm:$0xff]  ;;  %3547 = vrcp.f32 %v2155_v61  ;;  %v6104_v61 = vld [vmem:[#allocation54_spill] sm:$0xff] }
 0x554   :  { %2302 = vmatprep.subr.bf16.mxu0 %v6085_v56  ;;  %2343 = vmatprep.subr.bf16.mxu1 %v6086_v37 }
 0x557   :  { %2303 = vmatpush2.bf16.msra.mxu0 %v6087_v30  ;;  %2344 = vmatpush2.bf16.msra.mxu1 %v6088_v59 }
 0x558   :  { %2304 = vmatprep.subr.bf16.mxu0 %v6089_v36  ;;  %2345 = vmatprep.subr.bf16.mxu1 %v6090_v22 }
 0x55b   :  { %2305 = vmatpush2.bf16.msra.mxu0 %v6091_v51  ;;  %2346 = vmatpush2.bf16.msra.mxu1 %v6092_v40 }
 0x55c   :  { %v3542_v50 = vpop.eup %3541  ;;  %2306 = vmatprep.subr.bf16.mxu0 %v6093_v13  ;;  %2347 = vmatprep.subr.bf16.mxu1 %v6094_v25  ;;  %v6095_v13 = vld [vmem:[#allocation45_spill] sm:$0xff]  ;;  %v6096_v25 = vld [vmem:[#allocation46_spill] sm:$0xff] }
 0x55d   :  { %v3544_v56 = vpop.eup %3543 }
 0x55e   :  { %v3546_v37 = vpop.eup %3545  ;;  %v2159_v30 = vmul.f32 %v3544_v56, %v3542_v50  ;;  %v6097_v56 = vld [vmem:[#allocation47_spill] sm:$0xff]  ;;  %v6100_v50 = vld [vmem:[#allocation50_spill] sm:$0xff] }
 0x55f   :  { %v2158_v59 = vmul.f32 %v3546_v37, %v4925_v1  ;;  %2307 = vmatpush2.bf16.msra.mxu0 %v4919_v0  ;;  %2348 = vmatpush2.bf16.msra.mxu1 %v4922_v34  ;;  %v6098_v1 = vld [vmem:[#allocation48_spill] sm:$0xff]  ;;  %v6101_v37 = vld [vmem:[#allocation51_spill] sm:$0xff] }
 0x560   :  { %2308 = vmatprep.subr.bf16.mxu0 %v4927_v57  ;;  %2349 = vmatprep.subr.bf16.mxu1 %v4930_v28  ;;  %v6102_v28 = vld [vmem:[#allocation52_spill] sm:$0xff] }
 0x561   :  { %v5082_v40 = vadd.f32 %v2159_v30, %v2158_v59  ;;  %v6103_v30 = vld [vmem:[#allocation53_spill] sm:$0xff]  ;;  %v3548_v59 = vpop.eup %3547 }
 0x563   :  { %2309 = vmatpush2.bf16.msra.mxu0 %v6095_v13  ;;  %2350 = vmatpush2.bf16.msra.mxu1 %v6096_v25  ;;  %3549 = vtanh.f32 %v5082_v40 }
 0x564   :  { %2310 = vmatprep.subr.bf16.mxu0 %v6097_v56  ;;  %2351 = vmatprep.subr.bf16.mxu1 %v6098_v1  ;;  %v5099_v1 = vld [vmem:[#allocation5 + $0xe4] ss:$16 sps:$4 sm:$0xff]  }
 0x565   :  { %6105 = vst [vmem:[#allocation72_spill] sm:$0xff] %v5099_v1 }
 0x567   :  { %2311 = vmatpush2.bf16.msra.mxu0 %v6099_v26  ;;  %2352 = vmatpush2.bf16.msra.mxu1 %v6100_v50 }
 0x568   :  { %2312 = vmatprep.subr.bf16.mxu0 %v6101_v37  ;;  %2353 = vmatprep.subr.bf16.mxu1 %v6102_v28  ;;  %v5102_v37 = vld [vmem:[#allocation5 + $0xec] ss:$16 sps:$4 sm:$0xff]  }
 0x56b   :  { %2313 = vmatpush2.bf16.msra.mxu0 %v6103_v30  ;;  %2354 = vmatpush2.bf16.msra.mxu1 %v4961_v2 }
 0x56c   :  { %2314 = vmatprep.subr.bf16.mxu0 %v4964_v32  ;;  %2355 = vmatprep.subr.bf16.mxu1 %v6104_v61 }
 0x56f   :  { %2315 = vmatpush2.bf16.msra.mxu0 %v4970_v10  ;;  %2356 = vmatpush2.bf16.msra.mxu1 %v4973_v33  ;;  %v5110_v33 = vld [vmem:[#allocation5 + $0xe0] ss:$16 sps:$4 sm:$0xff]  }
 0x570   :  { %v3550_v26 = vpop.eup %3549  ;;  %2400 = vmatprep.subr.bf16.mxu0 %v5099_v1  ;;  %2441 = vmatprep.subr.bf16.mxu1 %v5102_v37  ;;  %v5113_v1 = vld [vmem:[#allocation5 + $0xe8] ss:$16 sps:$4 sm:$0xff]  }
 0x571   :  { %v2162_v30 = vmul.f32 %v3550_v26, %v3548_v59  ;;  %v5116_v26 = vld [vmem:[#allocation5 + $0xc4] ss:$16 sps:$4 sm:$0xff]   ;;  %v5119_v59 = vld [vmem:[#allocation5 + $0xcc] ss:$16 sps:$4 sm:$0xff]  }
 0x572   :  { %6106 = vst [vmem:[#allocation73_spill] sm:$0xff] %v5116_v26  ;;  %6107 = vst [vmem:[#allocation76_spill] sm:$0xff] %v5119_v59 }
 0x573   :  { %3144 = vst [vmem:[%s5580_s7 + $0x18] sm:$0xff] %v2162_v30  ;;  %v2283_v61 = vpack.c.bf16 %v2162_v30, %v2162_v30  ;;  %v5127_v30 = vld [vmem:[#allocation5 + $0xc8] ss:$16 sps:$4 sm:$0xff]  }
 0x575   :  { %2316 = vmatprep.mubr.bf16.mxu0 %v2283_v61  ;;  %2357 = vmatprep.mubr.bf16.mxu1 %v2283_v61  ;;  %v5130_v61 = vld [vmem:[#allocation5 + $0xa4] ss:$16 sps:$4 sm:$0xff]  }
 0x576   :  { %2317 = vmatmul.mubr.bf16.vlgmr.msra.gmra.mxu0 %v5025_v38  ;;  %2358 = vmatmul.mubr.bf16.vlgmr.msra.gmra.mxu1 %v5025_v38  ;;  %v5124_v38 = vld [vmem:[#allocation5 + $0xc0] ss:$16 sps:$4 sm:$0xff]  }
 0x577   :  { %2401 = vmatpush1.bf16.msra.mxu0 %v5110_v33  ;;  %2442 = vmatpush1.bf16.msra.mxu1 %v5113_v1 }
 0x578   :  { %2402 = vmatprep.subr.bf16.mxu0 %v5116_v26  ;;  %2443 = vmatprep.subr.bf16.mxu1 %v5119_v59  ;;  %v5133_v26 = vld [vmem:[#allocation5 + $0xac] ss:$16 sps:$4 sm:$0xff]   ;;  %v5136_v59 = vld [vmem:[#allocation5 + $0xa0] ss:$16 sps:$4 sm:$0xff]  }
 0x579   :  { %2432 = vmatprep.mubr.bf16.mxu0 %v6010_v41  ;;  %2473 = vmatprep.mubr.bf16.mxu1 %v6010_v41  ;;  %6108 = vst [vmem:[#allocation18_spill] sm:$0xff] %v5133_v26  ;;  %6109 = vst [vmem:[#allocation19_spill] sm:$0xff] %v5136_v59  ;;  %v5139_v41 = vld [vmem:[#allocation5 + $0xa8] ss:$16 sps:$4 sm:$0xff]  }
 0x57a   :  { %6110 = vst [vmem:[#allocation20_spill] sm:$0xff] %v5139_v41 }
 0x57b   :  { %2403 = vmatpush1.bf16.msra.mxu0 %v5124_v38  ;;  %2444 = vmatpush1.bf16.msra.mxu1 %v5127_v30 }
 0x57c   :  { %2404 = vmatprep.subr.bf16.mxu0 %v5130_v61  ;;  %2445 = vmatprep.subr.bf16.mxu1 %v5133_v26 }
 0x57f   :  { %2405 = vmatpush1.bf16.msra.mxu0 %v5136_v59  ;;  %2446 = vmatpush1.bf16.msra.mxu1 %v5139_v41 }
 0x580   :  { %2406 = vmatprep.subr.bf16.mxu0 %v4704_v12  ;;  %2447 = vmatprep.subr.bf16.mxu1 %v4707_v54  ;;  %v6111_v12 = vld [vmem:[#allocation22_spill] sm:$0xff]  ;;  %v6112_v54 = vld [vmem:[#allocation23_spill] sm:$0xff] }
 0x583   :  { %2407 = vmatpush1.bf16.msra.mxu0 %v4710_v47  ;;  %2448 = vmatpush1.bf16.msra.mxu1 %v4713_v62  ;;  %v6113_v47 = vld [vmem:[#allocation24_spill] sm:$0xff]  ;;  %v6114_v62 = vld [vmem:[#allocation34_spill] sm:$0xff] }
 0x584   :  { %2408 = vmatprep.subr.bf16.mxu0 %v4716_v42  ;;  %2449 = vmatprep.subr.bf16.mxu1 %v4719_v63  ;;  %v6115_v42 = vld [vmem:[#allocation74_spill] sm:$0xff] }
 0x585   :  { %v2168_v63 = vunpack.c.l.bf16 %v6115_v42 }
 0x587   :  { %2409 = vmatpush1.bf16.msra.mxu0 %v4722_v21  ;;  %2450 = vmatpush1.bf16.msra.mxu1 %v4725_v14 }
 0x588   :  { %2410 = vmatprep.subr.bf16.mxu0 %v4728_v15  ;;  %2451 = vmatprep.subr.bf16.mxu1 %v4731_v11  ;;  %v2169_v11 = vunpack.c.h.bf16 %v6115_v42 }
 0x58b   :  { %2411 = vmatpush1.bf16.msra.mxu0 %v4734_v4  ;;  %2452 = vmatpush1.bf16.msra.mxu1 %v4737_v19 }
 0x58c   :  { %2412 = vmatprep.subr.bf16.mxu0 %v4740_v20  ;;  %2453 = vmatprep.subr.bf16.mxu1 %v4743_v55 }
 0x58f   :  { %2413 = vmatpush1.bf16.msra.mxu0 %v4746_v23  ;;  %2454 = vmatpush1.bf16.msra.mxu1 %v4749_v58 }
 0x590   :  { %2414 = vmatprep.subr.bf16.mxu0 %v4752_v35  ;;  %2455 = vmatprep.subr.bf16.mxu1 %v4755_v24 }
 0x593   :  { %2415 = vmatpush1.bf16.msra.mxu0 %v6111_v12  ;;  %2456 = vmatpush1.bf16.msra.mxu1 %v6112_v54  ;;  %v6116_v54 = vld [vmem:[#allocation75_spill] sm:$0xff] }
 0x594   :  { %2511 = vmatprep.subr.bf16.mxu0 %v6113_v47  ;;  %2552 = vmatprep.subr.bf16.mxu1 %v6114_v62  ;;  %v2171_v47 = vunpack.c.h.bf16 %v6116_v54  ;;  %v2170_v41 = vunpack.c.l.bf16 %v6116_v54  ;;  %v6120_v54 = vld [vmem:[#allocation62_spill] sm:$0xff] }
 0x5f2   :  { %v2207_v21 = vpop.f32.mrf.mxu0  ;;  %v2248_v14 = vpop.f32.mrf.mxu1 }
 0x5f3   :  { %v2255_v15 = vadd.f32 %v2207_v21, %v2168_v63  ;;  %v2257_v59 = vadd.f32 %v2248_v14, %v2170_v41 }
 0x5f4   :  { %v2209_v4 = vpop.f32.mrf.mxu0  ;;  %v2250_v19 = vpop.f32.mrf.mxu1 }
 0x5f5   :  { %v3145_v20 = vmul.f32 -1.442695, %v2255_v15  ;;  %v2256_v55 = vadd.f32 %v2209_v4, %v2169_v11  ;;  %v2258_v62 = vadd.f32 %v2250_v19, %v2171_v47  ;;  %v6122_v47 = vld [vmem:[#allocation66_spill] sm:$0xff] }
 0x5f6   :  { %v2211_v23 = vpop.f32.mrf.mxu0  ;;  %v2252_v58 = vpop.f32.mrf.mxu1 }
 0x5f7   :  { %3551 = vpow2.f32 %v3145_v20  ;;  %v3146_v35 = vmul.f32 -1.442695, %v2256_v55  ;;  %v3147_v63 = vmul.f32 -1.442695, %v2258_v62 }
 0x5f8   :  { %v2212_v24 = vpop.f32.mrf.mxu0  ;;  %v2253_v12 = vpop.f32.mrf.mxu1 }
 0x5f9   :  { %3553 = vpow2.f32 %v3146_v35  ;;  %v6119_v12 = vld [vmem:[#allocation61_spill] sm:$0xff] }
 0x5fa   :  { %3555 = vtanh.f32 %v2257_v59 }
 0x5fb   :  { %3557 = vpow2.f32 %v3147_v63  ;;  %v6125_v63 = vld [vmem:[#allocation58_spill] sm:$0xff] }
 0x604   :  { %v3552_v21 = vpop.eup %3551 }
 0x605   :  { %v2262_v42 = vadd.f32 1.0, %v3552_v21  ;;  %v6126_v21 = vld [vmem:[#allocation25_spill] sm:$0xff] }
 0x606   :  { %v3554_v26 = vpop.eup %3553 }
 0x607   :  { %3559 = vrcp.f32 %v2262_v42  ;;  %v2268_v15 = vadd.f32 1.0, %v3554_v26  ;;  %v3556_v11 = vpop.eup %3555 }
 0x608   :  { %v3558_v4 = vpop.eup %3557 }
 0x609   :  { %3561 = vrcp.f32 %v2268_v15  ;;  %v2275_v58 = vadd.f32 1.0, %v3558_v4  ;;  %v6127_v15 = vld [vmem:[#allocation17_spill] sm:$0xff] }
 0x60b   :  { %3563 = vrcp.f32 %v2275_v58 }
 0x614   :  { %v3560_v20 = vpop.eup %3559 }
 0x615   :  { %v2279_v55 = vmul.f32 %v3560_v20, %v3556_v11 }
 0x616   :  { %v3562_v23 = vpop.eup %3561 }
 0x617   :  { %v2278_v19 = vmul.f32 %v3562_v23, %v5022_v3  ;;  %v6129_v23 = vld [vmem:[#allocation27_spill] sm:$0xff] }
 0x618   :  { %v3564_v41 = vpop.eup %3563 }
 0x619   :  { %v5169_v35 = vadd.f32 %v2279_v55, %v2278_v19  ;;  %v6128_v55 = vld [vmem:[#allocation26_spill] sm:$0xff]  ;;  %v6130_v19 = vld [vmem:[#allocation28_spill] sm:$0xff] }
 0x61b   :  { %3565 = vtanh.f32 %v5169_v35 }
 0x628   :  { %v3566_v59 = vpop.eup %3565 }
 0x629   :  { %v2282_v14 = vmul.f32 %v3566_v59, %v3564_v41  ;;  %v6133_v41 = vld [vmem:[#allocation31_spill] sm:$0xff]  ;;  %v6134_v59 = vld [vmem:[#allocation32_spill] sm:$0xff] }
 0x62b   :  { %v5172_v24 = vpack.c.bf16 %v2282_v14, %v2282_v14  ;;  %v6135_v14 = vld [vmem:[#allocation33_spill] sm:$0xff] }
 0x62d   :  { %2433 = vmatmul.mubr.bf16.vlgmr.msra.gmra.mxu0 %v5172_v24  ;;  %2474 = vmatmul.mubr.bf16.vlgmr.msra.gmra.mxu1 %v5172_v24 }
 0x62e   :  { %2512 = vmatpush1.bf16.msra.mxu0 %v4782_v8  ;;  %2553 = vmatpush1.bf16.msra.mxu1 %v4785_v9 }
 0x62f   :  { %2513 = vmatprep.subr.bf16.mxu0 %v4788_v18  ;;  %2554 = vmatprep.subr.bf16.mxu1 %v4791_v29 }
 0x632   :  { %2514 = vmatpush1.bf16.msra.mxu0 %v4794_v52  ;;  %2555 = vmatpush1.bf16.msra.mxu1 %v4797_v48 }
 0x633   :  { %2515 = vmatprep.subr.bf16.mxu0 %v4800_v49  ;;  %2556 = vmatprep.subr.bf16.mxu1 %v4803_v44 }
 0x636   :  { %v2318_v3 = vpop.f32.mrf.mxu0  ;;  %v2359_v26 = vpop.f32.mrf.mxu1  ;;  %2516 = vmatpush1.bf16.msra.mxu0 %v6062_v17  ;;  %2557 = vmatpush1.bf16.msra.mxu1 %v4810_v7  ;;  %v6118_v17 = vld [vmem:[#allocation60_spill] sm:$0xff] }
 0x637   :  { %v2319_v8 = vadd.f32 %v2318_v3, %v6061_v60  ;;  %2517 = vmatprep.subr.bf16.mxu0 %v4814_v31  ;;  %2558 = vmatprep.subr.bf16.mxu1 %v4817_v27  ;;  %v6117_v27 = vld [vmem:[#allocation57_spill] sm:$0xff]  ;;  %v2360_v11 = vadd.f32 %v2359_v26, %v6127_v15  ;;  %v6136_v3 = vld [vmem:[#allocation36_spill] sm:$0xff] }
 0x638   :  { %v2320_v9 = vpop.f32.mrf.mxu0  ;;  %v2361_v18 = vpop.f32.mrf.mxu1  ;;  %v6137_v26 = vld [vmem:[#allocation37_spill] sm:$0xff] }
 0x639   :  { %v3148_v29 = vmul.f32 -1.442695, %v2319_v8  ;;  %v2321_v52 = vadd.f32 %v2320_v9, %v6063_v6  ;;  %v6138_v8 = vld [vmem:[#allocation41_spill] sm:$0xff] }
 0x63a   :  { %v2322_v48 = vpop.f32.mrf.mxu0  ;;  %v2363_v49 = vpop.f32.mrf.mxu1  ;;  %2518 = vmatpush1.bf16.msra.mxu0 %v4820_v43  ;;  %2559 = vmatpush1.bf16.msra.mxu1 %v4823_v45  ;;  %v2362_v43 = vadd.f32 %v2361_v18, %v6069_v5  ;;  %v6121_v45 = vld [vmem:[#allocation63_spill] sm:$0xff]  ;;  %v6139_v18 = vld [vmem:[#allocation42_spill] sm:$0xff] }
 0x63b   :  { %3567 = vpow2.f32 %v3148_v29  ;;  %v3149_v44 = vmul.f32 -1.442695, %v2321_v52  ;;  %2519 = vmatprep.subr.bf16.mxu0 %v4826_v53  ;;  %2560 = vmatprep.subr.bf16.mxu1 %v6064_v39  ;;  %v6123_v53 = vld [vmem:[#allocation67_spill] sm:$0xff]  ;;  %v6124_v39 = vld [vmem:[#allocation68_spill] sm:$0xff] }
 0x63c   :  { %v2323_v7 = vpop.f32.mrf.mxu0  ;;  %v2364_v31 = vpop.f32.mrf.mxu1  ;;  %v3150_v62 = vmul.f32 -1.442695, %v2362_v43  ;;  %v6140_v29 = vld [vmem:[#allocation43_spill] sm:$0xff]  ;;  %v3775_v43 = vld [vmem:[#allocation5 + $0x64] ss:$16 sps:$4 sm:$0xff]  }
 0x63d   :  { %3569 = vpow2.f32 %v3149_v44  ;;  %v6142_v31 = vld [vmem:[#allocation48_spill] sm:$0xff] }
 0x63e   :  { %2520 = vmatpush1.bf16.msra.mxu0 %v6117_v27  ;;  %2561 = vmatpush1.bf16.msra.mxu1 %v6118_v17  ;;  %3571 = vpow2.f32 %v3150_v62  ;;  %v3772_v17 = vld [vmem:[#allocation5 + $0x8c] ss:$16 sps:$4 sm:$0xff]   ;;  %v3783_v62 = vld [vmem:[#allocation5 + $0x24] ss:$16 sps:$4 sm:$0xff]  }
 0x63f   :  { %2521 = vmatprep.subr.bf16.mxu0 %v6119_v12  ;;  %2562 = vmatprep.subr.bf16.mxu1 %v6120_v54  ;;  %v3773_v12 = vld [vmem:[#allocation5 + $0x80] ss:$16 sps:$4 sm:$0xff]   ;;  %v3774_v54 = vld [vmem:[#allocation5 + $0x88] ss:$16 sps:$4 sm:$0xff]  }
 0x642   :  { %2522 = vmatpush1.bf16.msra.mxu0 %v6121_v45  ;;  %2563 = vmatpush1.bf16.msra.mxu1 %v6122_v47  ;;  %v3779_v45 = vld [vmem:[#allocation5 + $0x44] ss:$16 sps:$4 sm:$0xff]   ;;  %v3780_v47 = vld [vmem:[#allocation5 + $0x4c] ss:$16 sps:$4 sm:$0xff]  }
 0x643   :  { %2523 = vmatprep.subr.bf16.mxu0 %v6123_v53  ;;  %2564 = vmatprep.subr.bf16.mxu1 %v6124_v39  ;;  %v3781_v53 = vld [vmem:[#allocation5 + $0x40] ss:$16 sps:$4 sm:$0xff]   ;;  %v3782_v39 = vld [vmem:[#allocation5 + $0x48] ss:$16 sps:$4 sm:$0xff]  }
 0x646   :  { %2524 = vmatpush1.bf16.msra.mxu0 %v6074_v16  ;;  %2565 = vmatpush1.bf16.msra.mxu1 %v6125_v63  ;;  %v6131_v16 = vld [vmem:[#allocation29_spill] sm:$0xff] }
 0x647   :  { %2525 = vmatprep.subr.bf16.mxu0 %v6077_v46  ;;  %2566 = vmatprep.subr.bf16.mxu1 %v6126_v21  ;;  %v6132_v46 = vld [vmem:[#allocation30_spill] sm:$0xff]  ;;  %v3784_v63 = vld [vmem:[#allocation5 + $0x2c] ss:$16 sps:$4 sm:$0xff]  }
 0x648   :  { %v3568_v42 = vpop.eup %3567  ;;  %v3785_v21 = vld [vmem:[#allocation5 + $0x20] ss:$16 sps:$4 sm:$0xff]  }
 0x649   :  { %v2369_v4 = vadd.f32 1.0, %v3568_v42  ;;  %v3786_v42 = vld [vmem:[#allocation5 + $0x28] ss:$16 sps:$4 sm:$0xff]  }
 0x64a   :  { %v3570_v20 = vpop.eup %3569  ;;  %2526 = vmatpush1.bf16.msra.mxu0 %v6128_v55  ;;  %2567 = vmatpush1.bf16.msra.mxu1 %v6129_v23  ;;  %v3790_v55 = vld [vmem:[#allocation5 + $0x8] ss:$16 sps:$4 sm:$0xff]   ;;  %v5265_v23 = vld [vmem:[#allocation7 + $0xe4] ss:$16 sps:$4 sm:$0xff]  }
 0x64b   :  { %3573 = vrcp.f32 %v2369_v4  ;;  %v2375_v58 = vadd.f32 1.0, %v3570_v20  ;;  %2527 = vmatprep.subr.bf16.mxu0 %v6130_v19  ;;  %2568 = vmatprep.subr.bf16.mxu1 %v6131_v16  ;;  %v3572_v9 = vpop.eup %3571  ;;  %v3788_v4 = vld [vmem:[#allocation5 + $0xc] ss:$16 sps:$4 sm:$0xff]   ;;  %v3789_v20 = vld [vmem:[#allocation5] ss:$16 sps:$4 sm:$0xff]  }
 0x64c   :  { %3575 = vtanh.f32 %v2360_v11  ;;  %v2382_v44 = vadd.f32 1.0, %v3572_v9  ;;  %v3787_v11 = vld [vmem:[#allocation5 + $0x4] ss:$16 sps:$4 sm:$0xff]   ;;  %v6155_v19 = vld [vmem:[#allocation77_spill] sm:$0xff] }
 0x64d   :  { %3577 = vrcp.f32 %v2375_v58  ;;  %v5268_v58 = vld [vmem:[#allocation7 + $0xec] ss:$16 sps:$4 sm:$0xff]   ;;  %v2395_v16 = vunpack.c.l.bf16 %v6155_v19 }
 0x64e   :  { %2528 = vmatpush2.bf16.msra.mxu0 %v6132_v46  ;;  %2569 = vmatpush2.bf16.msra.mxu1 %v6133_v41  ;;  %3579 = vrcp.f32 %v2382_v44  ;;  %v6156_v44 = vld [vmem:[#allocation78_spill] sm:$0xff] }
 0x64f   :  { %2529 = vmatprep.subr.bf16.mxu0 %v6134_v59  ;;  %2570 = vmatprep.subr.bf16.mxu1 %v6135_v14  ;;  %v2396_v14 = vunpack.c.h.bf16 %v6155_v19  ;;  %v5324_v19 = vld [vmem:[#allocation7 + $0x88] ss:$16 sps:$4 sm:$0xff]  }
 0x652   :  { %2530 = vmatpush2.bf16.msra.mxu0 %v6136_v3  ;;  %2571 = vmatpush2.bf16.msra.mxu1 %v6137_v26 }
 0x653   :  { %2531 = vmatprep.subr.bf16.mxu0 %v6089_v36  ;;  %2572 = vmatprep.subr.bf16.mxu1 %v6090_v22 }
 0x656   :  { %2532 = vmatpush2.bf16.msra.mxu0 %v6091_v51  ;;  %2573 = vmatpush2.bf16.msra.mxu1 %v6138_v8  ;;  %v6141_v51 = vld [vmem:[#allocation44_spill] sm:$0xff] }
 0x657   :  { %2533 = vmatprep.subr.bf16.mxu0 %v6139_v18  ;;  %2574 = vmatprep.subr.bf16.mxu1 %v6140_v29 }
 0x658   :  { %v3574_v52 = vpop.eup %3573 }
 0x659   :  { %v3576_v48 = vpop.eup %3575 }
 0x65a   :  { %v3578_v49 = vpop.eup %3577  ;;  %2534 = vmatpush2.bf16.msra.mxu0 %v4919_v0  ;;  %2575 = vmatpush2.bf16.msra.mxu1 %v4922_v34  ;;  %v2386_v36 = vmul.f32 %v3576_v48, %v3574_v52  ;;  %v6143_v34 = vld [vmem:[#allocation49_spill] sm:$0xff] }
 0x65b   :  { %v2385_v22 = vmul.f32 %v3578_v49, %v5082_v40  ;;  %2535 = vmatprep.subr.bf16.mxu0 %v4927_v57  ;;  %2576 = vmatprep.subr.bf16.mxu1 %v6141_v51  ;;  %v6144_v57 = vld [vmem:[#allocation51_spill] sm:$0xff]  ;;  %v6145_v0 = vld [vmem:[#allocation53_spill] sm:$0xff]  ;;  %v3580_v40 = vpop.eup %3579  ;;  %v2397_v51 = vunpack.c.l.bf16 %v6156_v44 }
 0x65d   :  { %v5229_v7 = vadd.f32 %v2386_v36, %v2385_v22  ;;  %v2398_v36 = vunpack.c.h.bf16 %v6156_v44  ;;  %v5352_v44 = vld [vmem:[#allocation7 + $0x24] ss:$16 sps:$4 sm:$0xff]  }
 0x65e   :  { %2536 = vmatpush2.bf16.msra.mxu0 %v6095_v13  ;;  %2577 = vmatpush2.bf16.msra.mxu1 %v6096_v25  ;;  %v6146_v25 = vld [vmem:[#allocation54_spill] sm:$0xff]  ;;  %v6147_v13 = vld [vmem:[#allocation55_spill] sm:$0xff] }
 0x65f   :  { %2537 = vmatprep.subr.bf16.mxu0 %v6097_v56  ;;  %2578 = vmatprep.subr.bf16.mxu1 %v6142_v31  ;;  %3581 = vtanh.f32 %v5229_v7  ;;  %v6148_v56 = vld [vmem:[#allocation72_spill] sm:$0xff] }
 0x662   :  { %2538 = vmatpush2.bf16.msra.mxu0 %v6143_v34  ;;  %2579 = vmatpush2.bf16.msra.mxu1 %v6100_v50 }
 0x663   :  { %2539 = vmatprep.subr.bf16.mxu0 %v6144_v57  ;;  %2580 = vmatprep.subr.bf16.mxu1 %v6102_v28 }
 0x666   :  { %2540 = vmatpush2.bf16.msra.mxu0 %v6145_v0  ;;  %2581 = vmatpush2.bf16.msra.mxu1 %v4961_v2  ;;  %v6150_v2 = vld [vmem:[#allocation76_spill] sm:$0xff] }
 0x667   :  { %2541 = vmatprep.subr.bf16.mxu0 %v4964_v32  ;;  %2582 = vmatprep.subr.bf16.mxu1 %v6146_v25  ;;  %v6151_v32 = vmov 0  }
 0x66a   :  { %2542 = vmatpush2.bf16.msra.mxu0 %v4970_v10  ;;  %2583 = vmatpush2.bf16.msra.mxu1 %v6147_v13  ;;  %v6149_v10 = vld [vmem:[#allocation73_spill] sm:$0xff] }
 0x66b   :  { %2627 = vmatprep.subr.bf16.mxu0 %v6148_v56  ;;  %2668 = vmatprep.subr.bf16.mxu1 %v5102_v37  ;;  %v6152_v37 = vld [vmem:[#allocation18_spill] sm:$0xff] }
 0x66c   :  { %v3582_v50 = vpop.eup %3581 }
 0x66d   :  { %v2389_v27 = vmul.f32 %v3582_v50, %v3580_v40 }
 0x66f   :  { %3151 = vst [vmem:[%s5580_s7 + $0x20] sm:$0xff] %v2389_v27  ;;  %v2510_v28 = vpack.c.bf16 %v2389_v27, %v2389_v27 }
 0x671   :  { %2543 = vmatprep.mubr.bf16.mxu0 %v2510_v28  ;;  %2584 = vmatprep.mubr.bf16.mxu1 %v2510_v28 }
 0x672   :  { %2544 = vmatmul.mubr.bf16.vlgmr.msra.gmra.mxu0 %v5172_v24  ;;  %2585 = vmatmul.mubr.bf16.vlgmr.msra.gmra.mxu1 %v5172_v24  ;;  %v6153_v24 = vld [vmem:[#allocation19_spill] sm:$0xff] }
 0x673   :  { %2628 = vmatpush1.bf16.msra.mxu0 %v5110_v33  ;;  %2669 = vmatpush1.bf16.msra.mxu1 %v5113_v1  ;;  %v6154_v33 = vld [vmem:[#allocation20_spill] sm:$0xff] }
 0x674   :  { %2629 = vmatprep.subr.bf16.mxu0 %v6149_v10  ;;  %2670 = vmatprep.subr.bf16.mxu1 %v6150_v2  ;;  %v3771_v1 = vld [vmem:[#allocation5 + $0x84] ss:$16 sps:$4 sm:$0xff]  }
 0x675   :  { %2659 = vmatprep.mubr.bf16.mxu0 %v6151_v32  ;;  %2700 = vmatprep.mubr.bf16.mxu1 %v6151_v32 }
 0x677   :  { %2630 = vmatpush1.bf16.msra.mxu0 %v5124_v38  ;;  %2671 = vmatpush1.bf16.msra.mxu1 %v5127_v30  ;;  %v3776_v38 = vld [vmem:[#allocation5 + $0x6c] ss:$16 sps:$4 sm:$0xff]   ;;  %v3777_v30 = vld [vmem:[#allocation5 + $0x60] ss:$16 sps:$4 sm:$0xff]  }
 0x678   :  { %2631 = vmatprep.subr.bf16.mxu0 %v5130_v61  ;;  %2672 = vmatprep.subr.bf16.mxu1 %v6152_v37  ;;  %v3778_v61 = vld [vmem:[#allocation5 + $0x68] ss:$16 sps:$4 sm:$0xff]  }
 0x67b   :  { %2632 = vmatpush1.bf16.msra.mxu0 %v6153_v24  ;;  %2673 = vmatpush1.bf16.msra.mxu1 %v6154_v33 }
 0x67c   :  { %2633 = vmatprep.subr.bf16.mxu0 %v3771_v1  ;;  %2674 = vmatprep.subr.bf16.mxu1 %v3772_v17  ;;  %v5283_v17 = vld [vmem:[#allocation7 + $0xe0] ss:$16 sps:$4 sm:$0xff]  }
 0x67f   :  { %2634 = vmatpush1.bf16.msra.mxu0 %v3773_v12  ;;  %2675 = vmatpush1.bf16.msra.mxu1 %v3774_v54  ;;  %v5286_v12 = vld [vmem:[#allocation7 + $0xe8] ss:$16 sps:$4 sm:$0xff]   ;;  %v5292_v54 = vld [vmem:[#allocation7 + $0xcc] ss:$16 sps:$4 sm:$0xff]  }
 0x680   :  { %2635 = vmatprep.subr.bf16.mxu0 %v3775_v43  ;;  %2676 = vmatprep.subr.bf16.mxu1 %v3776_v38  ;;  %v5295_v43 = vld [vmem:[#allocation7 + $0xc0] ss:$16 sps:$4 sm:$0xff]   ;;  %v5298_v38 = vld [vmem:[#allocation7 + $0xc8] ss:$16 sps:$4 sm:$0xff]  }
 0x683   :  { %2636 = vmatpush1.bf16.msra.mxu0 %v3777_v30  ;;  %2677 = vmatpush1.bf16.msra.mxu1 %v3778_v61  ;;  %v5301_v30 = vld [vmem:[#allocation7 + $0xa4] ss:$16 sps:$4 sm:$0xff]   ;;  %v5304_v61 = vld [vmem:[#allocation7 + $0xac] ss:$16 sps:$4 sm:$0xff]  }
 0x684   :  { %2637 = vmatprep.subr.bf16.mxu0 %v3779_v45  ;;  %2678 = vmatprep.subr.bf16.mxu1 %v3780_v47  ;;  %v5307_v45 = vld [vmem:[#allocation7 + $0xa0] ss:$16 sps:$4 sm:$0xff]   ;;  %v5310_v47 = vld [vmem:[#allocation7 + $0xa8] ss:$16 sps:$4 sm:$0xff]  }
 0x687   :  { %2638 = vmatpush1.bf16.msra.mxu0 %v3781_v53  ;;  %2679 = vmatpush1.bf16.msra.mxu1 %v3782_v39 }
 0x688   :  { %2639 = vmatprep.subr.bf16.mxu0 %v3783_v62  ;;  %2680 = vmatprep.subr.bf16.mxu1 %v3784_v63  ;;  %v5313_v62 = vld [vmem:[#allocation7 + $0x84] ss:$16 sps:$4 sm:$0xff]   ;;  %v5316_v63 = vld [vmem:[#allocation7 + $0x8c] ss:$16 sps:$4 sm:$0xff]  }
 0x68b   :  { %2640 = vmatpush1.bf16.msra.mxu0 %v3785_v21  ;;  %2681 = vmatpush1.bf16.msra.mxu1 %v3786_v42 }
 0x68c   :  { %2641 = vmatprep.subr.bf16.mxu0 %v3787_v11  ;;  %2682 = vmatprep.subr.bf16.mxu1 %v3788_v4 }
 0x68f   :  { %2642 = vmatpush1.bf16.msra.mxu0 %v3789_v20  ;;  %2683 = vmatpush1.bf16.msra.mxu1 %v3790_v55  ;;  %v5321_v55 = vld [vmem:[#allocation7 + $0x80] ss:$16 sps:$4 sm:$0xff]  }
 0x690   :  { %2738 = vmatprep.subr.bf16.mxu0 %v5265_v23  ;;  %2779 = vmatprep.subr.bf16.mxu1 %v5268_v58 }
 0x6ed   :  { %v2434_v46 = vpop.f32.mrf.mxu0  ;;  %v2475_v41 = vpop.f32.mrf.mxu1 }
 0x6ee   :  { %v2482_v59 = vadd.f32 %v2434_v46, %v2395_v16  ;;  %v2484_v31 = vadd.f32 %v2475_v41, %v2397_v51  ;;  %v5327_v41 = vld [vmem:[#allocation7 + $0x64] ss:$16 sps:$4 sm:$0xff]   ;;  %v5361_v51 = vld [vmem:[#allocation7 + $0x28] ss:$16 sps:$4 sm:$0xff]  }
 0x6ef   :  { %v2436_v3 = vpop.f32.mrf.mxu0  ;;  %v2477_v26 = vpop.f32.mrf.mxu1 }
 0x6f0   :  { %v3152_v8 = vmul.f32 -1.442695, %v2482_v59  ;;  %v2483_v9 = vadd.f32 %v2436_v3, %v2396_v14  ;;  %v2485_v22 = vadd.f32 %v2477_v26, %v2398_v36  ;;  %v5330_v59 = vld [vmem:[#allocation7 + $0x6c] ss:$16 sps:$4 sm:$0xff]  }
 0x6f1   :  { %v2438_v18 = vpop.f32.mrf.mxu0  ;;  %v2479_v29 = vpop.f32.mrf.mxu1  ;;  %v5355_v36 = vld [vmem:[#allocation7 + $0x2c] ss:$16 sps:$4 sm:$0xff]  }
 0x6f2   :  { %3583 = vpow2.f32 %v3152_v8  ;;  %v3153_v52 = vmul.f32 -1.442695, %v2483_v9  ;;  %v3154_v34 = vmul.f32 -1.442695, %v2485_v22  ;;  %v5333_v8 = vld [vmem:[#allocation7 + $0x60] ss:$16 sps:$4 sm:$0xff]  }
 0x6f3   :  { %v2439_v48 = vpop.f32.mrf.mxu0  ;;  %v2480_v49 = vpop.f32.mrf.mxu1  ;;  %v5336_v9 = vld [vmem:[#allocation7 + $0x68] ss:$16 sps:$4 sm:$0xff]   ;;  %v5339_v18 = vld [vmem:[#allocation7 + $0x44] ss:$16 sps:$4 sm:$0xff]   ;;  %v5342_v29 = vld [vmem:[#allocation7 + $0x4c] ss:$16 sps:$4 sm:$0xff]  }
 0x6f4   :  { %3585 = vpow2.f32 %v3153_v52  ;;  %v5345_v52 = vld [vmem:[#allocation7 + $0x40] ss:$16 sps:$4 sm:$0xff]   ;;  %v5348_v48 = vld [vmem:[#allocation7 + $0x48] ss:$16 sps:$4 sm:$0xff]  }
 0x6f5   :  { %3587 = vtanh.f32 %v2484_v31  ;;  %v5358_v22 = vld [vmem:[#allocation7 + $0x20] ss:$16 sps:$4 sm:$0xff]  }
 0x6f6   :  { %3589 = vpow2.f32 %v3154_v34  ;;  %v5364_v34 = vld [vmem:[#allocation7 + $0x4] ss:$16 sps:$4 sm:$0xff]  }
 0x6ff   :  { %v3584_v57 = vpop.eup %3583 }
 0x700   :  { %v2489_v0 = vadd.f32 1.0, %v3584_v57  ;;  %v5367_v57 = vld [vmem:[#allocation7 + $0xc] ss:$16 sps:$4 sm:$0xff]  }
 0x701   :  { %v3586_v25 = vpop.eup %3585 }
 0x702   :  { %3591 = vrcp.f32 %v2489_v0  ;;  %v2495_v13 = vadd.f32 1.0, %v3586_v25  ;;  %v3588_v40 = vpop.eup %3587 }
 0x703   :  { %v3590_v56 = vpop.eup %3589 }
 0x704   :  { %3593 = vrcp.f32 %v2495_v13  ;;  %v2502_v10 = vadd.f32 1.0, %v3590_v56  ;;  %v5374_v56 = vld [vmem:[#allocation7 + $0x8] ss:$16 sps:$4 sm:$0xff]  }
 0x706   :  { %3595 = vrcp.f32 %v2502_v10 }
 0x70f   :  { %v3592_v50 = vpop.eup %3591 }
 0x710   :  { %v2506_v27 = vmul.f32 %v3592_v50, %v3588_v40  ;;  %v5371_v40 = vld [vmem:[#allocation7] ss:$16 sps:$4 sm:$0xff]  }
 0x711   :  { %v3594_v28 = vpop.eup %3593 }
 0x712   :  { %v2505_v2 = vmul.f32 %v3594_v28, %v5169_v35  ;;  %v5289_v35 = vld [vmem:[#allocation7 + $0xc4] ss:$16 sps:$4 sm:$0xff]   ;;  %v5380_v28 = vld [vmem:[#allocation7 + $0x1ec] ss:$16 sps:$4 sm:$0xff]  }
 0x713   :  { %v3596_v37 = vpop.eup %3595 }
 0x714   :  { %v5276_v32 = vadd.f32 %v2506_v27, %v2505_v2  ;;  %v5377_v27 = vld [vmem:[#allocation7 + $0x1e4] ss:$16 sps:$4 sm:$0xff]   ;;  %v5383_v2 = vld [vmem:[#allocation7 + $0x1e0] ss:$16 sps:$4 sm:$0xff]  }
 0x716   :  { %6157 = vst [vmem:[#allocation21_spill] sm:$0xff] %v5276_v32  ;;  %3597 = vtanh.f32 %v5276_v32  ;;  %v5471_v32 = vld [vmem:[#allocation7 + $0x100] ss:$16 sps:$4 sm:$0xff]  }
 0x723   :  { %v3598_v24 = vpop.eup %3597 }
 0x724   :  { %v2509_v33 = vmul.f32 %v3598_v24, %v3596_v37  ;;  %v5386_v37 = vld [vmem:[#allocation7 + $0x1e8] ss:$16 sps:$4 sm:$0xff]   ;;  %v5389_v24 = vld [vmem:[#allocation7 + $0x1c4] ss:$16 sps:$4 sm:$0xff]  }
 0x726   :  { %v5279_v1 = vpack.c.bf16 %v2509_v33, %v2509_v33  ;;  %v5392_v33 = vld [vmem:[#allocation7 + $0x1cc] ss:$16 sps:$4 sm:$0xff]  }
 0x728   :  { %2660 = vmatmul.mubr.bf16.vlgmr.msra.gmra.mxu0 %v5279_v1  ;;  %2701 = vmatmul.mubr.bf16.vlgmr.msra.gmra.mxu1 %v5279_v1 }
 0x729   :  { %2739 = vmatpush1.bf16.msra.mxu0 %v5283_v17  ;;  %2780 = vmatpush1.bf16.msra.mxu1 %v5286_v12 }
 0x72a   :  { %2740 = vmatprep.subr.bf16.mxu0 %v5289_v35  ;;  %2781 = vmatprep.subr.bf16.mxu1 %v5292_v54 }
 0x72d   :  { %2741 = vmatpush1.bf16.msra.mxu0 %v5295_v43  ;;  %2782 = vmatpush1.bf16.msra.mxu1 %v5298_v38 }
 0x72e   :  { %2742 = vmatprep.subr.bf16.mxu0 %v5301_v30  ;;  %2783 = vmatprep.subr.bf16.mxu1 %v5304_v61 }
 0x731   :  { %2743 = vmatpush1.bf16.msra.mxu0 %v5307_v45  ;;  %2784 = vmatpush1.bf16.msra.mxu1 %v5310_v47 }
 0x732   :  { %v2545_v53 = vpop.f32.mrf.mxu0  ;;  %v2586_v39 = vpop.f32.mrf.mxu1  ;;  %2744 = vmatprep.subr.bf16.mxu0 %v5313_v62  ;;  %2785 = vmatprep.subr.bf16.mxu1 %v5316_v63 }
 0x733   :  { %v2546_v21 = vadd.f32 %v2545_v53, %v6061_v60  ;;  %v2587_v25 = vadd.f32 %v2586_v39, %v6127_v15  ;;  %v5395_v53 = vld [vmem:[#allocation7 + $0x1c0] ss:$16 sps:$4 sm:$0xff]   ;;  %v5398_v39 = vld [vmem:[#allocation7 + $0x1c8] ss:$16 sps:$4 sm:$0xff]   ;;  %v5443_v60 = vld [vmem:[#allocation7 + $0x14c] ss:$16 sps:$4 sm:$0xff]  }
 0x734   :  { %v2547_v42 = vpop.f32.mrf.mxu0  ;;  %v2588_v11 = vpop.f32.mrf.mxu1 }
 0x735   :  { %v3155_v4 = vmul.f32 -1.442695, %v2546_v21  ;;  %v2548_v20 = vadd.f32 %v2547_v42, %v6063_v6  ;;  %2745 = vmatpush1.bf16.msra.mxu0 %v5321_v55  ;;  %2786 = vmatpush1.bf16.msra.mxu1 %v5324_v19  ;;  %v2589_v49 = vadd.f32 %v2588_v11, %v6069_v5  ;;  %v5401_v21 = vld [vmem:[#allocation7 + $0x1a4] ss:$16 sps:$4 sm:$0xff]   ;;  %v5404_v42 = vld [vmem:[#allocation7 + $0x1ac] ss:$16 sps:$4 sm:$0xff]  }
 0x736   :  { %v2549_v16 = vpop.f32.mrf.mxu0  ;;  %v2590_v46 = vpop.f32.mrf.mxu1  ;;  %2746 = vmatprep.subr.bf16.mxu0 %v5327_v41  ;;  %2787 = vmatprep.subr.bf16.mxu1 %v5330_v59  ;;  %v5407_v11 = vld [vmem:[#allocation7 + $0x1a0] ss:$16 sps:$4 sm:$0xff]   ;;  %v5437_v6 = vld [vmem:[#allocation7 + $0x168] ss:$16 sps:$4 sm:$0xff]  }
 0x737   :  { %3599 = vpow2.f32 %v3155_v4  ;;  %v3156_v14 = vmul.f32 -1.442695, %v2548_v20  ;;  %v3157_v31 = vmul.f32 -1.442695, %v2589_v49  ;;  %v5410_v4 = vld [vmem:[#allocation7 + $0x1a8] ss:$16 sps:$4 sm:$0xff]  }
 0x738   :  { %v2550_v3 = vpop.f32.mrf.mxu0  ;;  %v2591_v26 = vpop.f32.mrf.mxu1  ;;  %v5413_v20 = vld [vmem:[#allocation7 + $0x184] ss:$16 sps:$4 sm:$0xff]   ;;  %v5416_v16 = vld [vmem:[#allocation7 + $0x18c] ss:$16 sps:$4 sm:$0xff]   ;;  %v5422_v49 = vld [vmem:[#allocation7 + $0x188] ss:$16 sps:$4 sm:$0xff]  }
 0x739   :  { %3601 = vpow2.f32 %v3156_v14  ;;  %2747 = vmatpush1.bf16.msra.mxu0 %v5333_v8  ;;  %2788 = vmatpush1.bf16.msra.mxu1 %v5336_v9  ;;  %v5419_v26 = vld [vmem:[#allocation7 + $0x180] ss:$16 sps:$4 sm:$0xff]  }
 0x73a   :  { %2748 = vmatprep.subr.bf16.mxu0 %v5339_v18  ;;  %2789 = vmatprep.subr.bf16.mxu1 %v5342_v29  ;;  %3603 = vpow2.f32 %v3157_v31  ;;  %v5434_v5 = vld [vmem:[#allocation7 + $0x160] ss:$16 sps:$4 sm:$0xff]  }
 0x73d   :  { %2749 = vmatpush1.bf16.msra.mxu0 %v5345_v52  ;;  %2790 = vmatpush1.bf16.msra.mxu1 %v5348_v48 }
 0x73e   :  { %2750 = vmatprep.subr.bf16.mxu0 %v5352_v44  ;;  %2791 = vmatprep.subr.bf16.mxu1 %v5355_v36 }
 0x741   :  { %2751 = vmatpush1.bf16.msra.mxu0 %v5358_v22  ;;  %2792 = vmatpush1.bf16.msra.mxu1 %v5361_v51 }
 0x742   :  { %2752 = vmatprep.subr.bf16.mxu0 %v5364_v34  ;;  %2793 = vmatprep.subr.bf16.mxu1 %v5367_v57 }
 0x744   :  { %v3600_v0 = vpop.eup %3599 }
 0x745   :  { %v2596_v13 = vadd.f32 1.0, %v3600_v0  ;;  %2753 = vmatpush1.bf16.msra.mxu0 %v5371_v40  ;;  %2794 = vmatpush1.bf16.msra.mxu1 %v5374_v56 }
 0x746   :  { %v3602_v50 = vpop.eup %3601  ;;  %2754 = vmatprep.subr.bf16.mxu0 %v5377_v27  ;;  %2795 = vmatprep.subr.bf16.mxu1 %v5380_v28 }
 0x747   :  { %3605 = vrcp.f32 %v2596_v13  ;;  %v2602_v10 = vadd.f32 1.0, %v3602_v50  ;;  %v3604_v46 = vpop.eup %3603  ;;  %v5428_v13 = vld [vmem:[#allocation7 + $0x16c] ss:$16 sps:$4 sm:$0xff]  }
 0x748   :  { %3607 = vtanh.f32 %v2587_v25  ;;  %v2609_v0 = vadd.f32 1.0, %v3604_v46  ;;  %v5425_v25 = vld [vmem:[#allocation7 + $0x164] ss:$16 sps:$4 sm:$0xff]  }
 0x749   :  { %3609 = vrcp.f32 %v2602_v10  ;;  %2755 = vmatpush2.bf16.msra.mxu0 %v5383_v2  ;;  %2796 = vmatpush2.bf16.msra.mxu1 %v5386_v37  ;;  %v5440_v46 = vld [vmem:[#allocation7 + $0x144] ss:$16 sps:$4 sm:$0xff]  }
 0x74a   :  { %2756 = vmatprep.subr.bf16.mxu0 %v5389_v24  ;;  %2797 = vmatprep.subr.bf16.mxu1 %v5392_v33  ;;  %3611 = vrcp.f32 %v2609_v0  ;;  %v5459_v0 = vld [vmem:[#allocation7 + $0x120] ss:$16 sps:$4 sm:$0xff]  }
 0x74b   :  { %6161 = vst [vmem:[#allocation71_spill] sm:$0xff] %v5459_v0 }
 0x74d   :  { %2757 = vmatpush2.bf16.msra.mxu0 %v5395_v53  ;;  %2798 = vmatpush2.bf16.msra.mxu1 %v5398_v39 }
 0x74e   :  { %2758 = vmatprep.subr.bf16.mxu0 %v5401_v21  ;;  %2799 = vmatprep.subr.bf16.mxu1 %v5404_v42 }
 0x751   :  { %2759 = vmatpush2.bf16.msra.mxu0 %v5407_v11  ;;  %2800 = vmatpush2.bf16.msra.mxu1 %v5410_v4 }
 0x752   :  { %2760 = vmatprep.subr.bf16.mxu0 %v5413_v20  ;;  %2801 = vmatprep.subr.bf16.mxu1 %v5416_v16 }
 0x754   :  { %v3606_v14 = vpop.eup %3605 }
 0x755   :  { %v3608_v3 = vpop.eup %3607  ;;  %2761 = vmatpush2.bf16.msra.mxu0 %v5419_v26  ;;  %2802 = vmatpush2.bf16.msra.mxu1 %v5422_v49 }
 0x756   :  { %v3610_v31 = vpop.eup %3609  ;;  %2762 = vmatprep.subr.bf16.mxu0 %v5425_v25  ;;  %2803 = vmatprep.subr.bf16.mxu1 %v5428_v13  ;;  %v2613_v50 = vmul.f32 %v3608_v3, %v3606_v14  ;;  %v5450_v14 = vld [vmem:[#allocation7 + $0x148] ss:$16 sps:$4 sm:$0xff]   ;;  %v5453_v3 = vld [vmem:[#allocation7 + $0x124] ss:$16 sps:$4 sm:$0xff]  }
 0x757   :  { %v2612_v10 = vmul.f32 %v3610_v31, %v5229_v7  ;;  %v5447_v7 = vld [vmem:[#allocation7 + $0x140] ss:$16 sps:$4 sm:$0xff]   ;;  %6159 = vst [vmem:[#allocation65_spill] sm:$0xff] %v5453_v3  ;;  %v5456_v31 = vld [vmem:[#allocation7 + $0x12c] ss:$16 sps:$4 sm:$0xff]  }
 0x758   :  { %6160 = vst [vmem:[#allocation70_spill] sm:$0xff] %v5456_v31 }
 0x759   :  { %v5432_v15 = vadd.f32 %v2613_v50, %v2612_v10  ;;  %2763 = vmatpush2.bf16.msra.mxu0 %v5434_v5  ;;  %2804 = vmatpush2.bf16.msra.mxu1 %v5437_v6  ;;  %v5462_v50 = vld [vmem:[#allocation7 + $0x128] ss:$16 sps:$4 sm:$0xff]   ;;  %v5465_v10 = vld [vmem:[#allocation7 + $0x104] ss:$16 sps:$4 sm:$0xff]  }
 0x75a   :  { %2764 = vmatprep.subr.bf16.mxu0 %v5440_v46  ;;  %2805 = vmatprep.subr.bf16.mxu1 %v5443_v60  ;;  %6162 = vst [vmem:[#allocation35_spill] sm:$0xff] %v5462_v50 }
 0x75b   :  { %6158 = vst [vmem:[#allocation64_spill] sm:$0xff] %v5432_v15  ;;  %3613 = vtanh.f32 %v5432_v15  ;;  %v5468_v15 = vld [vmem:[#allocation7 + $0x10c] ss:$16 sps:$4 sm:$0xff]  }
 0x75c   :  { %6163 = vst [vmem:[#allocation56_spill] sm:$0xff] %v5468_v15 }
 0x75d   :  { %2765 = vmatpush2.bf16.msra.mxu0 %v5447_v7  ;;  %2806 = vmatpush2.bf16.msra.mxu1 %v5450_v14 }
 0x75e   :  { %2766 = vmatprep.subr.bf16.mxu0 %v5453_v3  ;;  %2807 = vmatprep.subr.bf16.mxu1 %v5456_v31  ;;  %v5474_v31 = vld [vmem:[#allocation7 + $0x108] ss:$16 sps:$4 sm:$0xff]  }
 0x761   :  { %2767 = vmatpush2.bf16.msra.mxu0 %v5459_v0  ;;  %2808 = vmatpush2.bf16.msra.mxu1 %v5462_v50  ;;  %v3612_v50 = vpop.eup %3611 }
 0x762   :  { %2768 = vmatprep.subr.bf16.mxu0 %v5465_v10  ;;  %2809 = vmatprep.subr.bf16.mxu1 %v5468_v15 }
 0x765   :  { %2769 = vmatpush2.bf16.msra.mxu0 %v5471_v32  ;;  %2810 = vmatpush2.bf16.msra.mxu1 %v5474_v31 }
 0x766   :  { %2848 = vmatprep.subr.bf16.mxu0 %v5265_v23  ;;  %2889 = vmatprep.subr.bf16.mxu1 %v5268_v58  ;;  %v6165_v23 = vld [vmem:[#allocation70_spill] sm:$0xff]  ;;  %v6166_v58 = vld [vmem:[#allocation71_spill] sm:$0xff] }
 0x768   :  { %v3614_v0 = vpop.eup %3613 }
 0x769   :  { %v2616_v3 = vmul.f32 %v3614_v0, %v3612_v50  ;;  %v6179_v0 = vld [vmem:[#allocation10_spill] sm:$0xff] }
 0x76b   :  { %3158 = vst [vmem:[%s5580_s7 + $0x28] sm:$0xff] %v2616_v3  ;;  %v2737_v15 = vpack.c.bf16 %v2616_v3, %v2616_v3 }
 0x76d   :  { %2770 = vmatprep.mubr.bf16.mxu0 %v2737_v15  ;;  %2811 = vmatprep.mubr.bf16.mxu1 %v2737_v15  ;;  %v6164_v15 = vld [vmem:[#allocation65_spill] sm:$0xff] }
 0x76e   :  { %2771 = vmatmul.mubr.bf16.vlgmr.msra.gmra.mxu0 %v5279_v1  ;;  %2812 = vmatmul.mubr.bf16.vlgmr.msra.gmra.mxu1 %v5279_v1  ;;  %v6167_v1 = vld [vmem:[#allocation35_spill] sm:$0xff] }
 0x76f   :  { %2849 = vmatpush1.bf16.msra.mxu0 %v5283_v17  ;;  %2890 = vmatpush1.bf16.msra.mxu1 %v5286_v12  ;;  %v6171_v12 = vld [vmem:[#allocation12_spill] sm:$0xff] }
 0x770   :  { %2850 = vmatprep.subr.bf16.mxu0 %v5289_v35  ;;  %2891 = vmatprep.subr.bf16.mxu1 %v5292_v54  ;;  %v6172_v35 = vld [vmem:[#allocation82_spill] sm:$0xff] }
 0x771   :  { %v412_v54 = vadd.f32 %v6172_v35, %v6171_v12  ;;  %v6181_v12 = vld [vmem:[#allocation17_spill] sm:$0xff] }
 0x773   :  { %2851 = vmatpush1.bf16.msra.mxu0 %v5295_v43  ;;  %2892 = vmatpush1.bf16.msra.mxu1 %v5298_v38 }
 0x774   :  { %2852 = vmatprep.subr.bf16.mxu0 %v5301_v30  ;;  %2893 = vmatprep.subr.bf16.mxu1 %v5304_v61 }
 0x777   :  { %2853 = vmatpush1.bf16.msra.mxu0 %v5307_v45  ;;  %2894 = vmatpush1.bf16.msra.mxu1 %v5310_v47 }
 0x778   :  { %2854 = vmatprep.subr.bf16.mxu0 %v5313_v62  ;;  %2895 = vmatprep.subr.bf16.mxu1 %v5316_v63  ;;  %v6173_v62 = vld [vmem:[#allocation13_spill] sm:$0xff]  ;;  %v6174_v63 = vld [vmem:[#allocation79_spill] sm:$0xff] }
 0x77b   :  { %2855 = vmatpush1.bf16.msra.mxu0 %v5321_v55  ;;  %2896 = vmatpush1.bf16.msra.mxu1 %v5324_v19  ;;  %v483_v55 = vadd.f32 %v6174_v63, %v6173_v62  ;;  %v6175_v19 = vld [vmem:[#allocation14_spill] sm:$0xff] }
 0x77c   :  { %2856 = vmatprep.subr.bf16.mxu0 %v5327_v41  ;;  %2897 = vmatprep.subr.bf16.mxu1 %v5330_v59  ;;  %v6176_v41 = vld [vmem:[#allocation81_spill] sm:$0xff] }
 0x77f   :  { %2857 = vmatpush1.bf16.msra.mxu0 %v5333_v8  ;;  %2898 = vmatpush1.bf16.msra.mxu1 %v5336_v9 }
 0x780   :  { %2858 = vmatprep.subr.bf16.mxu0 %v5339_v18  ;;  %2899 = vmatprep.subr.bf16.mxu1 %v5342_v29 }
 0x783   :  { %2859 = vmatpush1.bf16.msra.mxu0 %v5345_v52  ;;  %2900 = vmatpush1.bf16.msra.mxu1 %v5348_v48 }
 0x784   :  { %2860 = vmatprep.subr.bf16.mxu0 %v5352_v44  ;;  %2901 = vmatprep.subr.bf16.mxu1 %v5355_v36 }
 0x787   :  { %2861 = vmatpush1.bf16.msra.mxu0 %v5358_v22  ;;  %2902 = vmatpush1.bf16.msra.mxu1 %v5361_v51 }
 0x788   :  { %2862 = vmatprep.subr.bf16.mxu0 %v5364_v34  ;;  %2903 = vmatprep.subr.bf16.mxu1 %v5367_v57 }
 0x78b   :  { %2863 = vmatpush1.bf16.msra.mxu0 %v5371_v40  ;;  %2904 = vmatpush1.bf16.msra.mxu1 %v5374_v56 }
 0x78c   :  { %2864 = vmatprep.subr.bf16.mxu0 %v5377_v27  ;;  %2905 = vmatprep.subr.bf16.mxu1 %v5380_v28 }
 0x78f   :  { %2865 = vmatpush2.bf16.msra.mxu0 %v5383_v2  ;;  %2906 = vmatpush2.bf16.msra.mxu1 %v5386_v37 }
 0x790   :  { %2866 = vmatprep.subr.bf16.mxu0 %v5389_v24  ;;  %2907 = vmatprep.subr.bf16.mxu1 %v5392_v33 }
 0x793   :  { %2867 = vmatpush2.bf16.msra.mxu0 %v5395_v53  ;;  %2908 = vmatpush2.bf16.msra.mxu1 %v5398_v39 }
 0x794   :  { %2868 = vmatprep.subr.bf16.mxu0 %v5401_v21  ;;  %2909 = vmatprep.subr.bf16.mxu1 %v5404_v42 }
 0x797   :  { %2869 = vmatpush2.bf16.msra.mxu0 %v5407_v11  ;;  %2910 = vmatpush2.bf16.msra.mxu1 %v5410_v4  ;;  %v6177_v11 = vld [vmem:[#allocation21_spill] sm:$0xff] }
 0x798   :  { %2870 = vmatprep.subr.bf16.mxu0 %v5413_v20  ;;  %2911 = vmatprep.subr.bf16.mxu1 %v5416_v16 }
 0x79b   :  { %2871 = vmatpush2.bf16.msra.mxu0 %v5419_v26  ;;  %2912 = vmatpush2.bf16.msra.mxu1 %v5422_v49 }
 0x79c   :  { %2872 = vmatprep.subr.bf16.mxu0 %v5425_v25  ;;  %2913 = vmatprep.subr.bf16.mxu1 %v5428_v13 }
 0x79f   :  { %2873 = vmatpush2.bf16.msra.mxu0 %v5434_v5  ;;  %2914 = vmatpush2.bf16.msra.mxu1 %v5437_v6  ;;  %v6168_v5 = vld [vmem:[#allocation56_spill] sm:$0xff] }
 0x7a0   :  { %2874 = vmatprep.subr.bf16.mxu0 %v5440_v46  ;;  %2915 = vmatprep.subr.bf16.mxu1 %v5443_v60  ;;  %v6169_v60 = vld [vmem:[#allocation11_spill] sm:$0xff]  ;;  %v6170_v6 = vld [vmem:[#allocation80_spill] sm:$0xff] }
 0x7a1   :  { %v410_v17 = vadd.f32 %v6170_v6, %v6169_v60  ;;  %v6178_v46 = vld [vmem:[#allocation15_spill] sm:$0xff] }
 0x7a3   :  { %2875 = vmatpush2.bf16.msra.mxu0 %v5447_v7  ;;  %2916 = vmatpush2.bf16.msra.mxu1 %v5450_v14  ;;  %v3188_v43 = vpack.c.bf16 %v412_v54, %v410_v17 }
 0x7a4   :  { %2876 = vmatprep.subr.bf16.mxu0 %v6164_v15  ;;  %2917 = vmatprep.subr.bf16.mxu1 %v6165_v23 }
 0x7a5   :  { %v2622_v38 = vunpack.c.l.bf16 %v3188_v43  ;;  %v2623_v47 = vunpack.c.h.bf16 %v3188_v43 }
 0x7a7   :  { %2877 = vmatpush2.bf16.msra.mxu0 %v6166_v58  ;;  %2918 = vmatpush2.bf16.msra.mxu1 %v6167_v1 }
 0x7a8   :  { %2878 = vmatprep.subr.bf16.mxu0 %v5465_v10  ;;  %2919 = vmatprep.subr.bf16.mxu1 %v6168_v5  ;;  %v6180_v5 = vld [vmem:[#allocation16_spill] sm:$0xff] }
 0x7ab   :  { %2879 = vmatpush2.bf16.msra.mxu0 %v5471_v32  ;;  %2920 = vmatpush2.bf16.msra.mxu1 %v5474_v31  ;;  %v485_v32 = vadd.f32 %v6176_v41, %v6175_v19 }
 0x7ad   :  { %v3189_v44 = vpack.c.bf16 %v485_v32, %v483_v55  ;;  %v6182_v55 = vld [vmem:[#allocation64_spill] sm:$0xff] }
 0x7af   :  { %v2625_v51 = vunpack.c.h.bf16 %v3189_v44  ;;  %v2624_v57 = vunpack.c.l.bf16 %v3189_v44 }
 0x7e8   :  { %v2661_v30 = vpop.f32.mrf.mxu0  ;;  %v2702_v61 = vpop.f32.mrf.mxu1 }
 0x7e9   :  { %v2709_v45 = vadd.f32 %v2661_v30, %v2622_v38  ;;  %v2711_v40 = vadd.f32 %v2702_v61, %v2624_v57 }
 0x7ea   :  { %v2663_v59 = vpop.f32.mrf.mxu0  ;;  %v2704_v8 = vpop.f32.mrf.mxu1 }
 0x7eb   :  { %v3159_v9 = vmul.f32 -1.442695, %v2709_v45  ;;  %v2710_v18 = vadd.f32 %v2663_v59, %v2623_v47  ;;  %v2712_v34 = vadd.f32 %v2704_v8, %v2625_v51 }
 0x7ec   :  { %v2665_v29 = vpop.f32.mrf.mxu0  ;;  %v2706_v52 = vpop.f32.mrf.mxu1 }
 0x7ed   :  { %3615 = vpow2.f32 %v3159_v9  ;;  %v3160_v48 = vmul.f32 -1.442695, %v2710_v18  ;;  %v3161_v56 = vmul.f32 -1.442695, %v2712_v34 }
 0x7ee   :  { %v2666_v36 = vpop.f32.mrf.mxu0  ;;  %v2707_v22 = vpop.f32.mrf.mxu1 }
 0x7ef   :  { %3617 = vpow2.f32 %v3160_v48 }
 0x7f0   :  { %3619 = vtanh.f32 %v2711_v40 }
 0x7f1   :  { %3621 = vpow2.f32 %v3161_v56 }
 0x7fa   :  { %v3616_v27 = vpop.eup %3615 }
 0x7fb   :  { %v2716_v28 = vadd.f32 1.0, %v3616_v27 }
 0x7fc   :  { %v3618_v2 = vpop.eup %3617 }
 0x7fd   :  { %3623 = vrcp.f32 %v2716_v28  ;;  %v2722_v37 = vadd.f32 1.0, %v3618_v2  ;;  %v3620_v24 = vpop.eup %3619 }
 0x7fe   :  { %v3622_v33 = vpop.eup %3621 }
 0x7ff   :  { %3625 = vrcp.f32 %v2722_v37  ;;  %v2729_v42 = vadd.f32 1.0, %v3622_v33 }
 0x801   :  { %3627 = vrcp.f32 %v2729_v42 }
 0x80a   :  { %v3624_v53 = vpop.eup %3623 }
 0x80b   :  { %v2733_v39 = vmul.f32 %v3624_v53, %v3620_v24 }
 0x80c   :  { %v3626_v21 = vpop.eup %3625 }
 0x80d   :  { %v2732_v4 = vmul.f32 %v3626_v21, %v6177_v11 }
 0x80e   :  { %v3628_v16 = vpop.eup %3627 }
 0x80f   :  { %v2734_v20 = vadd.f32 %v2733_v39, %v2732_v4 }
 0x811   :  { %3629 = vtanh.f32 %v2734_v20 }
 0x81e   :  { %v3630_v26 = vpop.eup %3629 }
 0x81f   :  { %v2736_v49 = vmul.f32 %v3630_v26, %v3628_v16 }
 0x821   :  { %2956 = vst [vmem:[%s5581_s8] sm:$0xff] %v2736_v49  ;;  %v2846_v18 = vpack.c.bf16 %v2736_v49, %v2736_v49 }
 0x82e   :  { %v2772_v25 = vpop.f32.mrf.mxu0  ;;  %v2813_v13 = vpop.f32.mrf.mxu1 }
 0x82f   :  { %v2773_v7 = vadd.f32 %v2772_v25, %v6178_v46  ;;  %v2814_v35 = vadd.f32 %v2813_v13, %v6181_v12 }
 0x830   :  { %v2774_v14 = vpop.f32.mrf.mxu0  ;;  %v2815_v3 = vpop.f32.mrf.mxu1 }
 0x831   :  { %v3162_v31 = vmul.f32 -1.442695, %v2773_v7  ;;  %v2775_v50 = vadd.f32 %v2774_v14, %v6179_v0  ;;  %v2816_v60 = vadd.f32 %v2815_v3, %v6180_v5 }
 0x832   :  { %v2776_v10 = vpop.f32.mrf.mxu0  ;;  %v2817_v15 = vpop.f32.mrf.mxu1 }
 0x833   :  { %3631 = vpow2.f32 %v3162_v31  ;;  %v3163_v23 = vmul.f32 -1.442695, %v2775_v50  ;;  %v3164_v6 = vmul.f32 -1.442695, %v2816_v60 }
 0x834   :  { %v2777_v58 = vpop.f32.mrf.mxu0  ;;  %v2818_v1 = vpop.f32.mrf.mxu1 }
 0x835   :  { %3633 = vpow2.f32 %v3163_v23 }
 0x836   :  { %3635 = vpow2.f32 %v3164_v6 }
 0x840   :  { %v3632_v17 = vpop.eup %3631 }
 0x841   :  { %v2823_v54 = vadd.f32 1.0, %v3632_v17 }
 0x842   :  { %v3634_v43 = vpop.eup %3633 }
 0x843   :  { %3637 = vrcp.f32 %v2823_v54  ;;  %v2829_v38 = vadd.f32 1.0, %v3634_v43  ;;  %v3636_v30 = vpop.eup %3635 }
 0x844   :  { %3639 = vtanh.f32 %v2814_v35  ;;  %v2836_v62 = vadd.f32 1.0, %v3636_v30 }
 0x845   :  { %3641 = vrcp.f32 %v2829_v38 }
 0x846   :  { %3643 = vrcp.f32 %v2836_v62 }
 0x850   :  { %v3638_v61 = vpop.eup %3637 }
 0x851   :  { %v3640_v45 = vpop.eup %3639 }
 0x852   :  { %v3642_v47 = vpop.eup %3641  ;;  %v2840_v63 = vmul.f32 %v3640_v45, %v3638_v61 }
 0x853   :  { %v2839_v19 = vmul.f32 %v3642_v47, %v6182_v55  ;;  %v3644_v32 = vpop.eup %3643 }
 0x855   :  { %v2841_v41 = vadd.f32 %v2840_v63, %v2839_v19 }
 0x857   :  { %3645 = vtanh.f32 %v2841_v41 }
 0x864   :  { %v3646_v59 = vpop.eup %3645 }
 0x865   :  { %v2843_v8 = vmul.f32 %v3646_v59, %v3644_v32 }
 0x867   :  { %3165 = vst [vmem:[%s5580_s7 + $0x30] sm:$0xff] %v2843_v8  ;;  %v2847_v9 = vpack.c.bf16 %v2843_v8, %v2843_v8 }
 0x869   :  { %2880 = vmatprep.mubr.bf16.mxu0 %v2847_v9  ;;  %2921 = vmatprep.mubr.bf16.mxu1 %v2847_v9 }
 0x86a   :  { %2881 = vmatmul.mubr.bf16.vlgmr.msra.gmra.mxu0 %v2846_v18  ;;  %2922 = vmatmul.mubr.bf16.vlgmr.msra.gmra.mxu1 %v2846_v18 }
 0x92a   :  { %v2882_v29 = vpop.f32.mrf.mxu0  ;;  %v2923_v52 = vpop.f32.mrf.mxu1 }
 0x92b   :  { %v2883_v48 = vadd.f32 %v2882_v29, %v6178_v46  ;;  %v2924_v24 = vadd.f32 %v2923_v52, %v6181_v12 }
 0x92c   :  { %v2884_v44 = vpop.f32.mrf.mxu0  ;;  %v2925_v36 = vpop.f32.mrf.mxu1 }
 0x92d   :  { %v3166_v22 = vmul.f32 -1.442695, %v2883_v48  ;;  %v2885_v51 = vadd.f32 %v2884_v44, %v6179_v0  ;;  %v2926_v28 = vadd.f32 %v2925_v36, %v6180_v5 }
 0x92e   :  { %v2886_v34 = vpop.f32.mrf.mxu0  ;;  %v2927_v57 = vpop.f32.mrf.mxu1 }
 0x92f   :  { %3647 = vpow2.f32 %v3166_v22  ;;  %v3167_v40 = vmul.f32 -1.442695, %v2885_v51  ;;  %v3168_v2 = vmul.f32 -1.442695, %v2926_v28 }
 0x930   :  { %v2887_v56 = vpop.f32.mrf.mxu0  ;;  %v2928_v27 = vpop.f32.mrf.mxu1 }
 0x931   :  { %3649 = vpow2.f32 %v3167_v40 }
 0x932   :  { %3651 = vpow2.f32 %v3168_v2 }
 0x93c   :  { %v3648_v37 = vpop.eup %3647 }
 0x93d   :  { %v2933_v33 = vadd.f32 1.0, %v3648_v37 }
 0x93e   :  { %v3650_v53 = vpop.eup %3649 }
 0x93f   :  { %3653 = vrcp.f32 %v2933_v33  ;;  %v2939_v39 = vadd.f32 1.0, %v3650_v53  ;;  %v3652_v21 = vpop.eup %3651 }
 0x940   :  { %3655 = vtanh.f32 %v2924_v24  ;;  %v2946_v20 = vadd.f32 1.0, %v3652_v21 }
 0x941   :  { %3657 = vrcp.f32 %v2939_v39 }
 0x942   :  { %3659 = vrcp.f32 %v2946_v20 }
 0x94c   :  { %v3654_v42 = vpop.eup %3653 }
 0x94d   :  { %v3656_v11 = vpop.eup %3655 }
 0x94e   :  { %v3658_v4 = vpop.eup %3657  ;;  %v2950_v16 = vmul.f32 %v3656_v11, %v3654_v42 }
 0x94f   :  { %v2949_v26 = vmul.f32 %v3658_v4, %v2841_v41  ;;  %v3660_v25 = vpop.eup %3659 }
 0x951   :  { %v2951_v49 = vadd.f32 %v2950_v16, %v2949_v26 }
 0x953   :  { %3661 = vtanh.f32 %v2951_v49 }
 0x960   :  { %v3662_v13 = vpop.eup %3661 }
 0x961   :  { %v2953_v46 = vmul.f32 %v3662_v13, %v3660_v25 }
 0x963   :  { %3169 = vst [vmem:[%s5580_s7 + $0x38] sm:$0xff] %v2953_v46 }
 0x964   :  { %2965 = vsyncpa [#allocation4], 1 }
 0x965   :  { %2966 = vsyncpa [#allocation6], 1 }

</bundles_post_ra>
